<compile_context>
chip_gen: v6e
topology: v6e:2x2x1
jax: 0.10.0
libtpu: 0.0.40
codegen_flags: <defaults>
</compile_context>

<pallas_src>
import functools

import jax
import jax.numpy as jnp
import numpy as np
from jax.experimental import pallas as pl
from jax.experimental.pallas import tpu as pltpu

_HIGH = jax.lax.Precision.HIGHEST


# ------------------------------ fused kernel ------------------------------- #

def _agcrn_cell_kernel(s_ref, x_ref, st_ref,
                       wxg_ref, wsg_ref, bg_ref,
                       wxu_ref, wsu_ref, bu_ref,
                       h_ref, *, cheb_k, batch):
    # s_ref:    (N, N)               cdt  (bf16 fast path / f32 check path)
    # x_ref:    (N, Bb*Cin)          f32  node-major, batch folded into lanes
    # st_ref:   (N, Bb*H)            f32
    # wx*_ref:  (K, N, Cin, c_out)   cdt  per-node weights, x row-block
    # ws*_ref:  (K, N, H,   c_out)   cdt  per-node weights, state row-block
    # b*_ref:   (N, c_out)           f32  per-node bias
    # h_ref:    (N, Bb*H)            f32
    n = s_ref.shape[0]
    b = batch
    c_in = x_ref.shape[1] // b
    h_dim = st_ref.shape[1] // b
    cdt = s_ref.dtype                                  # MXU operand dtype

    s = s_ref[...]
    x_flat = x_ref[...]
    st_flat = st_ref[...]

    def cheb_terms(feat_f32):
        # Chebyshev recursion on the propagated FEATURES (no (K,N,N) stack):
        #   t0 = X (no matmul), t1 = S@X, tk = 2*S@t_{k-1} - t_{k-2}.
        # Recursion arithmetic stays f32; each term is cast to `cdt` once.
        terms = [feat_f32.astype(cdt)]
        prev_f32, cur_f32 = None, feat_f32
        for _ in range(1, cheb_k):
            if prev_f32 is None:
                nxt = jnp.dot(s, terms[0], preferred_element_type=jnp.float32)
            else:
                nxt = (2.0 * jnp.dot(s, terms[-1],
                                     preferred_element_type=jnp.float32)
                       - prev_f32)
            prev_f32, cur_f32 = cur_f32, nxt
            terms.append(nxt.astype(cdt))
        return terms

    def contract(terms, w_ref, ci, co):
        # sum_k  (N, Bb, ci) @ (N, ci, co)  -> (N, Bb, co), batched over nodes.
        acc = None
        for k in range(cheb_k):
            t3 = terms[k].reshape(n, b, ci)
            part = jax.lax.dot_general(
                t3, w_ref[k],
                dimension_numbers=(((2,), (1,)), ((0,), (0,))),
                preferred_element_type=jnp.float32)
            acc = part if acc is None else acc + part
        return acc

    # Propagated x columns are shared by the gate and the candidate paths.
    gx = cheb_terms(x_flat)
    gs = cheb_terms(st_flat)

    # gate: z, r = split(sigmoid(AVWGCN([x, state])))
    zr = jax.nn.sigmoid(contract(gx, wxg_ref, c_in, 2 * h_dim)
                        + contract(gs, wsg_ref, h_dim, 2 * h_dim)
                        + bg_ref[...][:, None, :])
    z = zr[..., :h_dim]
    r = zr[..., h_dim:]

    # candidate: hc = tanh(AVWGCN([x, r*state])); x contribution (gx) reused.
    st3 = st_flat.reshape(n, b, h_dim)
    rs_terms = cheb_terms((r * st3).reshape(n, b * h_dim))
    hc = jnp.tanh(contract(gx, wxu_ref, c_in, h_dim)
                  + contract(rs_terms, wsu_ref, h_dim, h_dim)
                  + bu_ref[...][:, None, :])

    # fused GRU combine, lane-dense store.
    h = z * st3 + (1.0 - z) * hc
    h_ref[...] = h.reshape(n, b * h_dim).astype(h_ref.dtype)


# ------------------------------ JAX wrappers ------------------------------- #

def precompute_cell_statics(node_embedding, params, *, c_in,
                            compute_dtype=jnp.bfloat16):
    """Per-forward-pass prep, hoisted out of the per-timestep kernel.

    E is constant across timesteps, so the adaptive support and the per-node
    (D-precombined) weights / biases are computed once here in plain JAX and
    reused by every timestep / batch-grid step inside the kernel.
    """
    e = node_embedding.astype(jnp.float32)
    logits = jnp.matmul(e, e.T, precision=_HIGH)
    support = jax.nn.softmax(jnp.maximum(logits, 0.0), axis=1)

    def per_node(wpool):
        # (D, K, Cin+H, c_out) -> (K, N, Cin+H, c_out), split into x/state rows
        w = jnp.einsum('nd,dkio->knio', e, wpool, precision=_HIGH)
        return (w[:, :, :c_in, :].astype(compute_dtype),
                w[:, :, c_in:, :].astype(compute_dtype))

    wx_g, ws_g = per_node(params['gate_w'])
    wx_u, ws_u = per_node(params['update_w'])
    return {
        'support': support.astype(compute_dtype),
        'wx_gate': wx_g, 'ws_gate': ws_g,
        'b_gate': jnp.matmul(e, params['gate_b'], precision=_HIGH).astype(jnp.float32),
        'wx_update': wx_u, 'ws_update': ws_u,
        'b_update': jnp.matmul(e, params['update_b'], precision=_HIGH).astype(jnp.float32),
    }


def agcrn_cell_forward(x, state, statics, *, cheb_k, num_batch_blocks=1):
    """AGCRNCell forward: x (B,N,Cin), state (B,N,H) -> h (B,N,H)."""
    b, n, c_in = x.shape
    h_dim = state.shape[-1]
    assert b % num_batch_blocks == 0, "batch must divide evenly into blocks"
    bb = b // num_batch_blocks
    # For v7x, pick num_batch_blocks >= 2 (so both TensorCores work) with
    # bb*Cin and bb*H multiples of 128 so batch blocks stay lane-aligned; at
    # these tiny demo shapes a single whole-batch block is used.

    # Node-major, lane-dense layout (B folded into the last dim).  In a full
    # sequence model this transpose is done ONCE outside the time loop and the
    # recurrent state is kept in this layout between steps.
    xt = jnp.transpose(x, (1, 0, 2)).reshape(n, b * c_in)
    stt = jnp.transpose(state, (1, 0, 2)).reshape(n, b * h_dim)

    cdt_bytes = statics['support'].dtype.itemsize
    # Rough VMEM accounting: double-buffered per-block tensors + resident
    # statics + in-kernel f32/cdt intermediates, with headroom; clamp [16,64]MiB.
    est = (2 * (n * bb * (c_in + 2 * h_dim)) * 4
           + (n * n + cheb_k * n * (c_in + h_dim) * 3 * h_dim) * cdt_bytes
           + n * 3 * h_dim * 4
           + cheb_k * n * bb * (c_in + 2 * h_dim) * (4 + cdt_bytes)
           + 8 * n * bb * h_dim * 4)
    vmem_limit = int(min(max(4 * est, 16 * 1024 * 1024), 64 * 1024 * 1024))

    flops = int((2 * (cheb_k - 1) * n * n * bb * (c_in + 2 * h_dim)          # S props
                 + 2 * n * bb * cheb_k * (c_in + h_dim) * 3 * h_dim)         # weight contractions
                * num_batch_blocks)
    in_arrays = (statics['support'], xt, stt,
                 statics['wx_gate'], statics['ws_gate'], statics['b_gate'],
                 statics['wx_update'], statics['ws_update'], statics['b_update'])
    bytes_accessed = int(sum(int(a.size) * a.dtype.itemsize for a in in_arrays)
                         + n * b * h_dim * 4)

    kern = functools.partial(_agcrn_cell_kernel, cheb_k=cheb_k, batch=bb)
    h_flat = pl.pallas_call(
        kern,
        out_shape=jax.ShapeDtypeStruct((n, b * h_dim), jnp.float32),
        grid=(num_batch_blocks,),
        in_specs=[
            pl.BlockSpec((n, n), lambda i: (0, 0)),                              # support
            pl.BlockSpec((n, bb * c_in), lambda i: (0, i)),                      # x
            pl.BlockSpec((n, bb * h_dim), lambda i: (0, i)),                     # state
            pl.BlockSpec((cheb_k, n, c_in, 2 * h_dim), lambda i: (0, 0, 0, 0)),  # gate Wx
            pl.BlockSpec((cheb_k, n, h_dim, 2 * h_dim), lambda i: (0, 0, 0, 0)), # gate Ws
            pl.BlockSpec((n, 2 * h_dim), lambda i: (0, 0)),                      # gate bias
            pl.BlockSpec((cheb_k, n, c_in, h_dim), lambda i: (0, 0, 0, 0)),      # update Wx
            pl.BlockSpec((cheb_k, n, h_dim, h_dim), lambda i: (0, 0, 0, 0)),     # update Ws
            pl.BlockSpec((n, h_dim), lambda i: (0, 0)),                          # update bias
        ],
        out_specs=pl.BlockSpec((n, bb * h_dim), lambda i: (0, i)),
        compiler_params=pltpu.CompilerParams(
            dimension_semantics=("parallel",),
            vmem_limit_bytes=vmem_limit),
        cost_estimate=pl.CostEstimate(
            flops=flops,
            transcendentals=int(3 * n * b * h_dim),
            bytes_accessed=bytes_accessed),
    )(*in_arrays)

    return jnp.transpose(h_flat.reshape(n, b, h_dim), (1, 0, 2))   # (B, N, H)


# ------------------------- pure-JAX reference check ------------------------ #

def _avwgcn_ref(x, node_embedding, weights_pool, bias_pool, cheb_k):
    n = node_embedding.shape[0]
    support = jax.nn.softmax(
        jnp.maximum(jnp.matmul(node_embedding, node_embedding.T,
                               precision=_HIGH), 0.0), axis=1)
    support_set = [jnp.eye(n, dtype=jnp.float32), support]
    for _ in range(2, cheb_k):
        support_set.append(2.0 * jnp.matmul(support, support_set[-1],
                                            precision=_HIGH) - support_set[-2])
    supports = jnp.stack(support_set[:cheb_k], axis=0)
    weights = jnp.einsum('nd,dkio->nkio', node_embedding, weights_pool,
                         precision=_HIGH)
    bias = jnp.matmul(node_embedding, bias_pool, precision=_HIGH)
    x_g = jnp.einsum('knm,bmc->bknc', supports, x, precision=_HIGH)
    x_g = jnp.transpose(x_g, (0, 2, 1, 3))
    return jnp.einsum('bnki,nkio->bno', x_g, weights, precision=_HIGH) + bias


def _agcrn_cell_ref(x, state, node_embedding, params, cheb_k, hidden_dim):
    z_r = jax.nn.sigmoid(
        _avwgcn_ref(jnp.concatenate([x, state], -1), node_embedding,
                    params['gate_w'], params['gate_b'], cheb_k))
    z = z_r[..., :hidden_dim]
    r = z_r[..., hidden_dim:]
    hc = jnp.tanh(
        _avwgcn_ref(jnp.concatenate([x, r * state], -1), node_embedding,
                    params['update_w'], params['update_b'], cheb_k))
    return z * state + (1.0 - z) * hc


# ---------------------------------- main ----------------------------------- #

if __name__ == "__main__":
    B, N, C_IN, H, K, D = 2, 16, 4, 8, 3, 8   # batch, nodes, in_dim, hidden, cheb_k, embed_dim

    key = jax.random.PRNGKey(0)
    ks = jax.random.split(key, 7)
    x = jax.random.normal(ks[0], (B, N, C_IN), jnp.float32)
    state = jax.random.normal(ks[1], (B, N, H), jnp.float32)
    node_embedding = jax.random.normal(ks[2], (N, D), jnp.float32)

    params = {
        # gate: AVWGCN(in=C_IN+H, out=2H)
        'gate_w': 0.1 * jax.random.normal(ks[3], (D, K, C_IN + H, 2 * H), jnp.float32),
        'gate_b': 0.1 * jax.random.normal(ks[4], (D, 2 * H), jnp.float32),
        # update: AVWGCN(in=C_IN+H, out=H)
        'update_w': 0.1 * jax.random.normal(ks[5], (D, K, C_IN + H, H), jnp.float32),
        'update_b': 0.1 * jax.random.normal(ks[6], (D, H), jnp.float32),
    }

    h_ref = _agcrn_cell_ref(x, state, node_embedding, params, K, H)
    fwd = jax.jit(functools.partial(agcrn_cell_forward, cheb_k=K))

    # f32-operand validation pass (tight-ish tolerance; catches layout bugs).
    statics_f32 = precompute_cell_statics(node_embedding, params, c_in=C_IN,
                                          compute_dtype=jnp.float32)
    h_f32 = jax.block_until_ready(fwd(x, state, statics_f32))
    np.testing.assert_allclose(np.asarray(h_f32), np.asarray(h_ref),
                               rtol=2e-3, atol=2e-3)

    # bf16 fast path (MXU operands bf16, f32 accumulation) — looser tolerance.
    statics_bf16 = precompute_cell_statics(node_embedding, params, c_in=C_IN,
                                           compute_dtype=jnp.bfloat16)
    h_bf16 = jax.block_until_ready(fwd(x, state, statics_bf16))
    np.testing.assert_allclose(np.asarray(h_bf16), np.asarray(h_ref),
                               rtol=5e-2, atol=5e-2)

    print("KERNEL_OK")
</pallas_src>

<mosaic_0001>
module attributes {stable_mosaic.version = 11 : i64} {
  func.func @_agcrn_cell_kernel(%arg0: i32, %arg1: memref<16x16xf32, #tpu.memory_space<vmem>>, %arg2: memref<16x8xf32, #tpu.memory_space<vmem>>, %arg3: memref<16x16xf32, #tpu.memory_space<vmem>>, %arg4: memref<3x16x4x16xf32, #tpu.memory_space<vmem>>, %arg5: memref<3x16x8x16xf32, #tpu.memory_space<vmem>>, %arg6: memref<16x16xf32, #tpu.memory_space<vmem>>, %arg7: memref<3x16x4x8xf32, #tpu.memory_space<vmem>>, %arg8: memref<3x16x8x8xf32, #tpu.memory_space<vmem>>, %arg9: memref<16x8xf32, #tpu.memory_space<vmem>>, %arg10: memref<16x16xf32, #tpu.memory_space<vmem>>) attributes {dimension_semantics = [#tpu.dimension_semantics<parallel>], iteration_bounds = array<i64: 1>, scalar_prefetch = 0 : i64, scratch_operands = 0 : i64, tpu.core_type = #tpu.core_type<tc>, window_params = [{pipeline_mode = #tpu.pipeline_mode<synchronous>, transform_indices = @transform_0, window_bounds = array<i64: 16, 16>}, {transform_indices = @transform_1, window_bounds = array<i64: 16, 8>}, {transform_indices = @transform_2, window_bounds = array<i64: 16, 16>}, {pipeline_mode = #tpu.pipeline_mode<synchronous>, transform_indices = @transform_3, window_bounds = array<i64: 3, 16, 4, 16>}, {pipeline_mode = #tpu.pipeline_mode<synchronous>, transform_indices = @transform_4, window_bounds = array<i64: 3, 16, 8, 16>}, {pipeline_mode = #tpu.pipeline_mode<synchronous>, transform_indices = @transform_5, window_bounds = array<i64: 16, 16>}, {pipeline_mode = #tpu.pipeline_mode<synchronous>, transform_indices = @transform_6, window_bounds = array<i64: 3, 16, 4, 8>}, {pipeline_mode = #tpu.pipeline_mode<synchronous>, transform_indices = @transform_7, window_bounds = array<i64: 3, 16, 8, 8>}, {pipeline_mode = #tpu.pipeline_mode<synchronous>, transform_indices = @transform_8, window_bounds = array<i64: 16, 8>}, {transform_indices = @transform_9, window_bounds = array<i64: 16, 16>}]} {
    %c0 = arith.constant 0 : index
    %c0_0 = arith.constant 0 : index
    %0 = vector.load %arg1[%c0, %c0_0] : memref<16x16xf32, #tpu.memory_space<vmem>>, vector<16x16xf32>
    %c0_1 = arith.constant 0 : index
    %c0_2 = arith.constant 0 : index
    %1 = vector.load %arg2[%c0_1, %c0_2] : memref<16x8xf32, #tpu.memory_space<vmem>>, vector<16x8xf32>
    %c0_3 = arith.constant 0 : index
    %c0_4 = arith.constant 0 : index
    %2 = vector.load %arg3[%c0_3, %c0_4] : memref<16x16xf32, #tpu.memory_space<vmem>>, vector<16x16xf32>
    %cst = arith.constant dense<0.000000e+00> : vector<16x8xf32>
    %3 = tpu.matmul %0, %1, %cst {dimension_numbers = #tpu.dot_dimension_numbers<[1], [0], [0], [1], [0, 0, 1, 1], [], []>} : vector<16x16xf32>, vector<16x8xf32>, vector<16x8xf32> -> vector<16x8xf32>
    %cst_5 = arith.constant dense<0.000000e+00> : vector<16x8xf32>
    %4 = tpu.matmul %0, %3, %cst_5 {dimension_numbers = #tpu.dot_dimension_numbers<[1], [0], [0], [1], [0, 0, 1, 1], [], []>} : vector<16x16xf32>, vector<16x8xf32>, vector<16x8xf32> -> vector<16x8xf32>
    %cst_6 = arith.constant 2.000000e+00 : f32
    %5 = vector.broadcast %cst_6 : f32 to vector<16x8xf32>
    %6 = arith.mulf %5, %4 : vector<16x8xf32>
    %7 = arith.subf %6, %1 : vector<16x8xf32>
    %cst_7 = arith.constant dense<0.000000e+00> : vector<16x16xf32>
    %8 = tpu.matmul %0, %2, %cst_7 {dimension_numbers = #tpu.dot_dimension_numbers<[1], [0], [0], [1], [0, 0, 1, 1], [], []>} : vector<16x16xf32>, vector<16x16xf32>, vector<16x16xf32> -> vector<16x16xf32>
    %cst_8 = arith.constant dense<0.000000e+00> : vector<16x16xf32>
    %9 = tpu.matmul %0, %8, %cst_8 {dimension_numbers = #tpu.dot_dimension_numbers<[1], [0], [0], [1], [0, 0, 1, 1], [], []>} : vector<16x16xf32>, vector<16x16xf32>, vector<16x16xf32> -> vector<16x16xf32>
    %cst_9 = arith.constant 2.000000e+00 : f32
    %10 = vector.broadcast %cst_9 : f32 to vector<16x16xf32>
    %11 = arith.mulf %10, %9 : vector<16x16xf32>
    %12 = arith.subf %11, %2 : vector<16x16xf32>
    %13 = vector.shape_cast %1 : vector<16x8xf32> to vector<16x2x4xf32>
    %c0_10 = arith.constant 0 : index
    %c0_11 = arith.constant 0 : index
    %c0_12 = arith.constant 0 : index
    %c0_13 = arith.constant 0 : index
    %14 = vector.load %arg4[%c0_10, %c0_11, %c0_12, %c0_13] : memref<3x16x4x16xf32, #tpu.memory_space<vmem>>, vector<1x16x4x16xf32>
    %15 = vector.shape_cast %14 : vector<1x16x4x16xf32> to vector<16x4x16xf32>
    %cst_14 = arith.constant dense<0.000000e+00> : vector<16x2x16xf32>
    %16 = tpu.matmul %13, %15, %cst_14 {dimension_numbers = #tpu.dot_dimension_numbers<[2], [1], [1], [2], [0, 0, 0, 1, 1, 2], [0], [0]>} : vector<16x2x4xf32>, vector<16x4x16xf32>, vector<16x2x16xf32> -> vector<16x2x16xf32>
    %17 = vector.shape_cast %3 : vector<16x8xf32> to vector<16x2x4xf32>
    %c1 = arith.constant 1 : index
    %c0_15 = arith.constant 0 : index
    %c0_16 = arith.constant 0 : index
    %c0_17 = arith.constant 0 : index
    %18 = vector.load %arg4[%c1, %c0_15, %c0_16, %c0_17] : memref<3x16x4x16xf32, #tpu.memory_space<vmem>>, vector<1x16x4x16xf32>
    %19 = vector.shape_cast %18 : vector<1x16x4x16xf32> to vector<16x4x16xf32>
    %cst_18 = arith.constant dense<0.000000e+00> : vector<16x2x16xf32>
    %20 = tpu.matmul %17, %19, %cst_18 {dimension_numbers = #tpu.dot_dimension_numbers<[2], [1], [1], [2], [0, 0, 0, 1, 1, 2], [0], [0]>} : vector<16x2x4xf32>, vector<16x4x16xf32>, vector<16x2x16xf32> -> vector<16x2x16xf32>
    %21 = arith.addf %16, %20 : vector<16x2x16xf32>
    %22 = vector.shape_cast %7 : vector<16x8xf32> to vector<16x2x4xf32>
    %c2 = arith.constant 2 : index
    %c0_19 = arith.constant 0 : index
    %c0_20 = arith.constant 0 : index
    %c0_21 = arith.constant 0 : index
    %23 = vector.load %arg4[%c2, %c0_19, %c0_20, %c0_21] : memref<3x16x4x16xf32, #tpu.memory_space<vmem>>, vector<1x16x4x16xf32>
    %24 = vector.shape_cast %23 : vector<1x16x4x16xf32> to vector<16x4x16xf32>
    %cst_22 = arith.constant dense<0.000000e+00> : vector<16x2x16xf32>
    %25 = tpu.matmul %22, %24, %cst_22 {dimension_numbers = #tpu.dot_dimension_numbers<[2], [1], [1], [2], [0, 0, 0, 1, 1, 2], [0], [0]>} : vector<16x2x4xf32>, vector<16x4x16xf32>, vector<16x2x16xf32> -> vector<16x2x16xf32>
    %26 = arith.addf %21, %25 : vector<16x2x16xf32>
    %27 = vector.shape_cast %2 : vector<16x16xf32> to vector<16x2x8xf32>
    %c0_23 = arith.constant 0 : index
    %c0_24 = arith.constant 0 : index
    %c0_25 = arith.constant 0 : index
    %c0_26 = arith.constant 0 : index
    %28 = vector.load %arg5[%c0_23, %c0_24, %c0_25, %c0_26] : memref<3x16x8x16xf32, #tpu.memory_space<vmem>>, vector<1x16x8x16xf32>
    %29 = vector.shape_cast %28 : vector<1x16x8x16xf32> to vector<16x8x16xf32>
    %cst_27 = arith.constant dense<0.000000e+00> : vector<16x2x16xf32>
    %30 = tpu.matmul %27, %29, %cst_27 {dimension_numbers = #tpu.dot_dimension_numbers<[2], [1], [1], [2], [0, 0, 0, 1, 1, 2], [0], [0]>} : vector<16x2x8xf32>, vector<16x8x16xf32>, vector<16x2x16xf32> -> vector<16x2x16xf32>
    %31 = vector.shape_cast %8 : vector<16x16xf32> to vector<16x2x8xf32>
    %c1_28 = arith.constant 1 : index
    %c0_29 = arith.constant 0 : index
    %c0_30 = arith.constant 0 : index
    %c0_31 = arith.constant 0 : index
    %32 = vector.load %arg5[%c1_28, %c0_29, %c0_30, %c0_31] : memref<3x16x8x16xf32, #tpu.memory_space<vmem>>, vector<1x16x8x16xf32>
    %33 = vector.shape_cast %32 : vector<1x16x8x16xf32> to vector<16x8x16xf32>
    %cst_32 = arith.constant dense<0.000000e+00> : vector<16x2x16xf32>
    %34 = tpu.matmul %31, %33, %cst_32 {dimension_numbers = #tpu.dot_dimension_numbers<[2], [1], [1], [2], [0, 0, 0, 1, 1, 2], [0], [0]>} : vector<16x2x8xf32>, vector<16x8x16xf32>, vector<16x2x16xf32> -> vector<16x2x16xf32>
    %35 = arith.addf %30, %34 : vector<16x2x16xf32>
    %36 = vector.shape_cast %12 : vector<16x16xf32> to vector<16x2x8xf32>
    %c2_33 = arith.constant 2 : index
    %c0_34 = arith.constant 0 : index
    %c0_35 = arith.constant 0 : index
    %c0_36 = arith.constant 0 : index
    %37 = vector.load %arg5[%c2_33, %c0_34, %c0_35, %c0_36] : memref<3x16x8x16xf32, #tpu.memory_space<vmem>>, vector<1x16x8x16xf32>
    %38 = vector.shape_cast %37 : vector<1x16x8x16xf32> to vector<16x8x16xf32>
    %cst_37 = arith.constant dense<0.000000e+00> : vector<16x2x16xf32>
    %39 = tpu.matmul %36, %38, %cst_37 {dimension_numbers = #tpu.dot_dimension_numbers<[2], [1], [1], [2], [0, 0, 0, 1, 1, 2], [0], [0]>} : vector<16x2x8xf32>, vector<16x8x16xf32>, vector<16x2x16xf32> -> vector<16x2x16xf32>
    %40 = arith.addf %35, %39 : vector<16x2x16xf32>
    %41 = arith.addf %26, %40 : vector<16x2x16xf32>
    %c0_38 = arith.constant 0 : index
    %c0_39 = arith.constant 0 : index
    %42 = vector.load %arg6[%c0_38, %c0_39] : memref<16x16xf32, #tpu.memory_space<vmem>>, vector<16x16xf32>
    %43 = vector.shape_cast %42 : vector<16x16xf32> to vector<16x1x16xf32>
    %44 = vector.broadcast %43 : vector<16x1x16xf32> to vector<16x2x16xf32>
    %45 = arith.addf %41, %44 : vector<16x2x16xf32>
    %46 = arith.negf %45 : vector<16x2x16xf32>
    %47 = math.exp %46 : vector<16x2x16xf32>
    %cst_40 = arith.constant 1.000000e+00 : f32
    %48 = vector.broadcast %cst_40 : f32 to vector<16x2x16xf32>
    %49 = arith.addf %48, %47 : vector<16x2x16xf32>
    %50 = arith.divf %48, %49 : vector<16x2x16xf32>
    %51 = vector.extract_strided_slice %50 {offsets = [0, 0, 0], sizes = [16, 2, 8], strides = [1, 1, 1]} : vector<16x2x16xf32> to vector<16x2x8xf32>
    %52 = vector.extract_strided_slice %50 {offsets = [0, 0, 8], sizes = [16, 2, 8], strides = [1, 1, 1]} : vector<16x2x16xf32> to vector<16x2x8xf32>
    %53 = vector.shape_cast %2 : vector<16x16xf32> to vector<16x2x8xf32>
    %54 = arith.mulf %52, %53 : vector<16x2x8xf32>
    %55 = vector.shape_cast %54 : vector<16x2x8xf32> to vector<16x16xf32>
    %cst_41 = arith.constant dense<0.000000e+00> : vector<16x16xf32>
    %56 = tpu.matmul %0, %55, %cst_41 {dimension_numbers = #tpu.dot_dimension_numbers<[1], [0], [0], [1], [0, 0, 1, 1], [], []>} : vector<16x16xf32>, vector<16x16xf32>, vector<16x16xf32> -> vector<16x16xf32>
    %cst_42 = arith.constant dense<0.000000e+00> : vector<16x16xf32>
    %57 = tpu.matmul %0, %56, %cst_42 {dimension_numbers = #tpu.dot_dimension_numbers<[1], [0], [0], [1], [0, 0, 1, 1], [], []>} : vector<16x16xf32>, vector<16x16xf32>, vector<16x16xf32> -> vector<16x16xf32>
    %cst_43 = arith.constant 2.000000e+00 : f32
    %58 = vector.broadcast %cst_43 : f32 to vector<16x16xf32>
    %59 = arith.mulf %58, %57 : vector<16x16xf32>
    %60 = arith.subf %59, %55 : vector<16x16xf32>
    %61 = vector.shape_cast %1 : vector<16x8xf32> to vector<16x2x4xf32>
    %c0_44 = arith.constant 0 : index
    %c0_45 = arith.constant 0 : index
    %c0_46 = arith.constant 0 : index
    %c0_47 = arith.constant 0 : index
    %62 = vector.load %arg7[%c0_44, %c0_45, %c0_46, %c0_47] : memref<3x16x4x8xf32, #tpu.memory_space<vmem>>, vector<1x16x4x8xf32>
    %63 = vector.shape_cast %62 : vector<1x16x4x8xf32> to vector<16x4x8xf32>
    %cst_48 = arith.constant dense<0.000000e+00> : vector<16x2x8xf32>
    %64 = tpu.matmul %61, %63, %cst_48 {dimension_numbers = #tpu.dot_dimension_numbers<[2], [1], [1], [2], [0, 0, 0, 1, 1, 2], [0], [0]>} : vector<16x2x4xf32>, vector<16x4x8xf32>, vector<16x2x8xf32> -> vector<16x2x8xf32>
    %65 = vector.shape_cast %3 : vector<16x8xf32> to vector<16x2x4xf32>
    %c1_49 = arith.constant 1 : index
    %c0_50 = arith.constant 0 : index
    %c0_51 = arith.constant 0 : index
    %c0_52 = arith.constant 0 : index
    %66 = vector.load %arg7[%c1_49, %c0_50, %c0_51, %c0_52] : memref<3x16x4x8xf32, #tpu.memory_space<vmem>>, vector<1x16x4x8xf32>
    %67 = vector.shape_cast %66 : vector<1x16x4x8xf32> to vector<16x4x8xf32>
    %cst_53 = arith.constant dense<0.000000e+00> : vector<16x2x8xf32>
    %68 = tpu.matmul %65, %67, %cst_53 {dimension_numbers = #tpu.dot_dimension_numbers<[2], [1], [1], [2], [0, 0, 0, 1, 1, 2], [0], [0]>} : vector<16x2x4xf32>, vector<16x4x8xf32>, vector<16x2x8xf32> -> vector<16x2x8xf32>
    %69 = arith.addf %64, %68 : vector<16x2x8xf32>
    %70 = vector.shape_cast %7 : vector<16x8xf32> to vector<16x2x4xf32>
    %c2_54 = arith.constant 2 : index
    %c0_55 = arith.constant 0 : index
    %c0_56 = arith.constant 0 : index
    %c0_57 = arith.constant 0 : index
    %71 = vector.load %arg7[%c2_54, %c0_55, %c0_56, %c0_57] : memref<3x16x4x8xf32, #tpu.memory_space<vmem>>, vector<1x16x4x8xf32>
    %72 = vector.shape_cast %71 : vector<1x16x4x8xf32> to vector<16x4x8xf32>
    %cst_58 = arith.constant dense<0.000000e+00> : vector<16x2x8xf32>
    %73 = tpu.matmul %70, %72, %cst_58 {dimension_numbers = #tpu.dot_dimension_numbers<[2], [1], [1], [2], [0, 0, 0, 1, 1, 2], [0], [0]>} : vector<16x2x4xf32>, vector<16x4x8xf32>, vector<16x2x8xf32> -> vector<16x2x8xf32>
    %74 = arith.addf %69, %73 : vector<16x2x8xf32>
    %75 = vector.shape_cast %55 : vector<16x16xf32> to vector<16x2x8xf32>
    %c0_59 = arith.constant 0 : index
    %c0_60 = arith.constant 0 : index
    %c0_61 = arith.constant 0 : index
    %c0_62 = arith.constant 0 : index
    %76 = vector.load %arg8[%c0_59, %c0_60, %c0_61, %c0_62] : memref<3x16x8x8xf32, #tpu.memory_space<vmem>>, vector<1x16x8x8xf32>
    %77 = vector.shape_cast %76 : vector<1x16x8x8xf32> to vector<16x8x8xf32>
    %cst_63 = arith.constant dense<0.000000e+00> : vector<16x2x8xf32>
    %78 = tpu.matmul %75, %77, %cst_63 {dimension_numbers = #tpu.dot_dimension_numbers<[2], [1], [1], [2], [0, 0, 0, 1, 1, 2], [0], [0]>} : vector<16x2x8xf32>, vector<16x8x8xf32>, vector<16x2x8xf32> -> vector<16x2x8xf32>
    %79 = vector.shape_cast %56 : vector<16x16xf32> to vector<16x2x8xf32>
    %c1_64 = arith.constant 1 : index
    %c0_65 = arith.constant 0 : index
    %c0_66 = arith.constant 0 : index
    %c0_67 = arith.constant 0 : index
    %80 = vector.load %arg8[%c1_64, %c0_65, %c0_66, %c0_67] : memref<3x16x8x8xf32, #tpu.memory_space<vmem>>, vector<1x16x8x8xf32>
    %81 = vector.shape_cast %80 : vector<1x16x8x8xf32> to vector<16x8x8xf32>
    %cst_68 = arith.constant dense<0.000000e+00> : vector<16x2x8xf32>
    %82 = tpu.matmul %79, %81, %cst_68 {dimension_numbers = #tpu.dot_dimension_numbers<[2], [1], [1], [2], [0, 0, 0, 1, 1, 2], [0], [0]>} : vector<16x2x8xf32>, vector<16x8x8xf32>, vector<16x2x8xf32> -> vector<16x2x8xf32>
    %83 = arith.addf %78, %82 : vector<16x2x8xf32>
    %84 = vector.shape_cast %60 : vector<16x16xf32> to vector<16x2x8xf32>
    %c2_69 = arith.constant 2 : index
    %c0_70 = arith.constant 0 : index
    %c0_71 = arith.constant 0 : index
    %c0_72 = arith.constant 0 : index
    %85 = vector.load %arg8[%c2_69, %c0_70, %c0_71, %c0_72] : memref<3x16x8x8xf32, #tpu.memory_space<vmem>>, vector<1x16x8x8xf32>
    %86 = vector.shape_cast %85 : vector<1x16x8x8xf32> to vector<16x8x8xf32>
    %cst_73 = arith.constant dense<0.000000e+00> : vector<16x2x8xf32>
    %87 = tpu.matmul %84, %86, %cst_73 {dimension_numbers = #tpu.dot_dimension_numbers<[2], [1], [1], [2], [0, 0, 0, 1, 1, 2], [0], [0]>} : vector<16x2x8xf32>, vector<16x8x8xf32>, vector<16x2x8xf32> -> vector<16x2x8xf32>
    %88 = arith.addf %83, %87 : vector<16x2x8xf32>
    %89 = arith.addf %74, %88 : vector<16x2x8xf32>
    %c0_74 = arith.constant 0 : index
    %c0_75 = arith.constant 0 : index
    %90 = vector.load %arg9[%c0_74, %c0_75] : memref<16x8xf32, #tpu.memory_space<vmem>>, vector<16x8xf32>
    %91 = vector.shape_cast %90 : vector<16x8xf32> to vector<16x1x8xf32>
    %92 = vector.broadcast %91 : vector<16x1x8xf32> to vector<16x2x8xf32>
    %93 = arith.addf %89, %92 : vector<16x2x8xf32>
    %94 = math.tanh %93 : vector<16x2x8xf32>
    %95 = arith.mulf %51, %53 : vector<16x2x8xf32>
    %cst_76 = arith.constant 1.000000e+00 : f32
    %96 = vector.broadcast %cst_76 : f32 to vector<16x2x8xf32>
    %97 = arith.subf %96, %51 : vector<16x2x8xf32>
    %98 = arith.mulf %97, %94 : vector<16x2x8xf32>
    %99 = arith.addf %95, %98 : vector<16x2x8xf32>
    %100 = vector.shape_cast %99 : vector<16x2x8xf32> to vector<16x16xf32>
    %c0_77 = arith.constant 0 : index
    %c0_78 = arith.constant 0 : index
    %101 = vector.load %arg10[%c0_77, %c0_78] : memref<16x16xf32, #tpu.memory_space<vmem>>, vector<16x16xf32>
    tpu.vector_store %arg10[%c0_77, %c0_78], %100 {strides = array<i32>} : memref<16x16xf32, #tpu.memory_space<vmem>>, vector<16x16xf32>,
    return
  }
  func.func @transform_0(%arg0: i32) -> (i32, i32) {
    %c0_i32 = arith.constant 0 : i32
    %c0_i32_0 = arith.constant 0 : i32
    %c0_i32_1 = arith.constant 0 : i32
    return %c0_i32, %c0_i32_0 : i32, i32
  }
  func.func @transform_1(%arg0: i32) -> (i32, i32) {
    %c0_i32 = arith.constant 0 : i32
    %c0_i32_0 = arith.constant 0 : i32
    return %c0_i32, %arg0 : i32, i32
  }
  func.func @transform_2(%arg0: i32) -> (i32, i32) {
    %c0_i32 = arith.constant 0 : i32
    %c0_i32_0 = arith.constant 0 : i32
    return %c0_i32, %arg0 : i32, i32
  }
  func.func @transform_3(%arg0: i32) -> (i32, i32, i32, i32) {
    %c0_i32 = arith.constant 0 : i32
    %c0_i32_0 = arith.constant 0 : i32
    %c0_i32_1 = arith.constant 0 : i32
    %c0_i32_2 = arith.constant 0 : i32
    %c0_i32_3 = arith.constant 0 : i32
    return %c0_i32, %c0_i32_0, %c0_i32_1, %c0_i32_2 : i32, i32, i32, i32
  }
  func.func @transform_4(%arg0: i32) -> (i32, i32, i32, i32) {
    %c0_i32 = arith.constant 0 : i32
    %c0_i32_0 = arith.constant 0 : i32
    %c0_i32_1 = arith.constant 0 : i32
    %c0_i32_2 = arith.constant 0 : i32
    %c0_i32_3 = arith.constant 0 : i32
    return %c0_i32, %c0_i32_0, %c0_i32_1, %c0_i32_2 : i32, i32, i32, i32
  }
  func.func @transform_5(%arg0: i32) -> (i32, i32) {
    %c0_i32 = arith.constant 0 : i32
    %c0_i32_0 = arith.constant 0 : i32
    %c0_i32_1 = arith.constant 0 : i32
    return %c0_i32, %c0_i32_0 : i32, i32
  }
  func.func @transform_6(%arg0: i32) -> (i32, i32, i32, i32) {
    %c0_i32 = arith.constant 0 : i32
    %c0_i32_0 = arith.constant 0 : i32
    %c0_i32_1 = arith.constant 0 : i32
    %c0_i32_2 = arith.constant 0 : i32
    %c0_i32_3 = arith.constant 0 : i32
    return %c0_i32, %c0_i32_0, %c0_i32_1, %c0_i32_2 : i32, i32, i32, i32
  }
  func.func @transform_7(%arg0: i32) -> (i32, i32, i32, i32) {
    %c0_i32 = arith.constant 0 : i32
    %c0_i32_0 = arith.constant 0 : i32
    %c0_i32_1 = arith.constant 0 : i32
    %c0_i32_2 = arith.constant 0 : i32
    %c0_i32_3 = arith.constant 0 : i32
    return %c0_i32, %c0_i32_0, %c0_i32_1, %c0_i32_2 : i32, i32, i32, i32
  }
  func.func @transform_8(%arg0: i32) -> (i32, i32) {
    %c0_i32 = arith.constant 0 : i32
    %c0_i32_0 = arith.constant 0 : i32
    %c0_i32_1 = arith.constant 0 : i32
    return %c0_i32, %c0_i32_0 : i32, i32
  }
  func.func @transform_9(%arg0: i32) -> (i32, i32) {
    %c0_i32 = arith.constant 0 : i32
    %c0_i32_0 = arith.constant 0 : i32
    return %c0_i32, %arg0 : i32, i32
  }
}

</mosaic_0001>

<bundles_post_ra>
// kernel: agcrn_cell_forward.1
= control target key start
LH: loop header
LB: loop body
LE: loop exit
PB: predicated region body
PF: predicated region fallthrough
CT: control target
= control target key end

     0   :  { %vm38_vm0 = vcmask 130048   ;;  %v22031_v6 = vmov 0.0   ;;  %s18968_s21 = smov 124   ;;  %vm671_vm1 = vcmask 1043456   ;;  %vm18969_vm2 = vmmov 0   ;;  %s18972_s30 = smov 120   ;;  %s21992_s1 = inlined_call_operand.vmem [shape: f32[16,8], index: 1, kind: input, shape index: {}]   ;;  %s21993_s0 = inlined_call_operand.vmem [shape: f32[16,16], index: 0, kind: input, shape index: {}]   ;;  %s21994_s2 = inlined_call_operand.vmem [shape: f32[16,16], index: 2, kind: input, shape index: {}]   ;;  %s21995_s3 = inlined_call_operand.vmem [shape: f32[3,16,4,16], index: 3, kind: input, shape index: {}]   ;;  %s21996_s4 = inlined_call_operand.vmem [shape: f32[3,16,8,16], index: 4, kind: input, shape index: {}]   ;;  %s21997_s5 = inlined_call_operand.vmem [shape: f32[16,16], index: 5, kind: input, shape index: {}]   ;;  %s21998_s6 = inlined_call_operand.vmem [shape: f32[3,16,4,8], index: 6, kind: input, shape index: {}]   ;;  %s21999_s7 = inlined_call_operand.vmem [shape: f32[3,16,8,8], index: 7, kind: input, shape index: {}]   ;;  %s22000_s8 = inlined_call_operand.vmem [shape: f32[16,8], index: 8, kind: input, shape index: {}]   ;;  %s22001_s9 = inlined_call_operand.vmem [shape: f32[16,16], index: 9, kind: output, shape index: {}]  }
   0x1   :  { %v19028_v0 = vld [vmem:[%s21992_s1 + $0x8] sm:$0xff]  ;;  %v19033_v1 = vld [vmem:[%s21992_s1] sm:$0xff]  ;;  %v18970_v13 = vmov 1983009808   ;;  %v365_v15 = vlaneseq  ;;  %v18971_v16 = vmov 1934713408  }
   0x2   :  { %v32_v2 = vld [vmem:[%s21993_s0] sm:$0xff]  ;;  %17854 = vmatprep.subr.mxu0 %v19028_v0  ;;  %v33_v3 = vld [vmem:[%s21993_s0 + $0x8] sm:$0xff]  ;;  %355 = vrot.lane.b32.xlu1 %v19033_v1, %s18968_s21  ;;  %v363_v14 = vunpack.c.l.s4 %v18970_v13  ;;  %v394_v17 = vunpack.c.l.s4 %v18971_v16  ;;  %vm667_vm3 = vcmask 31744   ;;  %v17012_v39 = vld [vmem:[%s21995_s3 + $0x50] sm:$0xf]  ;;  %vm4805_vm4 = vcmask 64512  }
   0x3   :  { %17858 = vmatprep.mubr.msk.f32.mxu0 %vm38_vm0, %v32_v2  ;;  %17855 = vmatpush3.msra.mxu0 %v19028_v0  ;;  %v19047_v4 = vld [vmem:[%s21994_s2 + $0x8] sm:$0xff]  ;;  %v19055_v5 = vld [vmem:[%s21994_s2] sm:$0xff]  ;;  %v19102_v19 = vshrl.u32 %v365_v15, 7  ;;  %v17013_v44 = vld [vmem:[%s21995_s3 + $0x54] sm:$0xf]  ;;  %v361_v15 = vcombine.high %v19033_v1, %v22031_v6 }
   0x4   :  { %17865 = vmatprep.mubr.msk.f32.mxu1 %vm38_vm0, %v32_v2  ;;  %17856 = vmatprep.subr.mxu0 %v19033_v1  ;;  %v17008_v7 = vld [vmem:[%s21995_s3 + $0x40] sm:$0xf]  ;;  %v17009_v12 = vld [vmem:[%s21995_s3 + $0x44] sm:$0xf]  ;;  %v364_v18 = vunpack.c.0.s8 %v363_v14  ;;  %v395_v20 = vunpack.c.0.s8 %v394_v17  ;;  %v17010_v33 = vld [vmem:[%s21995_s3 + $0x48] sm:$0xf] }
   0x5   :  { %17857 = vmatpush3.msra.mxu0 %v19033_v1  ;;  %v17011_v37 = vld [vmem:[%s21995_s3 + $0x4c] sm:$0xf]  ;;  %v17014_v47 = vld [vmem:[%s21995_s3 + $0x58] sm:$0xf]  ;;  %v17015_v51 = vld [vmem:[%s21995_s3 + $0x5c] sm:$0xf] }
   0x6   :  { %17859 = vmatmul.mubr.msk.f32.vlgmr.msra.gmra.mxu0 %vm38_vm0, %v33_v3  ;;  %17868 = vmatprep.subr.mxu0 %v19047_v4  ;;  %v19105_v21 = vsub.s32 %v364_v18, %v19102_v19  ;;  %v19108_v22 = vsub.s32 %v395_v20, %v19102_v19  ;;  %v17016_v54 = vld [vmem:[%s21995_s3 + $0x60] sm:$0xf]  ;;  %v17017_v58 = vld [vmem:[%s21995_s3 + $0x64] sm:$0xf]  ;;  %v17018_v60 = vld [vmem:[%s21995_s3 + $0x68] sm:$0xf] }
   0x7   :  { %17869 = vmatpush3.msra.mxu0 %v19047_v4  ;;  %17872 = vmatprep.mubr.msk.f32.mxu0 %vm38_vm0, %v32_v2  ;;  %v17021_v16 = vld [vmem:[%s21995_s3 + $0x74] sm:$0xf]  ;;  %v17022_v20 = vld [vmem:[%s21995_s3 + $0x78] sm:$0xf] }
   0x8   :  { %17870 = vmatprep.subr.mxu0 %v19055_v5  ;;  %357 = vrot.lane.b32.xlu1 %v19028_v0, %s18968_s21  ;;  %22088 = vst [vmem:[#allocation2_spill] sm:$0xff] %v19105_v21  ;;  %22089 = vst [vmem:[#allocation3_spill] sm:$0xff] %v19108_v22 }
   0x9   :  { %17871 = vmatpush3.msra.mxu0 %v19055_v5 }
   0xa   :  { %17873 = vmatmul.mubr.msk.f32.vlgmr.msra.gmra.mxu0 %vm38_vm0, %v33_v3  ;;  %17882 = vmatprep.subr.mxu0 %v22031_v6 }
   0xb   :  { %17883 = vmatpush3.msk.msra.mxu0 %vm671_vm1, %v17008_v7  ;;  %17884 = vmatprep.mubr.msk.f32.mxu0 %vm18969_vm2, %v22031_v6  ;;  %v368_v7 = vrot.slane %v19033_v1, %v19105_v21 }
   0xc   :  { %17892 = vmatprep.subr.mxu0 %v22031_v6 }
  0x74   :  { %v356_v61 = vpop.permute.xlu1 %355 }
  0x75   :  { %v376_v17 = vcombine.high %v356_v61, %v22031_v6 }
  0xc6   :  { %v19076_v8 = vpop.f32.mrf.mxu0 }
  0xc7   :  { %17861 = vmatprep.subr.mxu1 %v19076_v8  ;;  %v591_v45 = vrot.slane %v19076_v8, %v19105_v21  ;;  %v584_v52 = vcombine.high %v19076_v8, %v22031_v6 }
  0xc8   :  { %v111_v9 = vpop.f32.mrf.mxu0  ;;  %17862 = vmatpush3.msra.mxu1 %v19076_v8 }
  0xc9   :  { %512 = vrot.lane.b32.xlu0 %v111_v9, %s18968_s21  ;;  %17863 = vmatprep.subr.mxu1 %v111_v9  ;;  %v518_v24 = vcombine.high %v111_v9, %v22031_v6  ;;  %v525_v25 = vrot.slane %v111_v9, %v19105_v21  ;;  %v598_v59 = vrot.slane %v584_v52, %v19105_v21 }
  0xca   :  { %17864 = vmatpush3.msra.mxu1 %v111_v9  ;;  %v19081_v10 = vpop.f32.mrf.mxu0  ;;  %v17020_v9 = vld [vmem:[%s21995_s3 + $0x70] sm:$0xf]  ;;  %v428_v52 = vcombine.high %v19028_v0, %v22031_v6 }
  0xcb   :  { %17866 = vmatmul.mubr.msk.f32.vlgmr.msra.gmra.mxu1 %vm38_vm0, %v33_v3  ;;  %17875 = vmatprep.subr.mxu1 %v19081_v10  ;;  %v532_v31 = vrot.slane %v518_v24, %v19105_v21 }
  0xcc   :  { %v19085_v11 = vpop.f32.mrf.mxu0  ;;  %17876 = vmatpush3.msra.mxu1 %v19081_v10  ;;  %17879 = vmatprep.mubr.msk.f32.mxu1 %vm38_vm0, %v32_v2 }
  0xcd   :  { %514 = vrot.lane.b32.xlu0 %v19076_v8, %s18968_s21  ;;  %17877 = vmatprep.subr.mxu1 %v19085_v11  ;;  %v383_v8 = vrot.slane %v356_v61, %v19105_v21  ;;  %v442_v61 = vrot.slane %v428_v52, %v19105_v21  ;;  %v17088_v52 = vld [vmem:[%s21995_s3 + $0x80] sm:$0xf] }
  0xce   :  { %17878 = vmatpush3.msra.mxu1 %v19085_v11 }
  0xcf   :  { %17880 = vmatmul.mubr.msk.f32.vlgmr.msra.gmra.mxu1 %vm38_vm0, %v33_v3  ;;  %17887 = vmatprep.subr.mxu1 %v22031_v6  ;;  %v17019_v3 = vld [vmem:[%s21995_s3 + $0x6c] sm:$0xf]  ;;  %v391_v18 = vcombine.low %v368_v7, %v383_v8 }
  0xd0   :  { %17888 = vmatpush3.msk.msra.mxu1 %vm671_vm1, %v17009_v12  ;;  %17889 = vmatprep.mubr.msk.f32.mxu1 %vm18969_vm2, %v22031_v6 }
  0xd1   :  { %17897 = vmatprep.subr.mxu1 %v22031_v6 }
 0x13b   :  { %v513_v23 = vpop.permute.xlu0 %512 }
 0x13c   :  { %v533_v26 = vcombine.high %v513_v23, %v22031_v6  ;;  %v540_v27 = vrot.slane %v513_v23, %v19105_v21 }
 0x13e   :  { %v547_v28 = vrot.slane %v533_v26, %v19105_v21  ;;  %v548_v29 = vcombine.low %v525_v25, %v540_v27  ;;  %v549_v30 = vcombine.high %v525_v25, %v540_v27  ;;  %v375_v25 = vrot.slane %v361_v15, %v19105_v21  ;;  %v17023_v26 = vld [vmem:[%s21995_s3 + $0x7c] sm:$0xf]  ;;  %v503_v15 = vld [vmem:[%s21995_s3 + $0x24] sm:$0xf] }
 0x13f   :  { %v515_v38 = vpop.permute.xlu0 %514  ;;  %v390_v27 = vrot.slane %v376_v17, %v19105_v21 }
 0x140   :  { %v19117_v32 = vrot.slane %v548_v29, %v19108_v22  ;;  %v19123_v34 = vrot.slane %v549_v30, %v19108_v22  ;;  %v564_v35 = vcombine.low %v532_v31, %v547_v28  ;;  %v565_v40 = vcombine.high %v532_v31, %v547_v28  ;;  %v494_v30 = vld [vmem:[%s21995_s3] sm:$0xf] }
 0x141   :  { %v606_v43 = vrot.slane %v515_v38, %v19105_v21  ;;  %v599_v46 = vcombine.high %v515_v38, %v22031_v6  ;;  %v392_v28 = vcombine.high %v368_v7, %v383_v8  ;;  %v19302_v29 = vrot.slane %v391_v18, %v19108_v22 }
 0x142   :  { %22090 = vst [vmem:[#allocation4_spill] sm:$0xff] %v19117_v32  ;;  %22091 = vst [vmem:[#allocation5_spill] sm:$0xff] %v19123_v34  ;;  %v19127_v36 = vcombine.high %v19117_v32, %v22031_v6  ;;  %17885 = vmatmul.mubr.msk.f32.vlgmr.msra.gmra.mxu0 %vm667_vm3, %v19117_v32  ;;  %v19145_v41 = vrot.slane %v564_v35, %v19108_v22  ;;  %v19149_v42 = vcombine.high %v19123_v34, %v22031_v6 }
 0x143   :  { %17893 = vmatpush3.msk.msra.mxu0 %vm671_vm1, %v17010_v33  ;;  %17894 = vmatprep.mubr.msk.f32.mxu0 %vm18969_vm2, %v22031_v6  ;;  %v19174_v48 = vrot.slane %v565_v40, %v19108_v22  ;;  %v614_v49 = vcombine.low %v591_v45, %v606_v43  ;;  %v613_v53 = vrot.slane %v599_v46, %v19105_v21  ;;  %v495_v33 = vld [vmem:[%s21995_s3 + $0x4] sm:$0xf]  ;;  %v358_v40 = vpop.permute.xlu1 %357 }
 0x144   :  { %22092 = vst [vmem:[#allocation6_spill] sm:$0xff] %v19127_v36  ;;  %17890 = vmatmul.mubr.msk.f32.vlgmr.msra.gmra.mxu1 %vm667_vm3, %v19127_v36  ;;  %17902 = vmatprep.subr.mxu0 %v22031_v6  ;;  %22093 = vst [vmem:[#allocation7_spill] sm:$0xff] %v19145_v41  ;;  %v19181_v50 = vcombine.high %v19145_v41, %v22031_v6  ;;  %v615_v55 = vcombine.high %v591_v45, %v606_v43 }
 0x145   :  { %17898 = vmatpush3.msk.msra.mxu1 %vm671_vm1, %v17011_v37  ;;  %22094 = vst [vmem:[#allocation8_spill] sm:$0xff] %v19149_v42  ;;  %17899 = vmatprep.mubr.msk.f32.mxu1 %vm18969_vm2, %v22031_v6  ;;  %22095 = vst [vmem:[#allocation9_spill] sm:$0xff] %v19174_v48  ;;  %v19202_v56 = vrot.slane %v614_v49, %v19108_v22  ;;  %v19209_v57 = vcombine.high %v19174_v48, %v22031_v6  ;;  %v498_v49 = vld [vmem:[%s21995_s3 + $0x10] sm:$0xf] }
 0x146   :  { %17895 = vmatmul.mubr.msk.f32.vlgmr.msra.gmra.mxu0 %vm667_vm3, %v19123_v34  ;;  %17907 = vmatprep.subr.mxu1 %v22031_v6  ;;  %22096 = vst [vmem:[#allocation10_spill] sm:$0xff] %v19181_v50  ;;  %v19228_v62 = vrot.slane %v615_v55, %v19108_v22  ;;  %v630_v63 = vcombine.low %v598_v59, %v613_v53  ;;  %22105 = vst [vmem:[#allocation19_spill] sm:$0xff] %v19302_v29 }
 0x147   :  { %17903 = vmatpush3.msk.msra.mxu0 %vm671_vm1, %v17012_v39  ;;  %17904 = vmatprep.mubr.msk.f32.mxu0 %vm18969_vm2, %v22031_v6  ;;  %22097 = vst [vmem:[#allocation11_spill] sm:$0xff] %v19202_v56  ;;  %22098 = vst [vmem:[#allocation12_spill] sm:$0xff] %v19209_v57  ;;  %v19232_v2 = vcombine.high %v19202_v56, %v22031_v6  ;;  %v631_v12 = vcombine.high %v598_v59, %v613_v53  ;;  %v496_v39 = vld [vmem:[%s21995_s3 + $0x8] sm:$0xf] }
 0x148   :  { %17900 = vmatmul.mubr.msk.f32.vlgmr.msra.gmra.mxu1 %vm667_vm3, %v19149_v42  ;;  %17912 = vmatprep.subr.mxu0 %v22031_v6  ;;  %22099 = vst [vmem:[#allocation13_spill] sm:$0xff] %v19228_v62  ;;  %v19256_v13 = vrot.slane %v630_v63, %v19108_v22  ;;  %v19260_v14 = vcombine.high %v19228_v62, %v22031_v6 }
 0x149   :  { %17909 = vmatprep.mubr.msk.f32.mxu1 %vm18969_vm2, %v22031_v6  ;;  %17908 = vmatpush3.msk.msra.mxu1 %vm671_vm1, %v17013_v44  ;;  %22100 = vst [vmem:[#allocation14_spill] sm:$0xff] %v19232_v2  ;;  %v19284_v23 = vrot.slane %v631_v12, %v19108_v22  ;;  %v19327_v35 = vrot.slane %v392_v28, %v19108_v22  ;;  %v497_v44 = vld [vmem:[%s21995_s3 + $0xc] sm:$0xf]  ;;  %v502_v12 = vld [vmem:[%s21995_s3 + $0x20] sm:$0xf] }
 0x14a   :  { %17905 = vmatmul.mubr.msk.f32.vlgmr.msra.gmra.mxu0 %vm667_vm3, %v19145_v41  ;;  %17917 = vmatprep.subr.mxu1 %v22031_v6  ;;  %22101 = vst [vmem:[#allocation15_spill] sm:$0xff] %v19256_v13  ;;  %22102 = vst [vmem:[#allocation16_spill] sm:$0xff] %v19260_v14  ;;  %v19291_v24 = vcombine.high %v19256_v13, %v22031_v6  ;;  %v407_v37 = vcombine.low %v375_v25, %v390_v27 }
 0x14b   :  { %17914 = vmatprep.mubr.msk.f32.mxu0 %vm18969_vm2, %v22031_v6  ;;  %17913 = vmatpush3.msk.msra.mxu0 %vm671_vm1, %v17014_v47  ;;  %22103 = vst [vmem:[#allocation17_spill] sm:$0xff] %v19284_v23  ;;  %v19318_v31 = vcombine.high %v19284_v23, %v22031_v6  ;;  %22107 = vst [vmem:[#allocation21_spill] sm:$0xff] %v19327_v35  ;;  %v19331_v38 = vcombine.high %v19302_v29, %v22031_v6 }
 0x14c   :  { %17910 = vmatmul.mubr.msk.f32.vlgmr.msra.gmra.mxu1 %vm667_vm3, %v19181_v50  ;;  %17922 = vmatprep.subr.mxu0 %v22031_v6  ;;  %22104 = vst [vmem:[#allocation18_spill] sm:$0xff] %v19291_v24  ;;  %v408_v43 = vcombine.high %v375_v25, %v390_v27  ;;  %v19352_v45 = vrot.slane %v407_v37, %v19108_v22  ;;  %v505_v25 = vld [vmem:[%s21995_s3 + $0x2c] sm:$0xf] }
 0x14d   :  { %17919 = vmatprep.mubr.msk.f32.mxu1 %vm18969_vm2, %v22031_v6  ;;  %17918 = vmatpush3.msk.msra.mxu1 %vm671_vm1, %v17015_v51  ;;  %22106 = vst [vmem:[#allocation20_spill] sm:$0xff] %v19318_v31  ;;  %22108 = vst [vmem:[#allocation22_spill] sm:$0xff] %v19331_v38  ;;  %v19356_v46 = vcombine.high %v19327_v35, %v22031_v6  ;;  %v450_v47 = vrot.slane %v358_v40, %v19105_v21  ;;  %v17007_v51 = vld.sshfl [vmem:[%s21992_s1 + $0x8] sm:$0xff pattern:$0x76325410]  ;;  %s18973_s1 = smov 8  }
 0x14e   :  { %17915 = vmatmul.mubr.msk.f32.vlgmr.msra.gmra.mxu0 %vm667_vm3, %v19174_v48  ;;  %17927 = vmatprep.subr.mxu1 %v22031_v6  ;;  %22109 = vst [vmem:[#allocation23_spill] sm:$0xff] %v19352_v45  ;;  %v443_v53 = vcombine.high %v358_v40, %v22031_v6  ;;  %v19384_v55 = vrot.slane %v408_v43, %v19108_v22  ;;  %v508_v40 = vld [vmem:[%s21995_s3 + $0x38] sm:$0xf]  ;;  %v509_v43 = vld [vmem:[%s21995_s3 + $0x3c] sm:$0xf] }
 0x14f   :  { %17924 = vmatprep.mubr.msk.f32.mxu0 %vm18969_vm2, %v22031_v6  ;;  %17923 = vmatpush3.msk.msra.mxu0 %vm671_vm1, %v17016_v54  ;;  %22110 = vst [vmem:[#allocation24_spill] sm:$0xff] %v19356_v46  ;;  %v499_v54 = vld [vmem:[%s21995_s3 + $0x14] sm:$0xf]  ;;  %v19391_v59 = vcombine.high %v19352_v45, %v22031_v6  ;;  %v459_v7 = vcombine.high %v17007_v51, %v450_v47 }
 0x150   :  { %17920 = vmatmul.mubr.msk.f32.vlgmr.msra.gmra.mxu1 %vm667_vm3, %v19209_v57  ;;  %17932 = vmatprep.subr.mxu0 %v22031_v6  ;;  %22111 = vst [vmem:[#allocation25_spill] sm:$0xff] %v19384_v55  ;;  %v457_v63 = vrot.slane %v443_v53, %v19105_v21 }
 0x151   :  { %17929 = vmatprep.mubr.msk.f32.mxu1 %vm18969_vm2, %v22031_v6  ;;  %17928 = vmatpush3.msk.msra.mxu1 %vm671_vm1, %v17017_v58  ;;  %v458_v58 = vcombine.low %v17007_v51, %v450_v47  ;;  %22112 = vst [vmem:[#allocation26_spill] sm:$0xff] %v19391_v59 }
 0x152   :  { %17925 = vmatmul.mubr.msk.f32.vlgmr.msra.gmra.mxu0 %vm667_vm3, %v19202_v56  ;;  %17937 = vmatprep.subr.mxu1 %v22031_v6  ;;  %v474_v17 = vcombine.low %v442_v61, %v457_v63 }
 0x153   :  { %17934 = vmatprep.mubr.msk.f32.mxu0 %vm18969_vm2, %v22031_v6  ;;  %17933 = vmatpush3.msk.msra.mxu0 %vm671_vm1, %v17018_v60  ;;  %v500_v60 = vld [vmem:[%s21995_s3 + $0x18] sm:$0xf]  ;;  %v19411_v8 = vrot.slane %v458_v58, %v19108_v22 }
 0x154   :  { %17930 = vmatmul.mubr.msk.f32.vlgmr.msra.gmra.mxu1 %vm667_vm3, %v19232_v2  ;;  %17942 = vmatprep.subr.mxu0 %v22031_v6  ;;  %v19461_v27 = vrot.slane %v474_v17, %v19108_v22 }
 0x155   :  { %17939 = vmatprep.mubr.msk.f32.mxu1 %vm18969_vm2, %v22031_v6  ;;  %17938 = vmatpush3.msk.msra.mxu1 %vm671_vm1, %v17019_v3  ;;  %v501_v3 = vld [vmem:[%s21995_s3 + $0x1c] sm:$0xf]  ;;  %22113 = vst [vmem:[#allocation27_spill] sm:$0xff] %v19411_v8  ;;  %v19440_v18 = vcombine.high %v19411_v8, %v22031_v6 }
 0x156   :  { %17935 = vmatmul.mubr.msk.f32.vlgmr.msra.gmra.mxu0 %vm667_vm3, %v19228_v62  ;;  %17947 = vmatprep.subr.mxu1 %v22031_v6  ;;  %22117 = vst [vmem:[#allocation31_spill] sm:$0xff] %v19461_v27 }
 0x157   :  { %17944 = vmatprep.mubr.msk.f32.mxu0 %vm18969_vm2, %v22031_v6  ;;  %17943 = vmatpush3.msk.msra.mxu0 %vm671_vm1, %v17020_v9  ;;  %v19418_v9 = vcombine.high %v19384_v55, %v22031_v6  ;;  %22116 = vst [vmem:[#allocation30_spill] sm:$0xff] %v19440_v18 }
 0x158   :  { %17940 = vmatmul.mubr.msk.f32.vlgmr.msra.gmra.mxu1 %vm667_vm3, %v19260_v14  ;;  %17952 = vmatprep.subr.mxu0 %v22031_v6 }
 0x159   :  { %17949 = vmatprep.mubr.msk.f32.mxu1 %vm18969_vm2, %v22031_v6  ;;  %17948 = vmatpush3.msk.msra.mxu1 %vm671_vm1, %v17021_v16  ;;  %22114 = vst [vmem:[#allocation28_spill] sm:$0xff] %v19418_v9  ;;  %v19436_v16 = vrot.slane %v459_v7, %v19108_v22 }
 0x15a   :  { %17945 = vmatmul.mubr.msk.f32.vlgmr.msra.gmra.mxu0 %vm667_vm3, %v19256_v13  ;;  %17957 = vmatprep.subr.mxu1 %v22031_v6 }
 0x15b   :  { %17954 = vmatprep.mubr.msk.f32.mxu0 %vm18969_vm2, %v22031_v6  ;;  %17953 = vmatpush3.msk.msra.mxu0 %vm671_vm1, %v17022_v20  ;;  %22115 = vst [vmem:[#allocation29_spill] sm:$0xff] %v19436_v16  ;;  %v504_v20 = vld [vmem:[%s21995_s3 + $0x28] sm:$0xf]  ;;  %v19465_v28 = vcombine.high %v19436_v16, %v22031_v6 }
 0x15c   :  { %17950 = vmatmul.mubr.msk.f32.vlgmr.msra.gmra.mxu1 %vm667_vm3, %v19291_v24  ;;  %17962 = vmatprep.subr.mxu0 %v22031_v6 }
 0x15d   :  { %17959 = vmatprep.mubr.msk.f32.mxu1 %vm18969_vm2, %v22031_v6  ;;  %17958 = vmatpush3.msk.msra.mxu1 %vm671_vm1, %v17023_v26  ;;  %v475_v26 = vcombine.high %v442_v61, %v457_v63  ;;  %22118 = vst [vmem:[#allocation32_spill] sm:$0xff] %v19465_v28 }
 0x15e   :  { %17955 = vmatmul.mubr.msk.f32.vlgmr.msra.gmra.mxu0 %vm667_vm3, %v19284_v23  ;;  %17967 = vmatprep.subr.mxu1 %v22031_v6 }
 0x15f   :  { %17964 = vmatprep.mubr.msk.f32.mxu0 %vm18969_vm2, %v22031_v6  ;;  %17963 = vmatpush3.msk.msra.mxu0 %vm671_vm1, %v494_v30  ;;  %v506_v30 = vld [vmem:[%s21995_s3 + $0x30] sm:$0xf]  ;;  %v19486_v37 = vrot.slane %v475_v26, %v19108_v22 }
 0x160   :  { %17960 = vmatmul.mubr.msk.f32.vlgmr.msra.gmra.mxu1 %vm667_vm3, %v19318_v31  ;;  %17972 = vmatprep.subr.mxu0 %v22031_v6 }
 0x161   :  { %17969 = vmatprep.mubr.msk.f32.mxu1 %vm18969_vm2, %v22031_v6  ;;  %17968 = vmatpush3.msk.msra.mxu1 %vm671_vm1, %v495_v33  ;;  %v507_v33 = vld [vmem:[%s21995_s3 + $0x34] sm:$0xf]  ;;  %22119 = vst [vmem:[#allocation33_spill] sm:$0xff] %v19486_v37 }
 0x162   :  { %17965 = vmatmul.mubr.msk.f32.vlgmr.msra.gmra.mxu0 %vm667_vm3, %v19302_v29  ;;  %17977 = vmatprep.subr.mxu1 %v22031_v6 }
 0x163   :  { %17974 = vmatprep.mubr.msk.f32.mxu0 %vm18969_vm2, %v22031_v6  ;;  %17973 = vmatpush3.msk.msra.mxu0 %vm671_vm1, %v496_v39  ;;  %v19493_v39 = vcombine.high %v19461_v27, %v22031_v6 }
 0x164   :  { %17970 = vmatmul.mubr.msk.f32.vlgmr.msra.gmra.mxu1 %vm667_vm3, %v19331_v38  ;;  %17982 = vmatprep.subr.mxu0 %v22031_v6 }
 0x165   :  { %17979 = vmatprep.mubr.msk.f32.mxu1 %vm18969_vm2, %v22031_v6  ;;  %17978 = vmatpush3.msk.msra.mxu1 %vm671_vm1, %v497_v44  ;;  %22120 = vst [vmem:[#allocation34_spill] sm:$0xff] %v19493_v39  ;;  %v19515_v44 = vcombine.high %v19486_v37, %v22031_v6 }
 0x166   :  { %17975 = vmatmul.mubr.msk.f32.vlgmr.msra.gmra.mxu0 %vm667_vm3, %v19327_v35  ;;  %17987 = vmatprep.subr.mxu1 %v22031_v6 }
 0x167   :  { %17984 = vmatprep.mubr.msk.f32.mxu0 %vm18969_vm2, %v22031_v6  ;;  %17983 = vmatpush3.msk.msra.mxu0 %vm671_vm1, %v498_v49  ;;  %22121 = vst [vmem:[#allocation35_spill] sm:$0xff] %v19515_v44 }
 0x168   :  { %17980 = vmatmul.mubr.msk.f32.vlgmr.msra.gmra.mxu1 %vm667_vm3, %v19356_v46  ;;  %17992 = vmatprep.subr.mxu0 %v22031_v6 }
 0x169   :  { %17989 = vmatprep.mubr.msk.f32.mxu1 %vm18969_vm2, %v22031_v6  ;;  %17988 = vmatpush3.msk.msra.mxu1 %vm671_vm1, %v499_v54 }
 0x16a   :  { %17985 = vmatmul.mubr.msk.f32.vlgmr.msra.gmra.mxu0 %vm667_vm3, %v19352_v45  ;;  %17997 = vmatprep.subr.mxu1 %v22031_v6 }
 0x16b   :  { %17994 = vmatprep.mubr.msk.f32.mxu0 %vm18969_vm2, %v22031_v6  ;;  %17993 = vmatpush3.msk.msra.mxu0 %vm671_vm1, %v500_v60  ;;  %v17089_v60 = vld [vmem:[%s21995_s3 + $0x84] sm:$0xf] }
 0x16c   :  { %17990 = vmatmul.mubr.msk.f32.vlgmr.msra.gmra.mxu1 %vm667_vm3, %v19391_v59  ;;  %18002 = vmatprep.subr.mxu0 %v22031_v6 }
 0x16d   :  { %17999 = vmatprep.mubr.msk.f32.mxu1 %vm18969_vm2, %v22031_v6  ;;  %17998 = vmatpush3.msk.msra.mxu1 %vm671_vm1, %v501_v3 }
 0x16e   :  { %17995 = vmatmul.mubr.msk.f32.vlgmr.msra.gmra.mxu0 %vm667_vm3, %v19384_v55  ;;  %18007 = vmatprep.subr.mxu1 %v22031_v6 }
 0x16f   :  { %18004 = vmatprep.mubr.msk.f32.mxu0 %vm18969_vm2, %v22031_v6  ;;  %18003 = vmatpush3.msk.msra.mxu0 %vm671_vm1, %v502_v12 }
 0x170   :  { %18000 = vmatmul.mubr.msk.f32.vlgmr.msra.gmra.mxu1 %vm667_vm3, %v19418_v9  ;;  %18012 = vmatprep.subr.mxu0 %v22031_v6 }
 0x171   :  { %18009 = vmatprep.mubr.msk.f32.mxu1 %vm18969_vm2, %v22031_v6  ;;  %18008 = vmatpush3.msk.msra.mxu1 %vm671_vm1, %v503_v15 }
 0x172   :  { %18005 = vmatmul.mubr.msk.f32.vlgmr.msra.gmra.mxu0 %vm667_vm3, %v19411_v8  ;;  %18017 = vmatprep.subr.mxu1 %v22031_v6 }
 0x173   :  { %18014 = vmatprep.mubr.msk.f32.mxu0 %vm18969_vm2, %v22031_v6  ;;  %18013 = vmatpush3.msk.msra.mxu0 %vm671_vm1, %v504_v20 }
 0x174   :  { %18010 = vmatmul.mubr.msk.f32.vlgmr.msra.gmra.mxu1 %vm667_vm3, %v19440_v18  ;;  %18022 = vmatprep.subr.mxu0 %v22031_v6 }
 0x175   :  { %18019 = vmatprep.mubr.msk.f32.mxu1 %vm18969_vm2, %v22031_v6  ;;  %18018 = vmatpush3.msk.msra.mxu1 %vm671_vm1, %v505_v25 }
 0x176   :  { %18015 = vmatmul.mubr.msk.f32.vlgmr.msra.gmra.mxu0 %vm667_vm3, %v19436_v16  ;;  %18027 = vmatprep.subr.mxu1 %v22031_v6 }
 0x177   :  { %18024 = vmatprep.mubr.msk.f32.mxu0 %vm18969_vm2, %v22031_v6  ;;  %18023 = vmatpush3.msk.msra.mxu0 %vm671_vm1, %v506_v30 }
 0x178   :  { %18020 = vmatmul.mubr.msk.f32.vlgmr.msra.gmra.mxu1 %vm667_vm3, %v19465_v28  ;;  %18032 = vmatprep.subr.mxu0 %v22031_v6 }
 0x179   :  { %18029 = vmatprep.mubr.msk.f32.mxu1 %vm18969_vm2, %v22031_v6  ;;  %18028 = vmatpush3.msk.msra.mxu1 %vm671_vm1, %v507_v33 }
 0x17a   :  { %18025 = vmatmul.mubr.msk.f32.vlgmr.msra.gmra.mxu0 %vm667_vm3, %v19461_v27  ;;  %18037 = vmatprep.subr.mxu1 %v22031_v6 }
 0x17b   :  { %18034 = vmatprep.mubr.msk.f32.mxu0 %vm18969_vm2, %v22031_v6  ;;  %18033 = vmatpush3.msk.msra.mxu0 %vm671_vm1, %v508_v40 }
 0x17c   :  { %18030 = vmatmul.mubr.msk.f32.vlgmr.msra.gmra.mxu1 %vm667_vm3, %v19493_v39  ;;  %18042 = vmatprep.subr.mxu0 %v22031_v6 }
 0x17d   :  { %18039 = vmatprep.mubr.msk.f32.mxu1 %vm18969_vm2, %v22031_v6  ;;  %18038 = vmatpush3.msk.msra.mxu1 %vm671_vm1, %v509_v43 }
 0x17e   :  { %18035 = vmatmul.mubr.msk.f32.vlgmr.msra.gmra.mxu0 %vm667_vm3, %v19486_v37  ;;  %18047 = vmatprep.subr.mxu1 %v22031_v6 }
 0x17f   :  { %18044 = vmatprep.mubr.msk.f32.mxu0 %vm18969_vm2, %v22031_v6  ;;  %18043 = vmatpush3.msk.msra.mxu0 %vm671_vm1, %v17088_v52 }
 0x180   :  { %18040 = vmatmul.mubr.msk.f32.vlgmr.msra.gmra.mxu1 %vm667_vm3, %v19515_v44  ;;  %18052 = vmatprep.subr.mxu0 %v22031_v6 }
 0x181   :  { %18049 = vmatprep.mubr.msk.f32.mxu1 %vm18969_vm2, %v22031_v6  ;;  %18048 = vmatpush3.msk.msra.mxu1 %vm671_vm1, %v17089_v60 }
 0x182   :  { %18057 = vmatprep.subr.mxu1 %v22031_v6 }
 0x18b   :  { %v17867_v47 = vpop.f32.mrf.mxu1 }
 0x18c   :  { %v196_v49 = vmul.f32 2.0, %v17867_v47 }
 0x18d   :  { %v186_v51 = vpop.f32.mrf.mxu1 }
 0x18e   :  { %v19535_v53 = vsub.f32 %v196_v49, %v19028_v0  ;;  %v195_v54 = vmul.f32 2.0, %v186_v51 }
 0x18f   :  { %v17881_v58 = vpop.f32.mrf.mxu1 }
 0x190   :  { %v197_v61 = vsub.f32 %v195_v54, %v19033_v1  ;;  %3105 = vrot.lane.b32.xlu1 %v19535_v53, %s18968_s21  ;;  %v350_v63 = vmul.f32 2.0, %v17881_v58  ;;  %v17090_v54 = vld [vmem:[%s21995_s3 + $0x88] sm:$0xf]  ;;  %v3182_v39 = vrot.slane %v19535_v53, %v19105_v21 }
 0x191   :  { %v340_v0 = vpop.f32.mrf.mxu1 }
 0x192   :  { %3103 = vrot.lane.b32.xlu0 %v197_v61, %s18968_s21  ;;  %v349_v3 = vmul.f32 2.0, %v340_v0  ;;  %v19553_v1 = vsub.f32 %v350_v63, %v19047_v4  ;;  %v3116_v25 = vrot.slane %v197_v61, %v19105_v21  ;;  %v3109_v60 = vcombine.high %v197_v61, %v22031_v6 }
 0x194   :  { %4652 = vrot.lane.b32.xlu1 %v19081_v10, %s18972_s30  ;;  %v19558_v7 = vsub.f32 %v349_v3, %v19055_v5 }
 0x196   :  { %4650 = vrot.lane.b32.xlu0 %v19085_v11, %s18972_s30 }
 0x198   :  { %4494 = vrot.lane.b32.xlu1 %v19047_v4, %s18972_s30 }
 0x19a   :  { %4492 = vrot.lane.b32.xlu0 %v19055_v5, %s18972_s30 }
 0x19c   :  { %7146 = vrot.lane.b32.xlu1 %v19553_v1, %s18972_s30 }
 0x19e   :  { %7144 = vrot.lane.b32.xlu0 %v19558_v7, %s18972_s30 }
 0x202   :  { %v19566_v12 = vpop.f32.mrf.mxu0 }
 0x204   :  { %v17886_v15 = vpop.f32.mrf.mxu0  ;;  %v19568_v17 = vpop.f32.mrf.mxu1 }
 0x205   :  { %v3104_v20 = vpop.permute.xlu0 %3103 }
 0x206   :  { %v3131_v26 = vrot.slane %v3104_v20, %v19105_v21  ;;  %v19572_v30 = vpop.f32.mrf.mxu0  ;;  %v17891_v33 = vpop.f32.mrf.mxu1  ;;  %v3124_v49 = vcombine.high %v3104_v20, %v22031_v6  ;;  %v17091_v20 = vld [vmem:[%s21995_s3 + $0x8c] sm:$0xf] }
 0x207   :  { %v3123_v33 = vrot.slane %v3109_v60, %v19105_v21 }
 0x208   :  { %v3139_v5 = vcombine.low %v3116_v25, %v3131_v26  ;;  %v17896_v40 = vpop.f32.mrf.mxu0  ;;  %v3140_v43 = vcombine.high %v3116_v25, %v3131_v26  ;;  %v19574_v47 = vpop.f32.mrf.mxu1  ;;  %v3138_v61 = vrot.slane %v3124_v49, %v19105_v21 }
 0x20a   :  { %v19578_v51 = vrot.slane %v3139_v5, %v19108_v22  ;;  %v19580_v52 = vpop.f32.mrf.mxu0  ;;  %v17901_v58 = vpop.f32.mrf.mxu1  ;;  %v19593_v3 = vrot.slane %v3140_v43, %v19108_v22  ;;  %v3155_v49 = vcombine.low %v3123_v33, %v3138_v61  ;;  %v3156_v44 = vcombine.high %v3123_v33, %v3138_v61  ;;  %v17094_v61 = vld [vmem:[%s21995_s3 + $0x98] sm:$0xf] }
 0x20b   :  { %v3106_v58 = vpop.permute.xlu1 %3105 }
 0x20c   :  { %22122 = vst [vmem:[#allocation36_spill] sm:$0xff] %v19578_v51  ;;  %v19588_v0 = vcombine.high %v19578_v51, %v22031_v6  ;;  %18045 = vmatmul.mubr.msk.f32.vlgmr.msra.gmra.mxu0 %vm667_vm3, %v19578_v51  ;;  %v17906_v63 = vpop.f32.mrf.mxu0  ;;  %22124 = vst [vmem:[#allocation38_spill] sm:$0xff] %v19593_v3  ;;  %v19595_v15 = vpop.f32.mrf.mxu1  ;;  %v19612_v40 = vcombine.high %v19593_v3, %v22031_v6  ;;  %v3190_v18 = vcombine.high %v3106_v58, %v22031_v6 }
 0x20d   :  { %18053 = vmatpush3.msk.msra.mxu0 %vm671_vm1, %v17090_v54  ;;  %18054 = vmatprep.mubr.msk.f32.mxu0 %vm18969_vm2, %v22031_v6  ;;  %v17092_v63 = vld [vmem:[%s21995_s3 + $0x90] sm:$0xf] }
 0x20e   :  { %22123 = vst [vmem:[#allocation37_spill] sm:$0xff] %v19588_v0  ;;  %18050 = vmatmul.mubr.msk.f32.vlgmr.msra.gmra.mxu1 %vm667_vm3, %v19588_v0  ;;  %v19604_v25 = vpop.f32.mrf.mxu0  ;;  %v17911_v26 = vpop.f32.mrf.mxu1  ;;  %22125 = vst [vmem:[#allocation39_spill] sm:$0xff] %v19612_v40  ;;  %18062 = vmatprep.subr.mxu0 %v22031_v6  ;;  %v3197_v0 = vrot.slane %v3106_v58, %v19105_v21  ;;  %v17095_v58 = vld [vmem:[%s21995_s3 + $0x9c] sm:$0xf]  ;;  %v3204_v59 = vrot.slane %v3190_v18, %v19105_v21 }
 0x20f   :  { %18058 = vmatpush3.msk.msra.mxu1 %vm671_vm1, %v17091_v20  ;;  %18059 = vmatprep.mubr.msk.f32.mxu1 %vm18969_vm2, %v22031_v6  ;;  %v17093_v26 = vld [vmem:[%s21995_s3 + $0x94] sm:$0xf] }
 0x210   :  { %v17916_v5 = vpop.f32.mrf.mxu0  ;;  %18055 = vmatmul.mubr.msk.f32.vlgmr.msra.gmra.mxu0 %vm667_vm3, %v19593_v3  ;;  %v19616_v43 = vpop.f32.mrf.mxu1  ;;  %18067 = vmatprep.subr.mxu1 %v22031_v6  ;;  %v3206_v38 = vcombine.high %v3182_v39, %v3197_v0 }
 0x211   :  { %18063 = vmatpush3.msk.msra.mxu0 %vm671_vm1, %v17092_v63  ;;  %18064 = vmatprep.mubr.msk.f32.mxu0 %vm18969_vm2, %v22031_v6  ;;  %v19655_v63 = vrot.slane %v3156_v44, %v19108_v22 }
 0x212   :  { %v19620_v54 = vpop.f32.mrf.mxu0  ;;  %18060 = vmatmul.mubr.msk.f32.vlgmr.msra.gmra.mxu1 %vm667_vm3, %v19612_v40  ;;  %v17921_v60 = vpop.f32.mrf.mxu1  ;;  %18072 = vmatprep.subr.mxu0 %v22031_v6 }
 0x213   :  { %v19636_v60 = vrot.slane %v3155_v49, %v19108_v22  ;;  %18068 = vmatpush3.msk.msra.mxu1 %vm671_vm1, %v17093_v26  ;;  %v3205_v49 = vcombine.low %v3182_v39, %v3197_v0  ;;  %22127 = vst [vmem:[#allocation41_spill] sm:$0xff] %v19655_v63  ;;  %18069 = vmatprep.mubr.msk.f32.mxu1 %vm18969_vm2, %v22031_v6  ;;  %v17097_v39 = vld [vmem:[%s21995_s3 + $0xa4] sm:$0xf] }
 0x214   :  { %v17926_v20 = vpop.f32.mrf.mxu0  ;;  %v19632_v5 = vpop.f32.mrf.mxu1  ;;  %18077 = vmatprep.subr.mxu1 %v22031_v6 }
 0x215   :  { %22126 = vst [vmem:[#allocation40_spill] sm:$0xff] %v19636_v60  ;;  %18065 = vmatmul.mubr.msk.f32.vlgmr.msra.gmra.mxu0 %vm667_vm3, %v19636_v60 }
 0x216   :  { %v19639_v40 = vpop.f32.mrf.mxu0  ;;  %v17931_v20 = vpop.f32.mrf.mxu1  ;;  %18073 = vmatpush3.msk.msra.mxu0 %vm671_vm1, %v17094_v61  ;;  %18074 = vmatprep.mubr.msk.f32.mxu0 %vm18969_vm2, %v22031_v6  ;;  %v19688_v61 = vcombine.high %v19655_v63, %v22031_v6 }
 0x217   :  { %v3175_v20 = vcombine.high %v19535_v53, %v22031_v6  ;;  %v19682_v53 = vrot.slane %v3205_v49, %v19108_v22  ;;  %18082 = vmatprep.subr.mxu0 %v22031_v6 }
 0x218   :  { %v17936_v28 = vpop.f32.mrf.mxu0  ;;  %v19652_v33 = vpop.f32.mrf.mxu1  ;;  %22130 = vst [vmem:[#allocation44_spill] sm:$0xff] %v19688_v61 }
 0x219   :  { %v19661_v28 = vcombine.high %v19636_v60, %v22031_v6  ;;  %22129 = vst [vmem:[#allocation43_spill] sm:$0xff] %v19682_v53  ;;  %18075 = vmatmul.mubr.msk.f32.vlgmr.msra.gmra.mxu0 %vm667_vm3, %v19655_v63  ;;  %v19713_v31 = vcombine.high %v19682_v53, %v22031_v6 }
 0x21a   :  { %v19667_v26 = vpop.f32.mrf.mxu0  ;;  %v17941_v44 = vpop.f32.mrf.mxu1  ;;  %18084 = vmatprep.mubr.msk.f32.mxu0 %vm18969_vm2, %v22031_v6 }
 0x21b   :  { %22128 = vst [vmem:[#allocation42_spill] sm:$0xff] %v19661_v28  ;;  %18070 = vmatmul.mubr.msk.f32.vlgmr.msra.gmra.mxu1 %vm667_vm3, %v19661_v28  ;;  %v19709_v28 = vrot.slane %v3206_v38, %v19108_v22  ;;  %22132 = vst [vmem:[#allocation46_spill] sm:$0xff] %v19713_v31  ;;  %v17099_v38 = vld [vmem:[%s21995_s3 + $0xac] sm:$0xf] }
 0x21c   :  { %v17946_v9 = vpop.f32.mrf.mxu0  ;;  %18078 = vmatpush3.msk.msra.mxu1 %vm671_vm1, %v17095_v58  ;;  %v19679_v46 = vpop.f32.mrf.mxu1  ;;  %v3189_v58 = vrot.slane %v3175_v20, %v19105_v21  ;;  %18079 = vmatprep.mubr.msk.f32.mxu1 %vm18969_vm2, %v22031_v6 }
 0x21d   :  { %v17096_v9 = vld [vmem:[%s21995_s3 + $0xa0] sm:$0xf]  ;;  %18087 = vmatprep.subr.mxu1 %v22031_v6  ;;  %22131 = vst [vmem:[#allocation45_spill] sm:$0xff] %v19709_v28 }
 0x21e   :  { %v19693_v18 = vpop.f32.mrf.mxu0  ;;  %v17951_v0 = vpop.f32.mrf.mxu1  ;;  %v3221_v44 = vcombine.low %v3189_v58, %v3204_v59  ;;  %18083 = vmatpush3.msk.msra.mxu0 %vm671_vm1, %v17096_v9  ;;  %v3222_v2 = vcombine.high %v3189_v58, %v3204_v59 }
 0x21f   :  { %18080 = vmatmul.mubr.msk.f32.vlgmr.msra.gmra.mxu1 %vm667_vm3, %v19688_v61  ;;  %v17098_v0 = vld [vmem:[%s21995_s3 + $0xa8] sm:$0xf]  ;;  %v4651_v9 = vpop.permute.xlu0 %4650  ;;  %18085 = vmatmul.mubr.msk.f32.vlgmr.msra.gmra.mxu0 %vm667_vm3, %v19682_v53 }
 0x220   :  { %v17956_v49 = vpop.f32.mrf.mxu0  ;;  %v19706_v20 = vpop.f32.mrf.mxu1  ;;  %18088 = vmatpush3.msk.msra.mxu1 %vm671_vm1, %v17097_v39  ;;  %18089 = vmatprep.mubr.msk.f32.mxu1 %vm18969_vm2, %v22031_v6  ;;  %v19737_v57 = vrot.slane %v3221_v44, %v19108_v22  ;;  %v17101_v44 = vld [vmem:[%s21995_s3 + $0xb4] sm:$0xf]  ;;  %v4671_v50 = vcombine.high %v4651_v9, %v22031_v6 }
 0x221   :  { %v19731_v39 = vpop.permute.xlu1 %4652  ;;  %18092 = vmatprep.subr.mxu0 %v22031_v6  ;;  %18097 = vmatprep.subr.mxu1 %v22031_v6 }
 0x222   :  { %v1957_v49 = vpop.f32.mrf.mxu0  ;;  %v17961_v61 = vpop.f32.mrf.mxu1  ;;  %22133 = vst [vmem:[#allocation47_spill] sm:$0xff] %v19737_v57  ;;  %18093 = vmatpush3.msk.msra.mxu0 %vm671_vm1, %v17098_v0  ;;  %18094 = vmatprep.mubr.msk.f32.mxu0 %vm18969_vm2, %v22031_v6  ;;  %v4737_v53 = vcombine.high %v19731_v39, %v22031_v6 }
 0x223   :  { %v19729_v24 = vadd.f32 %v1957_v49, %v19566_v12  ;;  %18090 = vmatmul.mubr.msk.f32.vlgmr.msra.gmra.mxu1 %vm667_vm3, %v19713_v31  ;;  %v19743_v12 = vcombine.high %v19709_v28, %v22031_v6  ;;  %v19746_v49 = vrot.slane %v4651_v9, %v19105_v21  ;;  %18095 = vmatmul.mubr.msk.f32.vlgmr.msra.gmra.mxu0 %vm667_vm3, %v19709_v28  ;;  %v19808_v9 = vld.sshfl [vmem:[%s21994_s2 + $0x8] sm:$0xff pattern:$0x76325410] }
 0x224   :  { %v17966_v14 = vpop.f32.mrf.mxu0  ;;  %v2033_v61 = vpop.f32.mrf.mxu1  ;;  %18098 = vmatpush3.msk.msra.mxu1 %vm671_vm1, %v17099_v38  ;;  %18099 = vmatprep.mubr.msk.f32.mxu1 %vm18969_vm2, %v22031_v6  ;;  %v4663_v31 = vrot.slane %v19085_v11, %v19105_v21 }
 0x225   :  { %22134 = vst [vmem:[#allocation48_spill] sm:$0xff] %v19743_v12  ;;  %v17100_v14 = vld [vmem:[%s21995_s3 + $0xb0] sm:$0xf]  ;;  %v19755_v59 = vadd.f32 %v2033_v61, %v19568_v17  ;;  %18102 = vmatprep.subr.mxu0 %v22031_v6  ;;  %v19773_v61 = vrot.slane %v3222_v2, %v19108_v22  ;;  %18107 = vmatprep.subr.mxu1 %v22031_v6  ;;  %v17102_v2 = vld [vmem:[%s21995_s3 + $0xb8] sm:$0xf] }
 0x226   :  { %v2109_v58 = vpop.f32.mrf.mxu0  ;;  %v17971_v0 = vpop.f32.mrf.mxu1  ;;  %18103 = vmatpush3.msk.msra.mxu0 %vm671_vm1, %v17100_v14  ;;  %18104 = vmatprep.mubr.msk.f32.mxu0 %vm18969_vm2, %v22031_v6  ;;  %v4687_v28 = vcombine.high %v4663_v31, %v19746_v49 }
 0x227   :  { %v19765_v38 = vadd.f32 %v2109_v58, %v19572_v30  ;;  %18100 = vmatmul.mubr.msk.f32.vlgmr.msra.gmra.mxu1 %vm667_vm3, %v19743_v12  ;;  %22135 = vst [vmem:[#allocation49_spill] sm:$0xff] %v19773_v61  ;;  %v4686_v30 = vcombine.low %v4663_v31, %v19746_v49  ;;  %v4495_v58 = vpop.permute.xlu1 %4494  ;;  %v19783_v12 = vcombine.high %v19737_v57, %v22031_v6 }
 0x228   :  { %v17976_v17 = vpop.f32.mrf.mxu0  ;;  %v2185_v0 = vpop.f32.mrf.mxu1  ;;  %18108 = vmatpush3.msk.msra.mxu1 %vm671_vm1, %v17101_v44  ;;  %v19793_v42 = vrot.slane %v4495_v58, %v19105_v21  ;;  %18105 = vmatmul.mubr.msk.f32.vlgmr.msra.gmra.mxu0 %vm667_vm3, %v19737_v57  ;;  %v17103_v44 = vld [vmem:[%s21995_s3 + $0xbc] sm:$0xf]  ;;  %v4656_v57 = vcombine.high %v19085_v11, %v22031_v6  ;;  %v17138_v11 = vld [vmem:[%s21996_s4 + $0x80] sm:$0xff] }
 0x229   :  { %22136 = vst [vmem:[#allocation50_spill] sm:$0xff] %v19783_v12  ;;  %v19789_v17 = vadd.f32 %v2185_v0, %v19574_v47  ;;  %18109 = vmatprep.mubr.msk.f32.mxu1 %vm18969_vm2, %v22031_v6  ;;  %18112 = vmatprep.subr.mxu0 %v22031_v6 }
 0x22a   :  { %v2261_v14 = vpop.f32.mrf.mxu0  ;;  %v17981_v36 = vpop.f32.mrf.mxu1  ;;  %18117 = vmatprep.subr.mxu1 %v22031_v6  ;;  %18113 = vmatpush3.msk.msra.mxu0 %vm671_vm1, %v17102_v2  ;;  %v19833_v2 = vrot.slane %v4671_v50, %v19105_v21 }
 0x22b   :  { %v19803_v47 = vadd.f32 %v2261_v14, %v19580_v52  ;;  %18110 = vmatmul.mubr.msk.f32.vlgmr.msra.gmra.mxu1 %vm667_vm3, %v19783_v12  ;;  %v4694_v52 = vrot.slane %v4686_v30, %v19108_v22  ;;  %18114 = vmatprep.mubr.msk.f32.mxu0 %vm18969_vm2, %v22031_v6  ;;  %v19824_v14 = vcombine.high %v19773_v61, %v22031_v6 }
 0x22c   :  { %v17986_v0 = vpop.f32.mrf.mxu0  ;;  %v2337_v36 = vpop.f32.mrf.mxu1  ;;  %18118 = vmatpush3.msk.msra.mxu1 %vm671_vm1, %v17103_v44  ;;  %v4596_v30 = vcombine.low %v19808_v9, %v19793_v42  ;;  %18115 = vmatmul.mubr.msk.f32.vlgmr.msra.gmra.mxu0 %vm667_vm3, %v19773_v61  ;;  %v17139_v44 = vld [vmem:[%s21996_s4 + $0x88] sm:$0xff]  ;;  %v4566_v12 = vcombine.high %v19047_v4, %v22031_v6  ;;  %v4581_v61 = vcombine.high %v4495_v58, %v22031_v6 }
 0x22d   :  { %22137 = vst [vmem:[#allocation51_spill] sm:$0xff] %v19824_v14  ;;  %v19830_v31 = vadd.f32 %v2337_v36, %v19595_v15  ;;  %18119 = vmatprep.mubr.msk.f32.mxu1 %vm18969_vm2, %v22031_v6  ;;  %18122 = vmatprep.subr.mxu0 %v22031_v6  ;;  %v19851_v36 = vrot.slane %v4656_v57, %v19105_v21  ;;  %v17140_v57 = vld [vmem:[%s21996_s4 + $0x90] sm:$0xff] }
 0x22e   :  { %v2413_v49 = vpop.f32.mrf.mxu0  ;;  %v17991_v0 = vpop.f32.mrf.mxu1  ;;  %18127 = vmatprep.subr.mxu1 %v22031_v6  ;;  %18123 = vmatpush3.msra.mxu0 %v17138_v11 }
 0x22f   :  { %v19845_v15 = vadd.f32 %v2413_v49, %v19604_v25  ;;  %18120 = vmatmul.mubr.msk.f32.vlgmr.msra.gmra.mxu1 %vm667_vm3, %v19824_v14  ;;  %v4701_v49 = vrot.slane %v4687_v28, %v19108_v22  ;;  %v4718_v0 = vcombine.high %v4694_v52, %v22031_v6  ;;  %18124 = vmatprep.mubr.msk.f32.mxu0 %vm18969_vm2, %v22031_v6  ;;  %v17141_v28 = vld [vmem:[%s21996_s4 + $0x98] sm:$0xff] }
 0x230   :  { %v17996_v50 = vpop.f32.mrf.mxu0  ;;  %v2489_v25 = vpop.f32.mrf.mxu1  ;;  %18128 = vmatpush3.msra.mxu1 %v17139_v44  ;;  %v4702_v11 = vcombine.low %v19851_v36, %v19833_v2  ;;  %18125 = vmatmul.mubr.msk.f32.vlgmr.msra.gmra.mxu0 %vm4805_vm4, %v4694_v52  ;;  %v19886_v52 = vrot.slane %v4566_v12, %v19105_v21  ;;  %v19889_v14 = vrot.slane %v4581_v61, %v19105_v21  ;;  %v17142_v61 = vld [vmem:[%s21996_s4 + $0xa0] sm:$0xff] }
 0x231   :  { %v19865_v4 = vadd.f32 %v2489_v25, %v19616_v43  ;;  %v19870_v50 = vrot.slane %v4596_v30, %v19108_v22  ;;  %18129 = vmatprep.mubr.msk.f32.mxu1 %vm18969_vm2, %v22031_v6  ;;  %v4597_v25 = vcombine.high %v19808_v9, %v19793_v42  ;;  %18132 = vmatprep.subr.mxu0 %v22031_v6 }
 0x232   :  { %v2565_v58 = vpop.f32.mrf.mxu0  ;;  %v18001_v44 = vpop.f32.mrf.mxu1  ;;  %18137 = vmatprep.subr.mxu1 %v22031_v6  ;;  %18133 = vmatpush3.msra.mxu0 %v17140_v57  ;;  %v4710_v12 = vrot.slane %v4702_v11, %v19108_v22  ;;  %v17143_v11 = vld [vmem:[%s21996_s4 + $0xa8] sm:$0xff] }
 0x233   :  { %22138 = vst [vmem:[#allocation52_spill] sm:$0xff] %v19870_v50  ;;  %v19879_v43 = vadd.f32 %v2565_v58, %v19620_v54  ;;  %18130 = vmatmul.mubr.msk.f32.vlgmr.msra.gmra.mxu1 %vm4805_vm4, %v4718_v0  ;;  %v4719_v54 = vcombine.high %v4701_v49, %v22031_v6  ;;  %18134 = vmatprep.mubr.msk.f32.mxu0 %vm18969_vm2, %v22031_v6 }
 0x234   :  { %v18006_v30 = vpop.f32.mrf.mxu0  ;;  %v2641_v44 = vpop.f32.mrf.mxu1  ;;  %18138 = vmatpush3.msra.mxu1 %v17141_v28  ;;  %18135 = vmatmul.mubr.msk.f32.vlgmr.msra.gmra.mxu0 %vm4805_vm4, %v4701_v49  ;;  %v19907_v0 = vcombine.high %v19870_v50, %v22031_v6  ;;  %v4703_v58 = vcombine.high %v19851_v36, %v19833_v2  ;;  %v19915_v49 = vrot.slane %v4597_v25, %v19108_v22 }
 0x235   :  { %v19896_v42 = vadd.f32 %v2641_v44, %v19632_v5  ;;  %18139 = vmatprep.mubr.msk.f32.mxu1 %vm18969_vm2, %v22031_v6  ;;  %8809 = vrot.lane.b32.xlu0 %v19870_v50, %s18973_s1  ;;  %v4612_v2 = vcombine.low %v19886_v52, %v19889_v14  ;;  %v19938_v44 = vrot.slane %v19081_v10, %v19105_v21 }
 0x236   :  { %v2717_v9 = vpop.f32.mrf.mxu0  ;;  %22139 = vst [vmem:[#allocation53_spill] sm:$0xff] %v19907_v0  ;;  %v18011_v57 = vpop.f32.mrf.mxu1  ;;  %22140 = vst [vmem:[#allocation54_spill] sm:$0xff] %v19915_v49  ;;  %18142 = vmatprep.subr.mxu0 %v22031_v6  ;;  %18147 = vmatprep.subr.mxu1 %v22031_v6 }
 0x237   :  { %v19910_v5 = vadd.f32 %v2717_v9, %v19639_v40  ;;  %18140 = vmatmul.mubr.msk.f32.vlgmr.msra.gmra.mxu1 %vm4805_vm4, %v4719_v54  ;;  %v19925_v40 = vrot.slane %v19731_v39, %v19105_v21  ;;  %18143 = vmatpush3.msra.mxu0 %v17142_v61  ;;  %v4720_v54 = vcombine.high %v4710_v12, %v22031_v6  ;;  %v17136_v39 = vld.sshfl [vmem:[%s21994_s2] sm:$0xff pattern:$0x76325410] }
 0x238   :  { %v18016_v28 = vpop.f32.mrf.mxu0  ;;  %v2793_v36 = vpop.f32.mrf.mxu1  ;;  %18144 = vmatprep.mubr.msk.f32.mxu0 %vm18969_vm2, %v22031_v6  ;;  %18148 = vmatpush3.msra.mxu1 %v17143_v11  ;;  %v4717_v57 = vrot.slane %v4703_v58, %v19108_v22  ;;  %v19955_v11 = vcombine.high %v19915_v49, %v22031_v6  ;;  %v19966_v58 = vrot.slane %v4612_v2, %v19108_v22 }
 0x239   :  { %v19934_v25 = vadd.f32 %v2793_v36, %v19652_v33  ;;  %8811 = vrot.lane.b32.xlu1 %v19907_v0, %s18973_s1  ;;  %18145 = vmatmul.mubr.msk.f32.vlgmr.msra.gmra.mxu0 %vm4805_vm4, %v4710_v12  ;;  %v17144_v33 = vld [vmem:[%s21996_s4 + $0xb0] sm:$0xff]  ;;  %v17145_v12 = vld [vmem:[%s21996_s4 + $0xb8] sm:$0xff]  ;;  %v4722_v2 = vcombine.high %v19081_v10, %v22031_v6  ;;  %v17146_v10 = vld [vmem:[%s21996_s4 + $0xc0] sm:$0xff] }
 0x23a   :  { %v2869_v30 = vpop.f32.mrf.mxu0  ;;  %v18021_v9 = vpop.f32.mrf.mxu1  ;;  %18149 = vmatprep.mubr.msk.f32.mxu1 %vm18969_vm2, %v22031_v6  ;;  %22141 = vst [vmem:[#allocation55_spill] sm:$0xff] %v19955_v11  ;;  %8813 = vrot.lane.b32.xlu0 %v19915_v49, %s18973_s1  ;;  %22142 = vst [vmem:[#allocation56_spill] sm:$0xff] %v19966_v58 }
 0x23b   :  { %v19944_v61 = vadd.f32 %v2869_v30, %v19667_v26  ;;  %v4752_v26 = vcombine.low %v19938_v44, %v19925_v40  ;;  %18150 = vmatmul.mubr.msk.f32.vlgmr.msra.gmra.mxu1 %vm4805_vm4, %v4720_v54  ;;  %v4613_v30 = vcombine.high %v19886_v52, %v19889_v14  ;;  %v4493_v9 = vpop.permute.xlu0 %4492  ;;  %18152 = vmatprep.subr.mxu0 %v22031_v6 }
 0x23c   :  { %v18026_v28 = vpop.f32.mrf.mxu0  ;;  %v2945_v36 = vpop.f32.mrf.mxu1  ;;  %18157 = vmatprep.subr.mxu1 %v22031_v6  ;;  %v19978_v63 = vrot.slane %v4493_v9, %v19105_v21  ;;  %18153 = vmatpush3.msra.mxu0 %v17144_v33 }
 0x23d   :  { %v19973_v28 = vadd.f32 %v2945_v36, %v19679_v46  ;;  %18154 = vmatprep.mubr.msk.f32.mxu0 %vm18969_vm2, %v22031_v6  ;;  %v4721_v46 = vcombine.high %v4717_v57, %v22031_v6  ;;  %18158 = vmatpush3.msra.mxu1 %v17145_v12  ;;  %v4760_v36 = vrot.slane %v4752_v26, %v19108_v22 }
 0x23e   :  { %v3021_v54 = vpop.f32.mrf.mxu0  ;;  %v18031_v14 = vpop.f32.mrf.mxu1  ;;  %8815 = vrot.lane.b32.xlu1 %v19955_v11, %s18973_s1  ;;  %18155 = vmatmul.mubr.msk.f32.vlgmr.msra.gmra.mxu0 %vm4805_vm4, %v4717_v57  ;;  %v17147_v57 = vld [vmem:[%s21996_s4 + $0xc8] sm:$0xff]  ;;  %v20013_v26 = vrot.slane %v4613_v30, %v19108_v22 }
 0x23f   :  { %v19983_v52 = vadd.f32 %v3021_v54, %v19693_v18  ;;  %18159 = vmatprep.mubr.msk.f32.mxu1 %vm18969_vm2, %v22031_v6  ;;  %v20002_v18 = vcombine.high %v19966_v58, %v22031_v6  ;;  %v4753_v54 = vcombine.high %v19938_v44, %v19925_v40  ;;  %8817 = vrot.lane.b32.xlu0 %v19966_v58, %s18973_s1  ;;  %v22145_v40 = vmov 0.0  }
 0x240   :  { %v18036_v33 = vpop.f32.mrf.mxu0  ;;  %v3097_v12 = vpop.f32.mrf.mxu1  ;;  %18160 = vmatmul.mubr.msk.f32.vlgmr.msra.gmra.mxu1 %vm4805_vm4, %v4721_v46  ;;  %22144 = vst [vmem:[#allocation58_spill] sm:$0xff] %v20013_v26  ;;  %v4529_v6 = vcombine.low %v17136_v39, %v19978_v63  ;;  %18162 = vmatprep.subr.mxu0 %v22145_v40  ;;  %v4736_v46 = vrot.slane %v4722_v2, %v19105_v21 }
 0x241   :  { %22143 = vst [vmem:[#allocation57_spill] sm:$0xff] %v20002_v18  ;;  %v20016_v14 = vadd.f32 %v3097_v12, %v19706_v20  ;;  %v4751_v33 = vrot.slane %v4737_v53, %v19105_v21  ;;  %18167 = vmatprep.subr.mxu1 %v22145_v40  ;;  %18163 = vmatpush3.msra.mxu0 %v17146_v10  ;;  %v18964_v20 = vld [vmem:[%s21994_s2] sm:$0xff]  ;;  %v17148_v10 = vld [vmem:[%s21996_s4 + $0xd0] sm:$0xff] }
 0x242   :  { %v18041_v44 = vpop.f32.mrf.mxu1  ;;  %18164 = vmatprep.mubr.msk.f32.mxu0 %vm18969_vm2, %v22145_v40  ;;  %v4784_v30 = vcombine.high %v4760_v36, %v22145_v40  ;;  %v4499_v53 = vcombine.high %v18964_v20, %v22145_v40  ;;  %v4514_v12 = vcombine.high %v4493_v9, %v22145_v40  ;;  %18168 = vmatpush3.msra.mxu1 %v17147_v57 }
 0x243   :  { %8819 = vrot.lane.b32.xlu1 %v20002_v18, %s18973_s1  ;;  %v4767_v2 = vrot.slane %v4753_v54, %v19108_v22  ;;  %18165 = vmatmul.mubr.msk.f32.vlgmr.msra.gmra.mxu0 %vm4805_vm4, %v4760_v36  ;;  %v20042_v44 = vcombine.high %v20013_v26, %v22145_v40  ;;  %v4768_v9 = vcombine.low %v4736_v46, %v4751_v33  ;;  %v17149_v36 = vld [vmem:[%s21996_s4 + $0xd8] sm:$0xff] }
 0x244   :  { %18169 = vmatprep.mubr.msk.f32.mxu1 %vm18969_vm2, %v22145_v40  ;;  %v20045_v57 = vrot.slane %v4529_v6, %v19108_v22  ;;  %8821 = vrot.lane.b32.xlu0 %v20013_v26, %s18973_s1  ;;  %v4530_v54 = vcombine.high %v17136_v39, %v19978_v63  ;;  %v4513_v20 = vrot.slane %v4499_v53, %v19105_v21  ;;  %v17150_v39 = vld [vmem:[%s21996_s4 + $0xe0] sm:$0xff] }
 0x245   :  { %22146 = vst [vmem:[#allocation59_spill] sm:$0xff] %v20042_v44  ;;  %18170 = vmatmul.mubr.msk.f32.vlgmr.msra.gmra.mxu1 %vm4805_vm4, %v4784_v30  ;;  %18172 = vmatprep.subr.mxu0 %v22145_v40  ;;  %v4528_v6 = vrot.slane %v4514_v12, %v19105_v21  ;;  %v4785_v30 = vcombine.high %v4767_v2, %v22145_v40 }
 0x246   :  { %22147 = vst [vmem:[#allocation60_spill] sm:$0xff] %v20045_v57  ;;  %18177 = vmatprep.subr.mxu1 %v22145_v40  ;;  %18173 = vmatpush3.msra.mxu0 %v17148_v10  ;;  %v4776_v63 = vrot.slane %v4768_v9, %v19108_v22  ;;  %v20072_v53 = vcombine.high %v20045_v57, %v22145_v40 }
 0x247   :  { %18174 = vmatprep.mubr.msk.f32.mxu0 %vm18969_vm2, %v22145_v40  ;;  %18178 = vmatpush3.msra.mxu1 %v17149_v36  ;;  %v4769_v12 = vcombine.high %v4736_v46, %v4751_v33  ;;  %v20075_v10 = vrot.slane %v4530_v54, %v19108_v22  ;;  %v4545_v9 = vcombine.low %v4513_v20, %v4528_v6  ;;  %v17152_v36 = vld [vmem:[%s21996_s4 + $0xf0] sm:$0xff] }
 0x248   :  { %8823 = vrot.lane.b32.xlu1 %v20042_v44, %s18973_s1  ;;  %18175 = vmatmul.mubr.msk.f32.vlgmr.msra.gmra.mxu0 %vm4805_vm4, %v4767_v2  ;;  %22148 = vst [vmem:[#allocation61_spill] sm:$0xff] %v20072_v53  ;;  %v17151_v2 = vld [vmem:[%s21996_s4 + $0xe8] sm:$0xff]  ;;  %v4786_v33 = vcombine.high %v4776_v63, %v22145_v40 }
 0x249   :  { %18179 = vmatprep.mubr.msk.f32.mxu1 %vm18969_vm2, %v22145_v40  ;;  %22149 = vst [vmem:[#allocation62_spill] sm:$0xff] %v20075_v10  ;;  %8793 = vrot.lane.b32.xlu0 %v20045_v57, %s18973_s1  ;;  %v4783_v46 = vrot.slane %v4769_v12, %v19108_v22  ;;  %v20099_v54 = vcombine.high %v20075_v10, %v22145_v40 }
 0x24a   :  { %18180 = vmatmul.mubr.msk.f32.vlgmr.msra.gmra.mxu1 %vm4805_vm4, %v4785_v30  ;;  %18182 = vmatprep.subr.mxu0 %v22145_v40  ;;  %v17153_v30 = vld [vmem:[%s21996_s4 + $0xf8] sm:$0xff] }
 0x24b   :  { %18187 = vmatprep.subr.mxu1 %v22145_v40  ;;  %18183 = vmatpush3.msra.mxu0 %v17150_v39  ;;  %22150 = vst [vmem:[#allocation63_spill] sm:$0xff] %v20099_v54  ;;  %v4546_v39 = vcombine.high %v4513_v20, %v4528_v6  ;;  %v4787_v12 = vcombine.high %v4783_v46, %v22145_v40  ;;  %v4632_v20 = vld [vmem:[%s21996_s4] sm:$0xff] }
 0x24c   :  { %18184 = vmatprep.mubr.msk.f32.mxu0 %vm18969_vm2, %v22145_v40  ;;  %18188 = vmatpush3.msra.mxu1 %v17151_v2  ;;  %v4633_v2 = vld [vmem:[%s21996_s4 + $0x8] sm:$0xff] }
 0x24d   :  { %8795 = vrot.lane.b32.xlu1 %v20072_v53, %s18973_s1  ;;  %18185 = vmatmul.mubr.msk.f32.vlgmr.msra.gmra.mxu0 %vm4805_vm4, %v4776_v63  ;;  %v20108_v63 = vrot.slane %v4545_v9, %v19108_v22  ;;  %v20134_v9 = vrot.slane %v4546_v39, %v19108_v22  ;;  %v4637_v39 = vld [vmem:[%s21996_s4 + $0x28] sm:$0xff] }
 0x24e   :  { %18189 = vmatprep.mubr.msk.f32.mxu1 %vm18969_vm2, %v22145_v40  ;;  %8797 = vrot.lane.b32.xlu0 %v20075_v10, %s18973_s1 }
 0x24f   :  { %18190 = vmatmul.mubr.msk.f32.vlgmr.msra.gmra.mxu1 %vm4805_vm4, %v4786_v33  ;;  %22151 = vst [vmem:[#allocation64_spill] sm:$0xff] %v20108_v63  ;;  %18192 = vmatprep.subr.mxu0 %v22145_v40  ;;  %v20125_v6 = vcombine.high %v20108_v63, %v22145_v40  ;;  %22153 = vst [vmem:[#allocation66_spill] sm:$0xff] %v20134_v9  ;;  %v4634_v33 = vld [vmem:[%s21996_s4 + $0x10] sm:$0xff] }
 0x250   :  { %18197 = vmatprep.subr.mxu1 %v22145_v40  ;;  %18193 = vmatpush3.msra.mxu0 %v17152_v36  ;;  %v4635_v36 = vld [vmem:[%s21996_s4 + $0x18] sm:$0xff] }
 0x251   :  { %18194 = vmatprep.mubr.msk.f32.mxu0 %vm18969_vm2, %v22145_v40  ;;  %18198 = vmatpush3.msra.mxu1 %v17153_v30  ;;  %22152 = vst [vmem:[#allocation65_spill] sm:$0xff] %v20125_v6  ;;  %v4636_v30 = vld [vmem:[%s21996_s4 + $0x20] sm:$0xff] }
 0x252   :  { %8799 = vrot.lane.b32.xlu1 %v20099_v54, %s18973_s1  ;;  %18195 = vmatmul.mubr.msk.f32.vlgmr.msra.gmra.mxu0 %vm4805_vm4, %v4783_v46  ;;  %v20151_v46 = vcombine.high %v20134_v9, %v22145_v40 }
 0x253   :  { %18199 = vmatprep.mubr.msk.f32.mxu1 %vm18969_vm2, %v22145_v40  ;;  %8801 = vrot.lane.b32.xlu0 %v20108_v63, %s18973_s1 }
 0x254   :  { %18200 = vmatmul.mubr.msk.f32.vlgmr.msra.gmra.mxu1 %vm4805_vm4, %v4787_v12  ;;  %18202 = vmatprep.subr.mxu0 %v22145_v40  ;;  %22154 = vst [vmem:[#allocation67_spill] sm:$0xff] %v20151_v46  ;;  %v4638_v12 = vld [vmem:[%s21996_s4 + $0x30] sm:$0xff] }
 0x255   :  { %18207 = vmatprep.subr.mxu1 %v22145_v40  ;;  %18203 = vmatpush3.msra.mxu0 %v4632_v20  ;;  %v4639_v20 = vld [vmem:[%s21996_s4 + $0x38] sm:$0xff] }
 0x256   :  { %18204 = vmatprep.mubr.msk.f32.mxu0 %vm18969_vm2, %v22145_v40  ;;  %18208 = vmatpush3.msra.mxu1 %v4633_v2  ;;  %v4640_v2 = vld [vmem:[%s21996_s4 + $0x40] sm:$0xff] }
 0x257   :  { %8803 = vrot.lane.b32.xlu1 %v20125_v6, %s18973_s1  ;;  %18205 = vmatmul.mubr.msk.f32.vlgmr.msra.gmra.mxu0 %vm4805_vm4, %v20045_v57 }
 0x258   :  { %18209 = vmatprep.mubr.msk.f32.mxu1 %vm18969_vm2, %v22145_v40  ;;  %8805 = vrot.lane.b32.xlu0 %v20134_v9, %s18973_s1 }
 0x259   :  { %18210 = vmatmul.mubr.msk.f32.vlgmr.msra.gmra.mxu1 %vm4805_vm4, %v20072_v53  ;;  %18212 = vmatprep.subr.mxu0 %v22145_v40 }
 0x25a   :  { %18217 = vmatprep.subr.mxu1 %v22145_v40  ;;  %18213 = vmatpush3.msra.mxu0 %v4634_v33  ;;  %v4641_v33 = vld [vmem:[%s21996_s4 + $0x48] sm:$0xff] }
 0x25b   :  { %18214 = vmatprep.mubr.msk.f32.mxu0 %vm18969_vm2, %v22145_v40  ;;  %18218 = vmatpush3.msra.mxu1 %v4635_v36  ;;  %v4642_v36 = vld [vmem:[%s21996_s4 + $0x50] sm:$0xff] }
 0x25c   :  { %8807 = vrot.lane.b32.xlu1 %v20151_v46, %s18973_s1  ;;  %18215 = vmatmul.mubr.msk.f32.vlgmr.msra.gmra.mxu0 %vm4805_vm4, %v20075_v10 }
 0x25d   :  { %18219 = vmatprep.mubr.msk.f32.mxu1 %vm18969_vm2, %v22145_v40  ;;  %18222 = vmatprep.subr.mxu0 %v22145_v40 }
 0x25e   :  { %18220 = vmatmul.mubr.msk.f32.vlgmr.msra.gmra.mxu1 %vm4805_vm4, %v20099_v54  ;;  %18227 = vmatprep.subr.mxu1 %v22145_v40 }
 0x25f   :  { %18223 = vmatpush3.msra.mxu0 %v4636_v30  ;;  %18224 = vmatprep.mubr.msk.f32.mxu0 %vm18969_vm2, %v22145_v40  ;;  %v7145_v30 = vpop.permute.xlu0 %7144 }
 0x260   :  { %18228 = vmatpush3.msra.mxu1 %v4637_v39  ;;  %18225 = vmatmul.mubr.msk.f32.vlgmr.msra.gmra.mxu0 %vm4805_vm4, %v20108_v63  ;;  %v4643_v39 = vld [vmem:[%s21996_s4 + $0x58] sm:$0xff] }
 0x261   :  { %18229 = vmatprep.mubr.msk.f32.mxu1 %vm18969_vm2, %v22145_v40  ;;  %18232 = vmatprep.subr.mxu0 %v22145_v40 }
 0x262   :  { %18230 = vmatmul.mubr.msk.f32.vlgmr.msra.gmra.mxu1 %vm4805_vm4, %v20125_v6  ;;  %18237 = vmatprep.subr.mxu1 %v22145_v40 }
 0x263   :  { %18233 = vmatpush3.msra.mxu0 %v4638_v12  ;;  %18234 = vmatprep.mubr.msk.f32.mxu0 %vm18969_vm2, %v22145_v40  ;;  %v7172_v12 = vrot.slane %v7145_v30, %v19105_v21 }
 0x264   :  { %18238 = vmatpush3.msra.mxu1 %v4639_v20  ;;  %18235 = vmatmul.mubr.msk.f32.vlgmr.msra.gmra.mxu0 %vm4805_vm4, %v20134_v9  ;;  %v4644_v20 = vld [vmem:[%s21996_s4 + $0x60] sm:$0xff] }
 0x265   :  { %18239 = vmatprep.mubr.msk.f32.mxu1 %vm18969_vm2, %v22145_v40  ;;  %18242 = vmatprep.subr.mxu0 %v22145_v40 }
 0x266   :  { %18240 = vmatmul.mubr.msk.f32.vlgmr.msra.gmra.mxu1 %vm4805_vm4, %v20151_v46  ;;  %18247 = vmatprep.subr.mxu1 %v22145_v40 }
 0x267   :  { %18243 = vmatpush3.msra.mxu0 %v4640_v2  ;;  %18244 = vmatprep.mubr.msk.f32.mxu0 %vm18969_vm2, %v22145_v40  ;;  %v4645_v2 = vld [vmem:[%s21996_s4 + $0x68] sm:$0xff] }
 0x268   :  { %18248 = vmatpush3.msra.mxu1 %v4641_v33  ;;  %18245 = vmatmul.mubr.msk.f32.vlgmr.msra.gmra.mxu0 %vm4805_vm4, %v19870_v50  ;;  %v7157_v33 = vrot.slane %v19558_v7, %v19105_v21 }
 0x269   :  { %18249 = vmatprep.mubr.msk.f32.mxu1 %vm18969_vm2, %v22145_v40  ;;  %18252 = vmatprep.subr.mxu0 %v22145_v40 }
 0x26a   :  { %18250 = vmatmul.mubr.msk.f32.vlgmr.msra.gmra.mxu1 %vm4805_vm4, %v19907_v0  ;;  %18257 = vmatprep.subr.mxu1 %v22145_v40 }
 0x26b   :  { %18253 = vmatpush3.msra.mxu0 %v4642_v36  ;;  %18254 = vmatprep.mubr.msk.f32.mxu0 %vm18969_vm2, %v22145_v40  ;;  %v7165_v36 = vcombine.high %v7145_v30, %v22145_v40  ;;  %v7150_v30 = vcombine.high %v19558_v7, %v22145_v40  ;;  %v17186_v7 = vld [vmem:[%s21996_s4 + $0x100] sm:$0xff] }
 0x26c   :  { %18258 = vmatpush3.msra.mxu1 %v4643_v39  ;;  %18255 = vmatmul.mubr.msk.f32.vlgmr.msra.gmra.mxu0 %vm4805_vm4, %v19915_v49  ;;  %v7180_v39 = vcombine.low %v7157_v33, %v7172_v12  ;;  %v4646_v49 = vld [vmem:[%s21996_s4 + $0x70] sm:$0xff] }
 0x26d   :  { %18259 = vmatprep.mubr.msk.f32.mxu1 %vm18969_vm2, %v22145_v40  ;;  %18262 = vmatprep.subr.mxu0 %v22145_v40 }
 0x26e   :  { %18260 = vmatmul.mubr.msk.f32.vlgmr.msra.gmra.mxu1 %vm4805_vm4, %v19955_v11  ;;  %18267 = vmatprep.subr.mxu1 %v22145_v40  ;;  %v7188_v11 = vrot.slane %v7180_v39, %v19108_v22 }
 0x26f   :  { %18263 = vmatpush3.msra.mxu0 %v4644_v20  ;;  %18264 = vmatprep.mubr.msk.f32.mxu0 %vm18969_vm2, %v22145_v40  ;;  %v4647_v20 = vld [vmem:[%s21996_s4 + $0x78] sm:$0xff] }
 0x270   :  { %18268 = vmatpush3.msra.mxu1 %v4645_v2  ;;  %18265 = vmatmul.mubr.msk.f32.vlgmr.msra.gmra.mxu0 %vm4805_vm4, %v19966_v58  ;;  %v7179_v2 = vrot.slane %v7165_v36, %v19105_v21  ;;  %v7181_v58 = vcombine.high %v7157_v33, %v7172_v12  ;;  %v7164_v12 = vrot.slane %v7150_v30, %v19105_v21  ;;  %v7147_v33 = vpop.permute.xlu1 %7146  ;;  %v17188_v30 = vld [vmem:[%s21996_s4 + $0x110] sm:$0xff] }
 0x271   :  { %18269 = vmatprep.mubr.msk.f32.mxu1 %vm18969_vm2, %v22145_v40  ;;  %18272 = vmatprep.subr.mxu0 %v22145_v40 }
 0x272   :  { %18270 = vmatmul.mubr.msk.f32.vlgmr.msra.gmra.mxu1 %vm4805_vm4, %v20002_v18  ;;  %18277 = vmatprep.subr.mxu1 %v22145_v40  ;;  %v7195_v36 = vrot.slane %v7181_v58, %v19108_v22  ;;  %v7196_v39 = vcombine.low %v7164_v12, %v7179_v2  ;;  %v17189_v58 = vld [vmem:[%s21996_s4 + $0x118] sm:$0xff] }
 0x273   :  { %18273 = vmatpush3.msra.mxu0 %v4646_v49  ;;  %18274 = vmatprep.mubr.msk.f32.mxu0 %vm18969_vm2, %v22145_v40  ;;  %v17187_v49 = vld [vmem:[%s21996_s4 + $0x108] sm:$0xff] }
 0x274   :  { %18278 = vmatpush3.msra.mxu1 %v4647_v20  ;;  %18275 = vmatmul.mubr.msk.f32.vlgmr.msra.gmra.mxu0 %vm4805_vm4, %v20013_v26  ;;  %v7212_v20 = vcombine.high %v7188_v11, %v22145_v40 }
 0x275   :  { %18279 = vmatprep.mubr.msk.f32.mxu1 %vm18969_vm2, %v22145_v40  ;;  %18282 = vmatprep.subr.mxu0 %v22145_v40 }
 0x276   :  { %18280 = vmatmul.mubr.msk.f32.vlgmr.msra.gmra.mxu1 %vm4805_vm4, %v20042_v44  ;;  %18287 = vmatprep.subr.mxu1 %v22145_v40  ;;  %v7204_v44 = vrot.slane %v7196_v39, %v19108_v22  ;;  %v7231_v39 = vcombine.high %v7147_v33, %v22145_v40 }
 0x277   :  { %18283 = vmatpush3.msra.mxu0 %v17186_v7  ;;  %18284 = vmatprep.mubr.msk.f32.mxu0 %vm18969_vm2, %v22145_v40  ;;  %v7238_v7 = vrot.slane %v7147_v33, %v19105_v21  ;;  %v17193_v33 = vld [vmem:[%s21996_s4 + $0x138] sm:$0xff] }
 0x278   :  { %18288 = vmatpush3.msra.mxu1 %v17187_v49  ;;  %18285 = vmatmul.mubr.msk.f32.vlgmr.msra.gmra.mxu0 %vm4805_vm4, %v7188_v11  ;;  %v7197_v49 = vcombine.high %v7164_v12, %v7179_v2  ;;  %v7213_v11 = vcombine.high %v7195_v36, %v22145_v40  ;;  %v17191_v2 = vld [vmem:[%s21996_s4 + $0x128] sm:$0xff]  ;;  %v7223_v12 = vrot.slane %v19553_v1, %v19105_v21 }
 0x279   :  { %18289 = vmatprep.mubr.msk.f32.mxu1 %vm18969_vm2, %v22145_v40  ;;  %18292 = vmatprep.subr.mxu0 %v22145_v40 }
 0x27a   :  { %18290 = vmatmul.mubr.msk.f32.vlgmr.msra.gmra.mxu1 %vm4805_vm4, %v7212_v20  ;;  %18297 = vmatprep.subr.mxu1 %v22145_v40  ;;  %v17190_v20 = vld [vmem:[%s21996_s4 + $0x120] sm:$0xff] }
 0x27b   :  { %18293 = vmatpush3.msra.mxu0 %v17188_v30  ;;  %18294 = vmatprep.mubr.msk.f32.mxu0 %vm18969_vm2, %v22145_v40  ;;  %v7211_v30 = vrot.slane %v7197_v49, %v19108_v22  ;;  %v7216_v49 = vcombine.high %v19553_v1, %v22145_v40  ;;  %v17194_v1 = vld [vmem:[%s21996_s4 + $0x140] sm:$0xff] }
 0x27c   :  { %18298 = vmatpush3.msra.mxu1 %v17189_v58  ;;  %18295 = vmatmul.mubr.msk.f32.vlgmr.msra.gmra.mxu0 %vm4805_vm4, %v7195_v36  ;;  %v7246_v36 = vcombine.low %v7223_v12, %v7238_v7  ;;  %v7214_v58 = vcombine.high %v7204_v44, %v22145_v40 }
 0x27d   :  { %18299 = vmatprep.mubr.msk.f32.mxu1 %vm18969_vm2, %v22145_v40  ;;  %18302 = vmatprep.subr.mxu0 %v22145_v40  ;;  %v7215_v26 = vcombine.high %v7211_v30, %v22145_v40 }
 0x27e   :  { %18300 = vmatmul.mubr.msk.f32.vlgmr.msra.gmra.mxu1 %vm4805_vm4, %v7213_v11  ;;  %18307 = vmatprep.subr.mxu1 %v22145_v40  ;;  %v17192_v11 = vld [vmem:[%s21996_s4 + $0x130] sm:$0xff] }
 0x27f   :  { %18303 = vmatpush3.msra.mxu0 %v17190_v20  ;;  %18304 = vmatprep.mubr.msk.f32.mxu0 %vm18969_vm2, %v22145_v40  ;;  %v7245_v20 = vrot.slane %v7231_v39, %v19105_v21 }
 0x280   :  { %18308 = vmatpush3.msra.mxu1 %v17191_v2  ;;  %18305 = vmatmul.mubr.msk.f32.vlgmr.msra.gmra.mxu0 %vm4805_vm4, %v7204_v44  ;;  %v7247_v44 = vcombine.high %v7223_v12, %v7238_v7  ;;  %v7254_v2 = vrot.slane %v7246_v36, %v19108_v22  ;;  %v17195_v7 = vld [vmem:[%s21996_s4 + $0x148] sm:$0xff]  ;;  %v7230_v12 = vrot.slane %v7216_v49, %v19105_v21 }
 0x281   :  { %18309 = vmatprep.mubr.msk.f32.mxu1 %vm18969_vm2, %v22145_v40  ;;  %18312 = vmatprep.subr.mxu0 %v22145_v40  ;;  %v8500_v21 = vld [vmem:[%s21997_s5 + $0x8] sm:$0xff] }
 0x282   :  { %18310 = vmatmul.mubr.msk.f32.vlgmr.msra.gmra.mxu1 %vm4805_vm4, %v7214_v58  ;;  %18317 = vmatprep.subr.mxu1 %v22145_v40  ;;  %v7261_v39 = vrot.slane %v7247_v44, %v19108_v22  ;;  %v7262_v36 = vcombine.low %v7230_v12, %v7245_v20  ;;  %v17196_v58 = vld [vmem:[%s21996_s4 + $0x150] sm:$0xff]  ;;  %v17198_v44 = vld [vmem:[%s21996_s4 + $0x160] sm:$0xff] }
 0x283   :  { %18313 = vmatpush3.msra.mxu0 %v17192_v11  ;;  %18314 = vmatprep.mubr.msk.f32.mxu0 %vm18969_vm2, %v22145_v40  ;;  %v7263_v11 = vcombine.high %v7230_v12, %v7245_v20  ;;  %v17199_v20 = vld [vmem:[%s21996_s4 + $0x168] sm:$0xff]  ;;  %v17201_v12 = vld [vmem:[%s21996_s4 + $0x178] sm:$0xff] }
 0x284   :  { %18318 = vmatpush3.msra.mxu1 %v17193_v33  ;;  %18315 = vmatmul.mubr.msk.f32.vlgmr.msra.gmra.mxu0 %vm4805_vm4, %v7211_v30  ;;  %v7278_v30 = vcombine.high %v7254_v2, %v22145_v40  ;;  %v7270_v33 = vrot.slane %v7262_v36, %v19108_v22  ;;  %v7279_v49 = vcombine.high %v7261_v39, %v22145_v40  ;;  %v18965_v36 = vld [vmem:[%s21993_s0] sm:$0xff] }
 0x285   :  { %18319 = vmatprep.mubr.msk.f32.mxu1 %vm18969_vm2, %v22145_v40  ;;  %18322 = vmatprep.subr.mxu0 %v22145_v40 }
 0x286   :  { %18320 = vmatmul.mubr.msk.f32.vlgmr.msra.gmra.mxu1 %vm4805_vm4, %v7215_v26  ;;  %18327 = vmatprep.subr.mxu1 %v22145_v40  ;;  %v17197_v26 = vld [vmem:[%s21996_s4 + $0x158] sm:$0xff] }
 0x287   :  { %18323 = vmatpush3.msra.mxu0 %v17194_v1  ;;  %18324 = vmatprep.mubr.msk.f32.mxu0 %vm18969_vm2, %v22145_v40  ;;  %v7280_v1 = vcombine.high %v7270_v33, %v22145_v40 }
 0x288   :  { %18328 = vmatpush3.msra.mxu1 %v17195_v7  ;;  %18325 = vmatmul.mubr.msk.f32.vlgmr.msra.gmra.mxu0 %vm4805_vm4, %v7254_v2  ;;  %v7277_v2 = vrot.slane %v7263_v11, %v19108_v22  ;;  %v17200_v7 = vld [vmem:[%s21996_s4 + $0x170] sm:$0xff] }
 0x289   :  { %18329 = vmatprep.mubr.msk.f32.mxu1 %vm18969_vm2, %v22145_v40  ;;  %18332 = vmatprep.subr.mxu0 %v22145_v40 }
 0x28a   :  { %18330 = vmatmul.mubr.msk.f32.vlgmr.msra.gmra.mxu1 %vm4805_vm4, %v7278_v30  ;;  %18337 = vmatprep.subr.mxu1 %v22145_v40 }
 0x28b   :  { %18333 = vmatpush3.msra.mxu0 %v17196_v58  ;;  %18334 = vmatprep.mubr.msk.f32.mxu0 %vm18969_vm2, %v22145_v40 }
 0x28c   :  { %18338 = vmatpush3.msra.mxu1 %v17197_v26  ;;  %18335 = vmatmul.mubr.msk.f32.vlgmr.msra.gmra.mxu0 %vm4805_vm4, %v7261_v39  ;;  %v7281_v39 = vcombine.high %v7277_v2, %v22145_v40 }
 0x28d   :  { %18339 = vmatprep.mubr.msk.f32.mxu1 %vm18969_vm2, %v22145_v40  ;;  %18342 = vmatprep.subr.mxu0 %v22145_v40 }
 0x28e   :  { %18340 = vmatmul.mubr.msk.f32.vlgmr.msra.gmra.mxu1 %vm4805_vm4, %v7279_v49  ;;  %18347 = vmatprep.subr.mxu1 %v22145_v40 }
 0x28f   :  { %18343 = vmatpush3.msra.mxu0 %v17198_v44  ;;  %18344 = vmatprep.mubr.msk.f32.mxu0 %vm18969_vm2, %v22145_v40 }
 0x290   :  { %18348 = vmatpush3.msra.mxu1 %v17199_v20  ;;  %18345 = vmatmul.mubr.msk.f32.vlgmr.msra.gmra.mxu0 %vm4805_vm4, %v7270_v33 }
 0x291   :  { %18349 = vmatprep.mubr.msk.f32.mxu1 %vm18969_vm2, %v22145_v40  ;;  %18352 = vmatprep.subr.mxu0 %v22145_v40 }
 0x292   :  { %18350 = vmatmul.mubr.msk.f32.vlgmr.msra.gmra.mxu1 %vm4805_vm4, %v7280_v1  ;;  %18357 = vmatprep.subr.mxu1 %v22145_v40 }
 0x293   :  { %18353 = vmatpush3.msra.mxu0 %v17200_v7  ;;  %18354 = vmatprep.mubr.msk.f32.mxu0 %vm18969_vm2, %v22145_v40 }
 0x294   :  { %18358 = vmatpush3.msra.mxu1 %v17201_v12  ;;  %18355 = vmatmul.mubr.msk.f32.vlgmr.msra.gmra.mxu0 %vm4805_vm4, %v7277_v2 }
 0x295   :  { %18359 = vmatprep.mubr.msk.f32.mxu1 %vm18969_vm2, %v22145_v40  ;;  %18366 = vmatprep.mubr.msk.f32.mxu0 %vm38_vm0, %v18965_v36 }
 0x296   :  { %18360 = vmatmul.mubr.msk.f32.vlgmr.msra.gmra.mxu1 %vm4805_vm4, %v7281_v39 }
 0x297   :  { %18373 = vmatprep.mubr.msk.f32.mxu1 %vm38_vm0, %v18965_v36 }
 0x2cc   :  { %v3330_v30 = vpop.f32.mrf.mxu0 }
 0x2cd   :  { %v20418_v58 = vadd.f32 %v3330_v30, %v19729_v24 }
 0x2ce   :  { %v18046_v26 = vpop.f32.mrf.mxu0  ;;  %v3406_v11 = vpop.f32.mrf.mxu1 }
 0x2cf   :  { %v20421_v33 = vadd.f32 %v3406_v11, %v19755_v59 }
 0x2d0   :  { %v18051_v49 = vpop.f32.mrf.mxu1  ;;  %v3482_v44 = vpop.f32.mrf.mxu0 }
 0x2d1   :  { %v20424_v20 = vadd.f32 %v3482_v44, %v19765_v38 }
 0x2d2   :  { %v18056_v2 = vpop.f32.mrf.mxu0  ;;  %v3558_v1 = vpop.f32.mrf.mxu1 }
 0x2d3   :  { %v20427_v7 = vadd.f32 %v3558_v1, %v19789_v17 }
 0x2d4   :  { %v18061_v12 = vpop.f32.mrf.mxu1 }
 0x2d5   :  { %v3634_v39 = vpop.f32.mrf.mxu0 }
 0x2d6   :  { %v20430_v24 = vadd.f32 %v3634_v39, %v19803_v47 }
 0x2d7   :  { %v18066_v36 = vpop.f32.mrf.mxu0 }
 0x2d9   :  { %v3786_v11 = vpop.f32.mrf.mxu0 }
 0x2da   :  { %v20436_v38 = vadd.f32 %v3786_v11, %v19845_v15 }
 0x2db   :  { %v3710_v30 = vpop.f32.mrf.mxu1  ;;  %v18076_v49 = vpop.f32.mrf.mxu0 }
 0x2dc   :  { %v20433_v59 = vadd.f32 %v3710_v30, %v19830_v31 }
 0x2dd   :  { %v18071_v26 = vpop.f32.mrf.mxu1 }
 0x2df   :  { %v3862_v44 = vpop.f32.mrf.mxu1  ;;  %v3938_v1 = vpop.f32.mrf.mxu0 }
 0x2e0   :  { %v20439_v17 = vadd.f32 %v3862_v44, %v19865_v4  ;;  %v20442_v47 = vadd.f32 %v3938_v1, %v19879_v43 }
 0x2e1   :  { %v18081_v2 = vpop.f32.mrf.mxu1  ;;  %v18086_v39 = vpop.f32.mrf.mxu0 }
 0x2e3   :  { %v4014_v12 = vpop.f32.mrf.mxu1  ;;  %v4090_v30 = vpop.f32.mrf.mxu0 }
 0x2e4   :  { %v20445_v31 = vadd.f32 %v4014_v12, %v19896_v42  ;;  %v20448_v15 = vadd.f32 %v4090_v30, %v19910_v5 }
 0x2e5   :  { %v18091_v36 = vpop.f32.mrf.mxu1  ;;  %v18096_v11 = vpop.f32.mrf.mxu0 }
 0x2e7   :  { %v4166_v26 = vpop.f32.mrf.mxu1 }
 0x2e8   :  { %v20451_v4 = vadd.f32 %v4166_v26, %v19934_v25  ;;  %v4242_v44 = vpop.f32.mrf.mxu0 }
 0x2e9   :  { %v18101_v49 = vpop.f32.mrf.mxu1  ;;  %v20454_v43 = vadd.f32 %v4242_v44, %v19944_v61 }
 0x2ea   :  { %v18106_v1 = vpop.f32.mrf.mxu0 }
 0x2eb   :  { %22155 = vst [vmem:[#allocation68_spill] sm:$0xff] %v20454_v43  ;;  %v4318_v2 = vpop.f32.mrf.mxu1 }
 0x2ec   :  { %v20457_v42 = vadd.f32 %v4318_v2, %v19973_v28  ;;  %v4394_v39 = vpop.f32.mrf.mxu0 }
 0x2ed   :  { %v18111_v12 = vpop.f32.mrf.mxu1  ;;  %v20460_v5 = vadd.f32 %v4394_v39, %v19983_v52 }
 0x2ee   :  { %22156 = vst [vmem:[#allocation69_spill] sm:$0xff] %v20457_v42  ;;  %v18116_v30 = vpop.f32.mrf.mxu0 }
 0x2ef   :  { %22157 = vst [vmem:[#allocation70_spill] sm:$0xff] %v20460_v5  ;;  %v4470_v36 = vpop.f32.mrf.mxu1 }
 0x2f0   :  { %v20463_v25 = vadd.f32 %v4470_v36, %v20016_v14  ;;  %v20465_v11 = vpop.f32.mrf.mxu0 }
 0x2f1   :  { %v18121_v26 = vpop.f32.mrf.mxu1 }
 0x2f2   :  { %22158 = vst [vmem:[#allocation71_spill] sm:$0xff] %v20463_v25  ;;  %v18126_v49 = vpop.f32.mrf.mxu0 }
 0x2f3   :  { %v20467_v61 = vpop.f32.mrf.mxu1 }
 0x2f4   :  { %v20469_v1 = vpop.f32.mrf.mxu0 }
 0x2f5   :  { %v18131_v44 = vpop.f32.mrf.mxu1 }
 0x2f6   :  { %v18136_v2 = vpop.f32.mrf.mxu0 }
 0x2f7   :  { %v20471_v28 = vpop.f32.mrf.mxu1 }
 0x2f9   :  { %v18141_v12 = vpop.f32.mrf.mxu1  ;;  %v20473_v52 = vpop.f32.mrf.mxu0 }
 0x2fb   :  { %v20475_v39 = vpop.f32.mrf.mxu1  ;;  %v18146_v30 = vpop.f32.mrf.mxu0 }
 0x2fd   :  { %v18151_v14 = vpop.f32.mrf.mxu1 }
 0x2fe   :  { %v20477_v36 = vpop.f32.mrf.mxu0 }
 0x300   :  { %v20479_v26 = vpop.f32.mrf.mxu1  ;;  %v18156_v18 = vpop.f32.mrf.mxu0 }
 0x302   :  { %v18161_v0 = vpop.f32.mrf.mxu1 }
 0x303   :  { %v20481_v49 = vpop.f32.mrf.mxu0 }
 0x305   :  { %v20483_v44 = vpop.f32.mrf.mxu1  ;;  %v18166_v50 = vpop.f32.mrf.mxu0 }
 0x307   :  { %v18171_v46 = vpop.f32.mrf.mxu1 }
 0x308   :  { %v20485_v2 = vpop.f32.mrf.mxu0 }
 0x30a   :  { %v20487_v12 = vpop.f32.mrf.mxu1  ;;  %v18176_v9 = vpop.f32.mrf.mxu0 }
 0x30c   :  { %v18181_v6 = vpop.f32.mrf.mxu1 }
 0x30d   :  { %v20489_v30 = vpop.f32.mrf.mxu0 }
 0x30f   :  { %v20491_v14 = vpop.f32.mrf.mxu1  ;;  %v18186_v63 = vpop.f32.mrf.mxu0 }
 0x311   :  { %v18191_v54 = vpop.f32.mrf.mxu1 }
 0x312   :  { %v20493_v18 = vpop.f32.mrf.mxu0  ;;  %v18974_v54 = vmov 1966171168  }
 0x313   :  { %v8505_v16 = vunpack.c.l.s4 %v18974_v54 }
 0x314   :  { %v20495_v0 = vpop.f32.mrf.mxu1  ;;  %v18196_v10 = vpop.f32.mrf.mxu0 }
 0x315   :  { %v8506_v45 = vunpack.c.0.s8 %v8505_v16 }
 0x316   :  { %v18201_v53 = vpop.f32.mrf.mxu1 }
 0x317   :  { %v6043_v50 = vpop.f32.mrf.mxu0 }
 0x318   :  { %v6044_v40 = vadd.f32 %v6043_v50, %v20465_v11 }
 0x319   :  { %v6116_v46 = vpop.f32.mrf.mxu1  ;;  %v18206_v57 = vpop.f32.mrf.mxu0 }
 0x31a   :  { %v6117_v22 = vadd.f32 %v6116_v46, %v20467_v61 }
 0x31b   :  { %v18211_v60 = vpop.f32.mrf.mxu1 }
 0x31c   :  { %v6189_v3 = vpop.f32.mrf.mxu0 }
 0x31d   :  { %v6190_v50 = vadd.f32 %v6189_v3, %v20469_v1 }
 0x31e   :  { %v6262_v51 = vpop.f32.mrf.mxu1  ;;  %v18216_v9 = vpop.f32.mrf.mxu0 }
 0x320   :  { %v18221_v6 = vpop.f32.mrf.mxu1  ;;  %v20497_v37 = vpop.f32.mrf.mxu0 }
 0x321   :  { %v20510_v6 = vsub.s32 %v8506_v45, %v19102_v19 }
 0x322   :  { %v20499_v27 = vpop.f32.mrf.mxu1  ;;  %v18226_v63 = vpop.f32.mrf.mxu0 }
 0x324   :  { %v18231_v8 = vpop.f32.mrf.mxu1  ;;  %v20501_v55 = vpop.f32.mrf.mxu0 }
 0x325   :  { %v8499_v8 = vld [vmem:[%s21997_s5] sm:$0xff] }
 0x326   :  { %v20503_v10 = vpop.f32.mrf.mxu1  ;;  %v18236_v53 = vpop.f32.mrf.mxu0  ;;  %v8510_v16 = vrot.slane %v8499_v8, %v20510_v6 }
 0x328   :  { %v18241_v57 = vpop.f32.mrf.mxu1  ;;  %v20505_v60 = vpop.f32.mrf.mxu0  ;;  %v8518_v62 = vcombine.high %v8510_v16, %v8510_v16  ;;  %v8526_v34 = vrot.slane %v8510_v16, %v20510_v6 }
 0x329   :  { %v8503_v57 = vcombine.high %v8499_v8, %v8499_v8 }
 0x32a   :  { %v20507_v35 = vpop.f32.mrf.mxu1  ;;  %v18246_v9 = vpop.f32.mrf.mxu0 }
 0x32c   :  { %v18251_v29 = vpop.f32.mrf.mxu1  ;;  %v20515_v63 = vpop.f32.mrf.mxu0 }
 0x32d   :  { %v8517_v29 = vrot.slane %v8503_v57, %v20510_v6 }
 0x32e   :  { %v20517_v54 = vpop.f32.mrf.mxu1  ;;  %v18256_v53 = vpop.f32.mrf.mxu0 }
 0x32f   :  { %v20531_v53 = vsub.s32 0, %v19102_v19  ;;  %v8519_v32 = vcombine.high %v8517_v29, %v8517_v29 }
 0x330   :  { %v18261_v23 = vpop.f32.mrf.mxu1  ;;  %v20520_v13 = vpop.f32.mrf.mxu0 }
 0x331   :  { %v8540_v23 = vrot.slane %v8518_v62, %v20510_v6  ;;  %v8604_v16 = vrot.slane %v8526_v34, %v20531_v53  ;;  %v20545_v61 = vrot.slane %v8519_v32, %v20510_v6 }
 0x332   :  { %v20522_v9 = vpop.f32.mrf.mxu1  ;;  %v18266_v45 = vpop.f32.mrf.mxu0 }
 0x333   :  { %v8550_v5 = vcombine.high %v8540_v23, %v8540_v23  ;;  %v8608_v11 = vrot.slane %v8540_v23, %v20531_v53 }
 0x334   :  { %v18271_v56 = vpop.f32.mrf.mxu1  ;;  %v20525_v48 = vpop.f32.mrf.mxu0 }
 0x335   :  { %v8548_v56 = vcombine.high %v8526_v34, %v8526_v34  ;;  %v6263_v34 = vadd.f32 %v6262_v51, %v20471_v28  ;;  %v8616_v32 = vrot.slane %v8550_v5, %v20531_v53  ;;  %v8624_v51 = vrot.slane %v20545_v61, %v20531_v53 }
 0x336   :  { %v20527_v41 = vpop.f32.mrf.mxu1  ;;  %v18276_v8 = vpop.f32.mrf.mxu0 }
 0x337   :  { %v20541_v8 = vrot.slane %v8517_v29, %v20510_v6 }
 0x338   :  { %v18281_v45 = vpop.f32.mrf.mxu1  ;;  %v7368_v57 = vpop.f32.mrf.mxu0 }
 0x339   :  { %v8467_v25 = vadd.f32 %v7368_v57, %v6044_v40  ;;  %v8559_v40 = vrot.slane %v8500_v21, %v20510_v6  ;;  %v8620_v3 = vrot.slane %v20541_v8, %v20531_v53 }
 0x33a   :  { %v7441_v19 = vpop.f32.mrf.mxu1  ;;  %v18286_v62 = vpop.f32.mrf.mxu0 }
 0x33b   :  { %v8468_v42 = vadd.f32 %v7441_v19, %v6117_v22  ;;  %v8483_v46 = vadd.f32 %v8467_v25, %v20418_v58  ;;  %v8612_v62 = vrot.slane %v8548_v56, %v20531_v53  ;;  %v8552_v22 = vcombine.high %v8500_v21, %v8500_v21 }
 0x33c   :  { %v18291_v45 = vpop.f32.mrf.mxu1  ;;  %v7514_v29 = vpop.f32.mrf.mxu0  ;;  %v6336_v21 = vadd.f32 %v20497_v37, %v20473_v52  ;;  %v8567_v5 = vcombine.high %v8559_v40, %v8559_v40  ;;  %v8551_v37 = vcombine.high %v20545_v61, %v20545_v61  ;;  %v6555_v61 = vadd.f32 %v20503_v10, %v20479_v26 }
 0x33d   :  { %v8484_v57 = vadd.f32 %v8468_v42, %v20421_v33  ;;  %v8681_v19 = vadd.f32 %v8604_v16, %v8483_v46  ;;  %v8469_v23 = vadd.f32 %v7514_v29, %v6190_v50  ;;  %v8549_v33 = vcombine.high %v20541_v8, %v20541_v8  ;;  %v20569_v52 = vpop.permute.xlu0 %8809 }
 0x33e   :  { %v7587_v43 = vpop.f32.mrf.mxu1  ;;  %v18296_v25 = vpop.f32.mrf.mxu0  ;;  %v6409_v16 = vadd.f32 %v20499_v27, %v20475_v39  ;;  %v8566_v46 = vrot.slane %v8552_v22, %v20510_v6  ;;  %v8575_v27 = vrot.slane %v8559_v40, %v20510_v6 }
 0x33f   :  { %v8682_v58 = vadd.f32 %v8608_v11, %v8484_v57  ;;  %v8470_v1 = vadd.f32 %v7587_v43, %v6263_v34  ;;  %v17218_v42 = vmul.f32 -1.442695, %v8681_v19  ;;  %v8485_v28 = vadd.f32 %v8469_v23, %v20424_v20  ;;  %v20572_v39 = vpop.permute.xlu1 %8811 }
 0x340   :  { %v18301_v56 = vpop.f32.mrf.mxu1  ;;  %v7660_v50 = vpop.f32.mrf.mxu0  ;;  %v20587_v10 = vrot.slane %v8566_v46, %v20510_v6 }
 0x341   :  { %v17219_v11 = vmul.f32 -1.442695, %v8682_v58  ;;  %v8486_v43 = vadd.f32 %v8470_v1, %v20427_v7  ;;  %18868 = vpow2.f32 %v17218_v42  ;;  %v8683_v45 = vadd.f32 %v8612_v62, %v8485_v28 }
 0x342   :  { %v8471_v34 = vadd.f32 %v7660_v50, %v6336_v21  ;;  %v7733_v57 = vpop.f32.mrf.mxu1  ;;  %v18306_v29 = vpop.f32.mrf.mxu0  ;;  %v6482_v7 = vadd.f32 %v20501_v55, %v20477_v36  ;;  %v8589_v58 = vrot.slane %v8567_v5, %v20510_v6  ;;  %v8568_v21 = vcombine.high %v8566_v46, %v8566_v46 }
 0x343   :  { %18870 = vpow2.f32 %v17219_v11  ;;  %v8684_v20 = vadd.f32 %v8616_v32, %v8486_v43  ;;  %v8472_v19 = vadd.f32 %v7733_v57, %v6409_v16  ;;  %v17220_v22 = vmul.f32 -1.442695, %v8683_v45 }
 0x344   :  { %v8487_v62 = vadd.f32 %v8471_v34, %v20430_v24  ;;  %v18311_v23 = vpop.f32.mrf.mxu1  ;;  %v7806_v1 = vpop.f32.mrf.mxu0  ;;  %v8597_v56 = vcombine.high %v8575_v27, %v8575_v27  ;;  %v8599_v16 = vcombine.high %v8589_v58, %v8589_v58  ;;  %v6628_v5 = vadd.f32 %v20505_v60, %v20481_v49 }
 0x345   :  { %v17221_v25 = vmul.f32 -1.442695, %v8684_v20  ;;  %v8488_v32 = vadd.f32 %v8472_v19, %v20433_v59  ;;  %18872 = vpow2.f32 %v17220_v22  ;;  %v8473_v42 = vadd.f32 %v7806_v1, %v6482_v7  ;;  %v20599_v60 = vpop.permute.xlu1 %8815 }
 0x346   :  { %v8685_v40 = vadd.f32 %v8620_v3, %v8487_v62  ;;  %v7879_v28 = vpop.f32.mrf.mxu1  ;;  %v18316_v36 = vpop.f32.mrf.mxu0  ;;  %v6701_v43 = vadd.f32 %v20507_v35, %v20483_v44  ;;  %v20597_v49 = vrot.slane %v8568_v21, %v20510_v6  ;;  %v8636_v46 = vrot.slane %v8575_v27, %v20531_v53 }
 0x347   :  { %18874 = vpow2.f32 %v17221_v25  ;;  %v8686_v55 = vadd.f32 %v8624_v51, %v8488_v32  ;;  %v8474_v24 = vadd.f32 %v7879_v28, %v6555_v61  ;;  %v20584_v26 = vadd.f32 %v8473_v42, %v20436_v38  ;;  %v20589_v3 = vpop.permute.xlu0 %8813 }
 0x348   :  { %v17222_v11 = vmul.f32 -1.442695, %v8685_v40  ;;  %v18321_v59 = vpop.f32.mrf.mxu1  ;;  %v7952_v45 = vpop.f32.mrf.mxu0  ;;  %v8640_v57 = vrot.slane %v8589_v58, %v20531_v53  ;;  %v8600_v44 = vcombine.high %v20597_v49, %v20597_v49  ;;  %v6774_v29 = vadd.f32 %v20515_v63, %v20485_v2 }
 0x349   :  { %v17223_v51 = vmul.f32 -1.442695, %v8686_v55  ;;  %v20594_v50 = vadd.f32 %v8474_v24, %v20439_v17  ;;  %v8475_v38 = vadd.f32 %v7952_v45, %v6628_v5  ;;  %v8598_v17 = vcombine.high %v20587_v10, %v20587_v10  ;;  %v20632_v42 = vpop.permute.xlu1 %8819 }
 0x34a   :  { %18876 = vpow2.f32 %v17222_v11  ;;  %v8025_v34 = vpop.f32.mrf.mxu1  ;;  %v18326_v20 = vpop.f32.mrf.mxu0  ;;  %v8628_v19 = vrot.slane %v8549_v33, %v20531_v53  ;;  %v20614_v27 = vrot.slane %v8551_v37, %v20531_v53  ;;  %v6847_v62 = vadd.f32 %v20517_v54, %v20487_v12 }
 0x34b   :  { %18878 = vpow2.f32 %v17223_v51  ;;  %v8476_v35 = vadd.f32 %v8025_v34, %v6701_v43  ;;  %v8491_v7 = vadd.f32 %v8475_v38, %v20442_v47  ;;  %v8644_v61 = vrot.slane %v8597_v56, %v20531_v53  ;;  %v20626_v32 = vpop.permute.xlu0 %8817  ;;  %v22159_v34 = vld [vmem:[#allocation68_spill] sm:$0xff] }
 0x34c   :  { %v18331_v22 = vpop.f32.mrf.mxu1  ;;  %v8098_v58 = vpop.f32.mrf.mxu0  ;;  %v8648_v2 = vrot.slane %v8599_v16, %v20531_v53  ;;  %v8652_v33 = vrot.slane %v20587_v10, %v20531_v53  ;;  %v8656_v47 = vrot.slane %v20597_v49, %v20531_v53  ;;  %v8660_v1 = vrot.slane %v8598_v17, %v20531_v53  ;;  %v22160_v17 = vld [vmem:[#allocation69_spill] sm:$0xff] }
 0x34d   :  { %v8492_v23 = vadd.f32 %v8476_v35, %v20445_v31  ;;  %v8689_v63 = vadd.f32 %v8636_v46, %v8491_v7  ;;  %v8477_v25 = vadd.f32 %v8098_v58, %v6774_v29  ;;  %v20630_v21 = vrot.slane %v8600_v44, %v20531_v53 }
 0x34e   :  { %v8171_v8 = vpop.f32.mrf.mxu1  ;;  %v18869_v37 = vpop.eup %18868  ;;  %v6920_v28 = vadd.f32 %v20520_v13, %v20489_v30  ;;  %v6993_v16 = vadd.f32 %v20522_v9, %v20491_v14  ;;  %v7066_v43 = vadd.f32 %v20525_v48, %v20493_v18  ;;  %v8688_v58 = vadd.f32 %v20614_v27, %v20594_v50 }
 0x34f   :  { %v8690_v12 = vadd.f32 %v8640_v57, %v8492_v23  ;;  %v18336_v54 = vpop.f32.mrf.mxu0  ;;  %v8478_v31 = vadd.f32 %v8171_v8, %v6847_v62  ;;  %v8745_v56 = vadd.f32 1.0, %v18869_v37  ;;  %v17226_v55 = vmul.f32 -1.442695, %v8689_v63  ;;  %v20645_v48 = vpop.permute.xlu0 %8821 }
 0x350   :  { %v18871_v40 = vpop.eup %18870  ;;  %v8493_v36 = vadd.f32 %v8477_v25, %v20448_v15  ;;  %v18341_v24 = vpop.f32.mrf.mxu1  ;;  %v7139_v15 = vadd.f32 %v20527_v41, %v20495_v0  ;;  %v8687_v0 = vadd.f32 %v8628_v19, %v20584_v26  ;;  %v22162_v19 = vld [vmem:[#allocation71_spill] sm:$0xff]  ;;  %v17225_v50 = vmul.f32 -1.442695, %v8688_v58 }
 0x351   :  { %v8746_v5 = vadd.f32 1.0, %v18871_v40  ;;  %v17227_v11 = vmul.f32 -1.442695, %v8690_v12  ;;  %v8494_v59 = vadd.f32 %v8478_v31, %v20451_v4  ;;  %v8244_v10 = vpop.f32.mrf.mxu0  ;;  %18880 = vrcp.f32 %v8745_v56  ;;  %v20648_v41 = vpop.permute.xlu1 %8823  ;;  %v22161_v12 = vld [vmem:[#allocation70_spill] sm:$0xff] }
 0x352   :  { %v8691_v51 = vadd.f32 %v8644_v61, %v8493_v36  ;;  %v8479_v45 = vadd.f32 %v8244_v10, %v6920_v28  ;;  %v8317_v13 = vpop.f32.mrf.mxu1  ;;  %v18873_v30 = vpop.eup %18872  ;;  %v17224_v28 = vmul.f32 -1.442695, %v8687_v0 }
 0x353   :  { %18882 = vrcp.f32 %v8746_v5  ;;  %v8692_v49 = vadd.f32 %v8648_v2, %v8494_v59  ;;  %v18346_v38 = vpop.f32.mrf.mxu0  ;;  %v8480_v14 = vadd.f32 %v8317_v13, %v6993_v16  ;;  %v8747_v46 = vadd.f32 1.0, %v18873_v30 }
 0x354   :  { %v18875_v9 = vpop.eup %18874  ;;  %18884 = vpow2.f32 %v17226_v55  ;;  %v17228_v4 = vmul.f32 -1.442695, %v8691_v51  ;;  %v8495_v57 = vadd.f32 %v8479_v45, %v22159_v34  ;;  %v18351_v20 = vpop.f32.mrf.mxu1 }
 0x355   :  { %v8748_v18 = vadd.f32 1.0, %v18875_v9  ;;  %18886 = vpow2.f32 %v17227_v11  ;;  %v17229_v35 = vmul.f32 -1.442695, %v8692_v49  ;;  %v8496_v44 = vadd.f32 %v8480_v14, %v22160_v17  ;;  %v8390_v29 = vpop.f32.mrf.mxu0  ;;  %v8794_v55 = vpop.permute.xlu0 %8793 }
 0x356   :  { %18888 = vrcp.f32 %v8747_v46  ;;  %v8693_v7 = vadd.f32 %v8652_v33, %v8495_v57  ;;  %v8481_v22 = vadd.f32 %v8390_v29, %v7066_v43  ;;  %v8463_v62 = vpop.f32.mrf.mxu1 }
 0x357   :  { %v18877_v23 = vpop.eup %18876  ;;  %18890 = vrcp.f32 %v8748_v18  ;;  %v8694_v61 = vadd.f32 %v8656_v47, %v8496_v44  ;;  %v18356_v2 = vpop.f32.mrf.mxu0  ;;  %v8482_v63 = vadd.f32 %v8463_v62, %v7139_v15 }
 0x358   :  { %v18879_v25 = vpop.eup %18878  ;;  %v8749_v8 = vadd.f32 1.0, %v18877_v23  ;;  %18892 = vpow2.f32 %v17228_v4  ;;  %v17230_v37 = vmul.f32 -1.442695, %v8693_v7  ;;  %v8497_v54 = vadd.f32 %v8481_v22, %v22161_v12  ;;  %v18361_v31 = vpop.f32.mrf.mxu1 }
 0x359   :  { %v8750_v40 = vadd.f32 1.0, %v18879_v25  ;;  %18894 = vpow2.f32 %v17229_v35  ;;  %v17231_v26 = vmul.f32 -1.442695, %v8694_v61  ;;  %v8498_v33 = vadd.f32 %v8482_v63, %v22162_v19  ;;  %v8796_v47 = vpop.permute.xlu1 %8795  ;;  %v8798_v59 = vpop.permute.xlu0 %8797 }
 0x35a   :  { %18896 = vrcp.f32 %v8749_v8  ;;  %v8695_v56 = vadd.f32 %v8660_v1, %v8497_v54 }
 0x35b   :  { %18898 = vrcp.f32 %v8750_v40  ;;  %v8696_v27 = vadd.f32 %v20630_v21, %v8498_v33 }
 0x35c   :  { %18900 = vpow2.f32 %v17230_v37  ;;  %v17232_v36 = vmul.f32 -1.442695, %v8695_v56 }
 0x35d   :  { %18902 = vpow2.f32 %v17231_v26  ;;  %v17233_v24 = vmul.f32 -1.442695, %v8696_v27  ;;  %v8800_v43 = vpop.permute.xlu1 %8799  ;;  %v8802_v4 = vpop.permute.xlu0 %8801 }
 0x35e   :  { %18904 = vpow2.f32 %v17224_v28  ;;  %v20656_v16 = vpop.eup %18880 }
 0x35f   :  { %18906 = vpow2.f32 %v17225_v50  ;;  %v8841_v11 = vmul.f32 %v20656_v16, %v8794_v55 }
 0x360   :  { %v20658_v5 = vpop.eup %18882  ;;  %18908 = vpow2.f32 %v17232_v36 }
 0x361   :  { %v18885_v1 = vpop.eup %18884  ;;  %18910 = vpow2.f32 %v17233_v24  ;;  %v8842_v10 = vmul.f32 %v20658_v5, %v8796_v47  ;;  %8873 = vrot.lane.b32.xlu0 %v8841_v11, %s18972_s30  ;;  %v8804_v20 = vpop.permute.xlu1 %8803 }
 0x362   :  { %v18887_v21 = vpop.eup %18886  ;;  %v8753_v51 = vadd.f32 1.0, %v18885_v1 }
 0x363   :  { %v20663_v45 = vpop.eup %18888  ;;  %v8754_v13 = vadd.f32 1.0, %v18887_v21  ;;  %8875 = vrot.lane.b32.xlu1 %v8842_v10, %s18972_s30 }
 0x364   :  { %v20666_v30 = vpop.eup %18890  ;;  %18912 = vrcp.f32 %v8753_v51  ;;  %v8843_v15 = vmul.f32 %v20663_v45, %v8798_v59 }
 0x365   :  { %v18893_v49 = vpop.eup %18892  ;;  %18914 = vrcp.f32 %v8754_v13  ;;  %v8844_v38 = vmul.f32 %v20666_v30, %v8800_v43  ;;  %v8808_v50 = vpop.permute.xlu1 %8807 }
 0x366   :  { %v18895_v14 = vpop.eup %18894  ;;  %v8755_v9 = vadd.f32 1.0, %v18893_v49  ;;  %8877 = vrot.lane.b32.xlu0 %v8843_v15, %s18972_s30 }
 0x367   :  { %v20671_v46 = vpop.eup %18896  ;;  %v8756_v34 = vadd.f32 1.0, %v18895_v14  ;;  %8879 = vrot.lane.b32.xlu1 %v8844_v38, %s18972_s30  ;;  %v22170_v14 = vld [vmem:[#allocation2_spill] sm:$0xff] }
 0x368   :  { %v20674_v57 = vpop.eup %18898  ;;  %18916 = vrcp.f32 %v8755_v9  ;;  %v8845_v18 = vmul.f32 %v20671_v46, %v8802_v4 }
 0x369   :  { %v18901_v35 = vpop.eup %18900  ;;  %18918 = vrcp.f32 %v8756_v34  ;;  %v8846_v17 = vmul.f32 %v20674_v57, %v8804_v20 }
 0x36a   :  { %v18903_v44 = vpop.eup %18902  ;;  %v8757_v29 = vadd.f32 1.0, %v18901_v35  ;;  %8881 = vrot.lane.b32.xlu0 %v8845_v18, %s18972_s30 }
 0x36b   :  { %v18905_v0 = vpop.eup %18904  ;;  %v8758_v7 = vadd.f32 1.0, %v18903_v44  ;;  %8883 = vrot.lane.b32.xlu1 %v8846_v17, %s18972_s30 }
 0x36c   :  { %v18907_v22 = vpop.eup %18906  ;;  %18920 = vrcp.f32 %v8757_v29  ;;  %v8751_v58 = vadd.f32 1.0, %v18905_v0 }
 0x36d   :  { %v18909_v62 = vpop.eup %18908  ;;  %18922 = vrcp.f32 %v8758_v7  ;;  %v8752_v2 = vadd.f32 1.0, %v18907_v22 }
 0x36e   :  { %v18911_v23 = vpop.eup %18910  ;;  %v8759_v61 = vadd.f32 1.0, %v18909_v62 }
 0x36f   :  { %v8760_v63 = vadd.f32 1.0, %v18911_v23 }
 0x370   :  { %18924 = vrcp.f32 %v8759_v61 }
 0x371   :  { %v20680_v25 = vpop.eup %18912  ;;  %18926 = vrcp.f32 %v8760_v63 }
 0x372   :  { %v20682_v8 = vpop.eup %18914  ;;  %18928 = vrcp.f32 %v8751_v58  ;;  %v8849_v37 = vmul.f32 %v20680_v25, %v20569_v52 }
 0x373   :  { %22163 = vst [vmem:[#allocation68_spill] sm:$0xff] %v20682_v8  ;;  %18930 = vrcp.f32 %v8752_v2  ;;  %v8850_v12 = vmul.f32 %v20682_v8, %v20572_v39  ;;  %v22222_v8 = vld [vmem:[#allocation61_spill] sm:$0xff] }
 0x374   :  { %8889 = vrot.lane.b32.xlu0 %v8849_v37, %s18972_s30 }
 0x375   :  { %v20689_v54 = vpop.eup %18916  ;;  %8891 = vrot.lane.b32.xlu1 %v8850_v12, %s18972_s30 }
 0x376   :  { %22164 = vst [vmem:[#allocation69_spill] sm:$0xff] %v20689_v54  ;;  %v20692_v31 = vpop.eup %18918  ;;  %v8851_v40 = vmul.f32 %v20689_v54, %v20589_v3 }
 0x377   :  { %22165 = vst [vmem:[#allocation70_spill] sm:$0xff] %v20692_v31  ;;  %v8852_v26 = vmul.f32 %v20692_v31, %v20599_v60 }
 0x378   :  { %8893 = vrot.lane.b32.xlu0 %v8851_v40, %s18972_s30  ;;  %v22171_v40 = vld [vmem:[#allocation3_spill] sm:$0xff] }
 0x379   :  { %v20699_v52 = vpop.eup %18920  ;;  %8895 = vrot.lane.b32.xlu1 %v8852_v26, %s18972_s30 }
 0x37a   :  { %22166 = vst [vmem:[#allocation71_spill] sm:$0xff] %v20699_v52  ;;  %v20702_v39 = vpop.eup %18922  ;;  %v8853_v19 = vmul.f32 %v20699_v52, %v20626_v32 }
 0x37b   :  { %22167 = vst [vmem:[#allocation72_spill] sm:$0xff] %v20702_v39  ;;  %v8854_v33 = vmul.f32 %v20702_v39, %v20632_v42  ;;  %v8806_v42 = vpop.permute.xlu0 %8805 }
 0x37c   :  { %8897 = vrot.lane.b32.xlu0 %v8853_v19, %s18972_s30 }
 0x37d   :  { %v20709_v3 = vpop.eup %18924  ;;  %8899 = vrot.lane.b32.xlu1 %v8854_v33, %s18972_s30 }
 0x37e   :  { %22168 = vst [vmem:[#allocation73_spill] sm:$0xff] %v20709_v3  ;;  %v20712_v60 = vpop.eup %18926  ;;  %v8855_v28 = vmul.f32 %v20709_v3, %v20645_v48 }
 0x37f   :  { %22169 = vst [vmem:[#allocation74_spill] sm:$0xff] %v20712_v60  ;;  %v20716_v56 = vpop.eup %18928  ;;  %v8856_v55 = vmul.f32 %v20712_v60, %v20648_v41 }
 0x380   :  { %v20720_v32 = vpop.eup %18930  ;;  %8901 = vrot.lane.b32.xlu0 %v8855_v28, %s18972_s30  ;;  %v8847_v27 = vmul.f32 %v20716_v56, %v8806_v42 }
 0x381   :  { %8903 = vrot.lane.b32.xlu1 %v8856_v55, %s18972_s30  ;;  %v8848_v47 = vmul.f32 %v20720_v32, %v8808_v50 }
 0x384   :  { %8885 = vrot.lane.b32.xlu0 %v8847_v27, %s18972_s30 }
 0x385   :  { %8887 = vrot.lane.b32.xlu1 %v8848_v47, %s18972_s30 }
 0x3d3   :  { %v20728_v48 = vpop.permute.xlu0 %8873 }
 0x3d5   :  { %v20730_v36 = vpop.permute.xlu1 %8875 }
 0x3d8   :  { %v20732_v41 = vpop.permute.xlu0 %8877 }
 0x3d9   :  { %v20734_v24 = vpop.permute.xlu1 %8879  ;;  %v8921_v34 = vcombine.low %v20728_v48, %v20732_v41 }
 0x3da   :  { %v8929_v38 = vcombine.low %v20730_v36, %v20734_v24 }
 0x3db   :  { %v8928_v62 = vrot.slane %v8921_v34, %v22170_v14  ;;  %v17238_v34 = vld [vmem:[%s21998_s6 + $0x40] sm:$0xf] }
 0x3dc   :  { %v20736_v11 = vpop.permute.xlu0 %8881  ;;  %v8936_v44 = vrot.slane %v8929_v38, %v22170_v14 }
 0x3dd   :  { %v20738_v1 = vpop.permute.xlu1 %8883 }
 0x3de   :  { %v8953_v63 = vcombine.low %v8928_v62, %v8936_v44  ;;  %v22173_v44 = vld [vmem:[#allocation4_spill] sm:$0xff]  ;;  %v22175_v62 = vld [vmem:[#allocation7_spill] sm:$0xff] }
 0x3e0   :  { %v8960_v42 = vrot.slane %v8953_v63, %v22171_v40  ;;  %v22177_v63 = vld [vmem:[#allocation11_spill] sm:$0xff] }
 0x3e6   :  { %v20740_v59 = vpop.permute.xlu0 %8889 }
 0x3e7   :  { %v20742_v10 = vpop.permute.xlu1 %8891 }
 0x3ea   :  { %v20744_v21 = vpop.permute.xlu0 %8893 }
 0x3eb   :  { %v20746_v43 = vpop.permute.xlu1 %8895  ;;  %v8971_v49 = vcombine.low %v20740_v59, %v20744_v21 }
 0x3ec   :  { %v8979_v51 = vcombine.low %v20742_v10, %v20746_v43 }
 0x3ed   :  { %v8978_v35 = vrot.slane %v8971_v49, %v22170_v14 }
 0x3ee   :  { %v20750_v13 = vpop.permute.xlu0 %8897  ;;  %v8986_v9 = vrot.slane %v8979_v51, %v22170_v14 }
 0x3ef   :  { %v20752_v15 = vpop.permute.xlu1 %8899 }
 0x3f0   :  { %v9003_v29 = vcombine.low %v8978_v35, %v8986_v9  ;;  %v22172_v35 = vmov 0.0  }
 0x3f2   :  { %v20759_v4 = vpop.permute.xlu0 %8901  ;;  %v9010_v26 = vrot.slane %v9003_v29, %v22171_v40  ;;  %v17242_v29 = vld [vmem:[%s21998_s6 + $0x50] sm:$0xf] }
 0x3f3   :  { %v8987_v20 = vcombine.low %v20750_v13, %v20759_v4  ;;  %v20765_v18 = vpop.permute.xlu1 %8903 }
 0x3f4   :  { %v8995_v17 = vcombine.low %v20752_v15, %v20765_v18 }
 0x3f5   :  { %v8994_v0 = vrot.slane %v8987_v20, %v22170_v14  ;;  %v20806_v20 = vld [vmem:[%s21993_s0 + $0x8] sm:$0xff] }
 0x3f6   :  { %v9002_v7 = vrot.slane %v8995_v17, %v22170_v14  ;;  %v20773_v22 = vpop.permute.xlu0 %8885  ;;  %v17240_v17 = vld [vmem:[%s21998_s6 + $0x48] sm:$0xf] }
 0x3f7   :  { %v8937_v23 = vcombine.low %v20736_v11, %v20773_v22  ;;  %v20778_v58 = vpop.permute.xlu1 %8887 }
 0x3f8   :  { %v9011_v61 = vcombine.low %v8994_v0, %v9002_v7  ;;  %v8945_v2 = vcombine.low %v20738_v1, %v20778_v58  ;;  %v22174_v0 = vld [vmem:[#allocation5_spill] sm:$0xff] }
 0x3f9   :  { %v8944_v37 = vrot.slane %v8937_v23, %v22170_v14  ;;  %v17244_v7 = vld [vmem:[%s21998_s6 + $0x58] sm:$0xf]  ;;  %v17246_v23 = vld [vmem:[%s21998_s6 + $0x60] sm:$0xf] }
 0x3fa   :  { %v8952_v12 = vrot.slane %v8945_v2, %v22170_v14  ;;  %v9018_v19 = vrot.slane %v9011_v61, %v22171_v40  ;;  %v22176_v61 = vld [vmem:[#allocation9_spill] sm:$0xff]  ;;  %v17248_v2 = vld [vmem:[%s21998_s6 + $0x68] sm:$0xf] }
 0x3fc   :  { %v8961_v33 = vcombine.low %v8944_v37, %v8952_v12  ;;  %v9020_v28 = vcombine.high %v9010_v26, %v9018_v19  ;;  %v9019_v55 = vcombine.low %v9010_v26, %v9018_v19  ;;  %v17250_v37 = vld [vmem:[%s21998_s6 + $0x70] sm:$0xf]  ;;  %v22178_v12 = vld [vmem:[#allocation13_spill] sm:$0xff]  ;;  %v22179_v19 = vld [vmem:[#allocation15_spill] sm:$0xff] }
 0x3fd   :  { %v17252_v26 = vld [vmem:[%s21998_s6 + $0x78] sm:$0xf] }
 0x3fe   :  { %9025 = vrot.lane.b32.xlu0 %v9020_v28, %s18973_s1  ;;  %v8968_v50 = vrot.slane %v8961_v33, %v22171_v40  ;;  %v9185_v33 = vld [vmem:[%s21998_s6] sm:$0xf]  ;;  %v22180_v28 = vld [vmem:[#allocation17_spill] sm:$0xff] }
 0x400   :  { %v8970_v27 = vcombine.high %v8960_v42, %v8968_v50  ;;  %v8969_v47 = vcombine.low %v8960_v42, %v8968_v50  ;;  %v22181_v42 = vld [vmem:[#allocation19_spill] sm:$0xff]  ;;  %v9189_v50 = vld [vmem:[%s21998_s6 + $0x10] sm:$0xf] }
 0x402   :  { %9023 = vrot.lane.b32.xlu1 %v8970_v27, %s18973_s1  ;;  %v22182_v27 = vld [vmem:[#allocation21_spill] sm:$0xff] }
 0x470   :  { %v9026_v51 = vpop.permute.xlu0 %9025 }
 0x471   :  { %v20791_v49 = vsel %vm4805_vm4, %v9019_v55, %v9026_v51  ;;  %v9187_v55 = vld [vmem:[%s21998_s6 + $0x8] sm:$0xf] }
 0x472   :  { %18362 = vmatprep.subr.mxu0 %v20791_v49  ;;  %v22183_v51 = vld [vmem:[#allocation23_spill] sm:$0xff] }
 0x473   :  { %18363 = vmatpush3.msra.mxu0 %v20791_v49 }
 0x474   :  { %v9024_v38 = vpop.permute.xlu1 %9023 }
 0x475   :  { %v20796_v9 = vsel %vm4805_vm4, %v8969_v47, %v9024_v38  ;;  %v9191_v47 = vld [vmem:[%s21998_s6 + $0x18] sm:$0xf]  ;;  %v9193_v38 = vld [vmem:[%s21998_s6 + $0x20] sm:$0xf] }
 0x476   :  { %18364 = vmatprep.subr.mxu0 %v20796_v9 }
 0x477   :  { %18365 = vmatpush3.msra.mxu0 %v20796_v9 }
 0x478   :  { %18367 = vmatmul.mubr.msk.f32.vlgmr.msra.gmra.mxu0 %vm38_vm0, %v20806_v20  ;;  %18376 = vmatprep.subr.mxu0 %v22172_v35 }
 0x479   :  { %18377 = vmatpush3.msk.msra.mxu0 %vm671_vm1, %v17238_v34  ;;  %18378 = vmatprep.mubr.msk.f32.mxu0 %vm18969_vm2, %v22172_v35  ;;  %v22184_v34 = vld [vmem:[#allocation25_spill] sm:$0xff] }
 0x47a   :  { %18386 = vmatprep.subr.mxu0 %v22172_v35 }
 0x47c   :  { %18379 = vmatmul.mubr.msk.f32.vlgmr.msra.gmra.mxu0 %vm667_vm3, %v22173_v44  ;;  %v22185_v44 = vld [vmem:[#allocation27_spill] sm:$0xff] }
 0x47d   :  { %18387 = vmatpush3.msk.msra.mxu0 %vm671_vm1, %v17240_v17  ;;  %18388 = vmatprep.mubr.msk.f32.mxu0 %vm18969_vm2, %v22172_v35  ;;  %v9195_v17 = vld [vmem:[%s21998_s6 + $0x28] sm:$0xf] }
 0x47e   :  { %18396 = vmatprep.subr.mxu0 %v22172_v35 }
 0x480   :  { %18389 = vmatmul.mubr.msk.f32.vlgmr.msra.gmra.mxu0 %vm667_vm3, %v22174_v0  ;;  %v22186_v0 = vld [vmem:[#allocation29_spill] sm:$0xff] }
 0x481   :  { %18397 = vmatpush3.msk.msra.mxu0 %vm671_vm1, %v17242_v29  ;;  %18398 = vmatprep.mubr.msk.f32.mxu0 %vm18969_vm2, %v22172_v35  ;;  %v9197_v29 = vld [vmem:[%s21998_s6 + $0x30] sm:$0xf] }
 0x482   :  { %18406 = vmatprep.subr.mxu0 %v22172_v35 }
 0x484   :  { %18399 = vmatmul.mubr.msk.f32.vlgmr.msra.gmra.mxu0 %vm667_vm3, %v22175_v62  ;;  %v22187_v62 = vld [vmem:[#allocation31_spill] sm:$0xff] }
 0x485   :  { %18407 = vmatpush3.msk.msra.mxu0 %vm671_vm1, %v17244_v7  ;;  %18408 = vmatprep.mubr.msk.f32.mxu0 %vm18969_vm2, %v22172_v35  ;;  %v9199_v7 = vld [vmem:[%s21998_s6 + $0x38] sm:$0xf] }
 0x486   :  { %18416 = vmatprep.subr.mxu0 %v22172_v35 }
 0x488   :  { %18409 = vmatmul.mubr.msk.f32.vlgmr.msra.gmra.mxu0 %vm667_vm3, %v22176_v61  ;;  %v22188_v61 = vld [vmem:[#allocation33_spill] sm:$0xff] }
 0x489   :  { %18417 = vmatpush3.msk.msra.mxu0 %vm671_vm1, %v17246_v23  ;;  %18418 = vmatprep.mubr.msk.f32.mxu0 %vm18969_vm2, %v22172_v35  ;;  %v17318_v23 = vld [vmem:[%s21998_s6 + $0x80] sm:$0xf] }
 0x48a   :  { %18426 = vmatprep.subr.mxu0 %v22172_v35 }
 0x48c   :  { %18419 = vmatmul.mubr.msk.f32.vlgmr.msra.gmra.mxu0 %vm667_vm3, %v22177_v63  ;;  %v22189_v63 = vld [vmem:[#allocation36_spill] sm:$0xff] }
 0x48d   :  { %18427 = vmatpush3.msk.msra.mxu0 %vm671_vm1, %v17248_v2  ;;  %18428 = vmatprep.mubr.msk.f32.mxu0 %vm18969_vm2, %v22172_v35  ;;  %v17320_v2 = vld [vmem:[%s21998_s6 + $0x88] sm:$0xf] }
 0x48e   :  { %18436 = vmatprep.subr.mxu0 %v22172_v35 }
 0x490   :  { %18429 = vmatmul.mubr.msk.f32.vlgmr.msra.gmra.mxu0 %vm667_vm3, %v22178_v12  ;;  %v22190_v12 = vld [vmem:[#allocation38_spill] sm:$0xff] }
 0x491   :  { %18437 = vmatpush3.msk.msra.mxu0 %vm671_vm1, %v17250_v37  ;;  %18438 = vmatprep.mubr.msk.f32.mxu0 %vm18969_vm2, %v22172_v35  ;;  %v17322_v37 = vld [vmem:[%s21998_s6 + $0x90] sm:$0xf] }
 0x492   :  { %18446 = vmatprep.subr.mxu0 %v22172_v35 }
 0x494   :  { %18439 = vmatmul.mubr.msk.f32.vlgmr.msra.gmra.mxu0 %vm667_vm3, %v22179_v19  ;;  %v22191_v19 = vld [vmem:[#allocation40_spill] sm:$0xff] }
 0x495   :  { %18447 = vmatpush3.msk.msra.mxu0 %vm671_vm1, %v17252_v26  ;;  %18448 = vmatprep.mubr.msk.f32.mxu0 %vm18969_vm2, %v22172_v35  ;;  %v17324_v26 = vld [vmem:[%s21998_s6 + $0x98] sm:$0xf] }
 0x496   :  { %18456 = vmatprep.subr.mxu0 %v22172_v35 }
 0x498   :  { %18449 = vmatmul.mubr.msk.f32.vlgmr.msra.gmra.mxu0 %vm667_vm3, %v22180_v28  ;;  %v22192_v28 = vld [vmem:[#allocation41_spill] sm:$0xff] }
 0x499   :  { %18457 = vmatpush3.msk.msra.mxu0 %vm671_vm1, %v9185_v33  ;;  %18458 = vmatprep.mubr.msk.f32.mxu0 %vm18969_vm2, %v22172_v35  ;;  %v17326_v33 = vld [vmem:[%s21998_s6 + $0xa0] sm:$0xf] }
 0x49a   :  { %18466 = vmatprep.subr.mxu0 %v22172_v35 }
 0x49c   :  { %18459 = vmatmul.mubr.msk.f32.vlgmr.msra.gmra.mxu0 %vm667_vm3, %v22181_v42  ;;  %v22193_v42 = vld [vmem:[#allocation43_spill] sm:$0xff] }
 0x49d   :  { %18467 = vmatpush3.msk.msra.mxu0 %vm671_vm1, %v9187_v55  ;;  %18468 = vmatprep.mubr.msk.f32.mxu0 %vm18969_vm2, %v22172_v35  ;;  %v17328_v55 = vld [vmem:[%s21998_s6 + $0xa8] sm:$0xf] }
 0x49e   :  { %18476 = vmatprep.subr.mxu0 %v22172_v35 }
 0x4a0   :  { %18469 = vmatmul.mubr.msk.f32.vlgmr.msra.gmra.mxu0 %vm667_vm3, %v22182_v27  ;;  %v22194_v27 = vld [vmem:[#allocation45_spill] sm:$0xff] }
 0x4a1   :  { %18477 = vmatpush3.msk.msra.mxu0 %vm671_vm1, %v9189_v50  ;;  %18478 = vmatprep.mubr.msk.f32.mxu0 %vm18969_vm2, %v22172_v35  ;;  %v17330_v50 = vld [vmem:[%s21998_s6 + $0xb0] sm:$0xf] }
 0x4a2   :  { %18486 = vmatprep.subr.mxu0 %v22172_v35 }
 0x4a4   :  { %18479 = vmatmul.mubr.msk.f32.vlgmr.msra.gmra.mxu0 %vm667_vm3, %v22183_v51  ;;  %v22195_v51 = vld [vmem:[#allocation47_spill] sm:$0xff] }
 0x4a5   :  { %18487 = vmatpush3.msk.msra.mxu0 %vm671_vm1, %v9191_v47  ;;  %18488 = vmatprep.mubr.msk.f32.mxu0 %vm18969_vm2, %v22172_v35  ;;  %v17332_v47 = vld [vmem:[%s21998_s6 + $0xb8] sm:$0xf] }
 0x4a6   :  { %18496 = vmatprep.subr.mxu0 %v22172_v35 }
 0x4a8   :  { %18489 = vmatmul.mubr.msk.f32.vlgmr.msra.gmra.mxu0 %vm667_vm3, %v22184_v34  ;;  %v17366_v34 = vld [vmem:[%s21999_s7 + $0x80] sm:$0xff] }
 0x4a9   :  { %18497 = vmatpush3.msk.msra.mxu0 %vm671_vm1, %v9193_v38  ;;  %18498 = vmatprep.mubr.msk.f32.mxu0 %vm18969_vm2, %v22172_v35  ;;  %v22196_v38 = vld [vmem:[#allocation49_spill] sm:$0xff] }
 0x4aa   :  { %18506 = vmatprep.subr.mxu0 %v22172_v35 }
 0x4ac   :  { %18499 = vmatmul.mubr.msk.f32.vlgmr.msra.gmra.mxu0 %vm667_vm3, %v22185_v44 }
 0x4ad   :  { %18507 = vmatpush3.msk.msra.mxu0 %vm671_vm1, %v9195_v17  ;;  %18508 = vmatprep.mubr.msk.f32.mxu0 %vm18969_vm2, %v22172_v35 }
 0x4ae   :  { %18516 = vmatprep.subr.mxu0 %v22172_v35 }
 0x4b0   :  { %18509 = vmatmul.mubr.msk.f32.vlgmr.msra.gmra.mxu0 %vm667_vm3, %v22186_v0 }
 0x4b1   :  { %18517 = vmatpush3.msk.msra.mxu0 %vm671_vm1, %v9197_v29  ;;  %18518 = vmatprep.mubr.msk.f32.mxu0 %vm18969_vm2, %v22172_v35  ;;  %v17239_v29 = vld [vmem:[%s21998_s6 + $0x44] sm:$0xf] }
 0x4b2   :  { %18526 = vmatprep.subr.mxu0 %v22172_v35 }
 0x4b4   :  { %18519 = vmatmul.mubr.msk.f32.vlgmr.msra.gmra.mxu0 %vm667_vm3, %v22187_v62  ;;  %v17241_v62 = vld [vmem:[%s21998_s6 + $0x4c] sm:$0xf] }
 0x4b5   :  { %18527 = vmatpush3.msk.msra.mxu0 %vm671_vm1, %v9199_v7  ;;  %18528 = vmatprep.mubr.msk.f32.mxu0 %vm18969_vm2, %v22172_v35 }
 0x4b6   :  { %18536 = vmatprep.subr.mxu0 %v22172_v35 }
 0x4b8   :  { %18529 = vmatmul.mubr.msk.f32.vlgmr.msra.gmra.mxu0 %vm667_vm3, %v22188_v61  ;;  %v22197_v61 = vld [vmem:[#allocation6_spill] sm:$0xff] }
 0x4b9   :  { %18537 = vmatpush3.msk.msra.mxu0 %vm671_vm1, %v17318_v23  ;;  %18538 = vmatprep.mubr.msk.f32.mxu0 %vm18969_vm2, %v22172_v35 }
 0x4ba   :  { %18546 = vmatprep.subr.mxu0 %v22172_v35 }
 0x4bc   :  { %18539 = vmatmul.mubr.msk.f32.vlgmr.msra.gmra.mxu0 %vm667_vm3, %v22189_v63 }
 0x4bd   :  { %18547 = vmatpush3.msk.msra.mxu0 %vm671_vm1, %v17320_v2  ;;  %18548 = vmatprep.mubr.msk.f32.mxu0 %vm18969_vm2, %v22172_v35 }
 0x4be   :  { %18556 = vmatprep.subr.mxu0 %v22172_v35 }
 0x4c0   :  { %18549 = vmatmul.mubr.msk.f32.vlgmr.msra.gmra.mxu0 %vm667_vm3, %v22190_v12 }
 0x4c1   :  { %18557 = vmatpush3.msk.msra.mxu0 %vm671_vm1, %v17322_v37  ;;  %18558 = vmatprep.mubr.msk.f32.mxu0 %vm18969_vm2, %v22172_v35  ;;  %v22198_v37 = vld [vmem:[#allocation8_spill] sm:$0xff] }
 0x4c2   :  { %18566 = vmatprep.subr.mxu0 %v22172_v35 }
 0x4c4   :  { %18559 = vmatmul.mubr.msk.f32.vlgmr.msra.gmra.mxu0 %vm667_vm3, %v22191_v19 }
 0x4c5   :  { %18567 = vmatpush3.msk.msra.mxu0 %vm671_vm1, %v17324_v26  ;;  %18568 = vmatprep.mubr.msk.f32.mxu0 %vm18969_vm2, %v22172_v35  ;;  %v17245_v26 = vld [vmem:[%s21998_s6 + $0x5c] sm:$0xf] }
 0x4c6   :  { %18576 = vmatprep.subr.mxu0 %v22172_v35 }
 0x4c8   :  { %18569 = vmatmul.mubr.msk.f32.vlgmr.msra.gmra.mxu0 %vm667_vm3, %v22192_v28 }
 0x4c9   :  { %18577 = vmatpush3.msk.msra.mxu0 %vm671_vm1, %v17326_v33  ;;  %18578 = vmatprep.mubr.msk.f32.mxu0 %vm18969_vm2, %v22172_v35  ;;  %v22199_v33 = vld [vmem:[#allocation10_spill] sm:$0xff] }
 0x4ca   :  { %18586 = vmatprep.subr.mxu0 %v22172_v35 }
 0x4cc   :  { %18579 = vmatmul.mubr.msk.f32.vlgmr.msra.gmra.mxu0 %vm667_vm3, %v22193_v42 }
 0x4cd   :  { %18587 = vmatpush3.msk.msra.mxu0 %vm671_vm1, %v17328_v55  ;;  %18588 = vmatprep.mubr.msk.f32.mxu0 %vm18969_vm2, %v22172_v35  ;;  %v17247_v55 = vld [vmem:[%s21998_s6 + $0x64] sm:$0xf] }
 0x4ce   :  { %18596 = vmatprep.subr.mxu0 %v22172_v35 }
 0x4d0   :  { %18589 = vmatmul.mubr.msk.f32.vlgmr.msra.gmra.mxu0 %vm667_vm3, %v22194_v27 }
 0x4d1   :  { %18597 = vmatpush3.msk.msra.mxu0 %vm671_vm1, %v17330_v50  ;;  %18598 = vmatprep.mubr.msk.f32.mxu0 %vm18969_vm2, %v22172_v35  ;;  %v22200_v50 = vld [vmem:[#allocation12_spill] sm:$0xff] }
 0x4d2   :  { %18606 = vmatprep.subr.mxu0 %v22172_v35 }
 0x4d4   :  { %18599 = vmatmul.mubr.msk.f32.vlgmr.msra.gmra.mxu0 %vm667_vm3, %v22195_v51 }
 0x4d5   :  { %18607 = vmatpush3.msk.msra.mxu0 %vm671_vm1, %v17332_v47  ;;  %18608 = vmatprep.mubr.msk.f32.mxu0 %vm18969_vm2, %v22172_v35  ;;  %v17249_v47 = vld [vmem:[%s21998_s6 + $0x6c] sm:$0xf] }
 0x4d6   :  { %18616 = vmatprep.subr.mxu0 %v22172_v35 }
 0x4d8   :  { %18609 = vmatmul.mubr.msk.f32.vlgmr.msra.gmra.mxu0 %vm667_vm3, %v22196_v38  ;;  %v22201_v38 = vld [vmem:[#allocation14_spill] sm:$0xff] }
 0x4d9   :  { %18618 = vmatprep.mubr.msk.f32.mxu0 %vm18969_vm2, %v22172_v35  ;;  %18617 = vmatpush3.msra.mxu0 %v17366_v34 }
 0x4da   :  { %18626 = vmatprep.subr.mxu0 %v22172_v35 }
 0x538   :  { %v21030_v17 = vpop.f32.mrf.mxu0 }
 0x539   :  { %12775 = vrot.lane.b32.xlu1 %v21030_v17, %s18972_s30  ;;  %18369 = vmatprep.subr.mxu1 %v21030_v17 }
 0x53a   :  { %v21035_v44 = vpop.f32.mrf.mxu0  ;;  %18370 = vmatpush3.msra.mxu1 %v21030_v17 }
 0x53b   :  { %12773 = vrot.lane.b32.xlu0 %v21035_v44, %s18972_s30  ;;  %18371 = vmatprep.subr.mxu1 %v21035_v44 }
 0x53c   :  { %18372 = vmatpush3.msra.mxu1 %v21035_v44  ;;  %v9287_v0 = vpop.f32.mrf.mxu0 }
 0x53d   :  { %18374 = vmatmul.mubr.msk.f32.vlgmr.msra.gmra.mxu1 %vm38_vm0, %v20806_v20  ;;  %18381 = vmatprep.subr.mxu1 %v22172_v35  ;;  %v17243_v20 = vld [vmem:[%s21998_s6 + $0x54] sm:$0xf] }
 0x53e   :  { %v18380_v7 = vpop.f32.mrf.mxu0  ;;  %18382 = vmatpush3.msk.msra.mxu1 %vm671_vm1, %v17239_v29  ;;  %18383 = vmatprep.mubr.msk.f32.mxu1 %vm18969_vm2, %v22172_v35  ;;  %v17251_v29 = vld [vmem:[%s21998_s6 + $0x74] sm:$0xf] }
 0x53f   :  { %18391 = vmatprep.subr.mxu1 %v22172_v35 }
 0x540   :  { %v9433_v23 = vpop.f32.mrf.mxu0 }
 0x541   :  { %18384 = vmatmul.mubr.msk.f32.vlgmr.msra.gmra.mxu1 %vm667_vm3, %v22197_v61 }
 0x542   :  { %v18390_v2 = vpop.f32.mrf.mxu0  ;;  %18392 = vmatpush3.msk.msra.mxu1 %vm671_vm1, %v17241_v62  ;;  %18393 = vmatprep.mubr.msk.f32.mxu1 %vm18969_vm2, %v22172_v35  ;;  %v22202_v62 = vld [vmem:[#allocation16_spill] sm:$0xff] }
 0x543   :  { %18401 = vmatprep.subr.mxu1 %v22172_v35  ;;  %v17253_v2 = vld [vmem:[%s21998_s6 + $0x7c] sm:$0xf] }
 0x544   :  { %v9579_v63 = vpop.f32.mrf.mxu0 }
 0x545   :  { %18394 = vmatmul.mubr.msk.f32.vlgmr.msra.gmra.mxu1 %vm667_vm3, %v22198_v37  ;;  %v22203_v37 = vld [vmem:[#allocation18_spill] sm:$0xff] }
 0x546   :  { %v18400_v12 = vpop.f32.mrf.mxu0  ;;  %18402 = vmatpush3.msk.msra.mxu1 %vm671_vm1, %v17243_v20  ;;  %18403 = vmatprep.mubr.msk.f32.mxu1 %vm18969_vm2, %v22172_v35 }
 0x547   :  { %18411 = vmatprep.subr.mxu1 %v22172_v35 }
 0x548   :  { %v9725_v19 = vpop.f32.mrf.mxu0 }
 0x549   :  { %18404 = vmatmul.mubr.msk.f32.vlgmr.msra.gmra.mxu1 %vm667_vm3, %v22199_v33 }
 0x54a   :  { %v18410_v28 = vpop.f32.mrf.mxu0  ;;  %18412 = vmatpush3.msk.msra.mxu1 %vm671_vm1, %v17245_v26  ;;  %18413 = vmatprep.mubr.msk.f32.mxu1 %vm18969_vm2, %v22172_v35  ;;  %v9186_v26 = vld [vmem:[%s21998_s6 + $0x4] sm:$0xf] }
 0x54b   :  { %18421 = vmatprep.subr.mxu1 %v22172_v35 }
 0x54c   :  { %v9871_v42 = vpop.f32.mrf.mxu0 }
 0x54d   :  { %18414 = vmatmul.mubr.msk.f32.vlgmr.msra.gmra.mxu1 %vm667_vm3, %v22200_v50 }
 0x54e   :  { %v18420_v27 = vpop.f32.mrf.mxu0  ;;  %18422 = vmatpush3.msk.msra.mxu1 %vm671_vm1, %v17247_v55  ;;  %18423 = vmatprep.mubr.msk.f32.mxu1 %vm18969_vm2, %v22172_v35  ;;  %v22204_v55 = vld [vmem:[#allocation20_spill] sm:$0xff] }
 0x54f   :  { %18431 = vmatprep.subr.mxu1 %v22172_v35  ;;  %v9188_v27 = vld [vmem:[%s21998_s6 + $0xc] sm:$0xf] }
 0x550   :  { %v10017_v51 = vpop.f32.mrf.mxu0 }
 0x551   :  { %18424 = vmatmul.mubr.msk.f32.vlgmr.msra.gmra.mxu1 %vm667_vm3, %v22201_v38 }
 0x552   :  { %v18430_v34 = vpop.f32.mrf.mxu0  ;;  %18432 = vmatpush3.msk.msra.mxu1 %vm671_vm1, %v17249_v47  ;;  %18433 = vmatprep.mubr.msk.f32.mxu1 %vm18969_vm2, %v22172_v35 }
 0x553   :  { %18441 = vmatprep.subr.mxu1 %v22172_v35 }
 0x554   :  { %v21100_v7 = vpop.f32.mrf.mxu0 }
 0x555   :  { %18434 = vmatmul.mubr.msk.f32.vlgmr.msra.gmra.mxu1 %vm667_vm3, %v22202_v62 }
 0x556   :  { %v18440_v61 = vpop.f32.mrf.mxu0  ;;  %18442 = vmatpush3.msk.msra.mxu1 %vm671_vm1, %v17251_v29  ;;  %18443 = vmatprep.mubr.msk.f32.mxu1 %vm18969_vm2, %v22172_v35  ;;  %v9190_v29 = vld [vmem:[%s21998_s6 + $0x14] sm:$0xf] }
 0x557   :  { %18451 = vmatprep.subr.mxu1 %v22172_v35 }
 0x558   :  { %v21111_v20 = vpop.f32.mrf.mxu0 }
 0x559   :  { %18444 = vmatmul.mubr.msk.f32.vlgmr.msra.gmra.mxu1 %vm667_vm3, %v22203_v37  ;;  %v9192_v37 = vld [vmem:[%s21998_s6 + $0x1c] sm:$0xf] }
 0x55a   :  { %v18450_v12 = vpop.f32.mrf.mxu0  ;;  %18452 = vmatpush3.msk.msra.mxu1 %vm671_vm1, %v17253_v2  ;;  %18453 = vmatprep.mubr.msk.f32.mxu1 %vm18969_vm2, %v22172_v35 }
 0x55b   :  { %18461 = vmatprep.subr.mxu1 %v22172_v35 }
 0x55c   :  { %v10455_v33 = vpop.f32.mrf.mxu0 }
 0x55d   :  { %v21122_v28 = vadd.f32 %v10455_v33, %v9287_v0  ;;  %18454 = vmatmul.mubr.msk.f32.vlgmr.msra.gmra.mxu1 %vm667_vm3, %v22204_v55  ;;  %v22205_v0 = vld [vmem:[#allocation22_spill] sm:$0xff] }
 0x55e   :  { %v18460_v50 = vpop.f32.mrf.mxu0  ;;  %18462 = vmatpush3.msk.msra.mxu1 %vm671_vm1, %v9186_v26  ;;  %18463 = vmatprep.mubr.msk.f32.mxu1 %vm18969_vm2, %v22172_v35  ;;  %v9194_v55 = vld [vmem:[%s21998_s6 + $0x24] sm:$0xf] }
 0x55f   :  { %18471 = vmatprep.subr.mxu1 %v22172_v35 }
 0x560   :  { %v10601_v47 = vpop.f32.mrf.mxu0 }
 0x561   :  { %v21133_v38 = vadd.f32 %v10601_v47, %v9433_v23  ;;  %18464 = vmatmul.mubr.msk.f32.vlgmr.msra.gmra.mxu1 %vm667_vm3, %v22205_v0  ;;  %v22206_v23 = vld [vmem:[#allocation24_spill] sm:$0xff]  ;;  %v9196_v0 = vld [vmem:[%s21998_s6 + $0x2c] sm:$0xf] }
 0x562   :  { %v18470_v34 = vpop.f32.mrf.mxu0  ;;  %18472 = vmatpush3.msk.msra.mxu1 %vm671_vm1, %v9188_v27  ;;  %18473 = vmatprep.mubr.msk.f32.mxu1 %vm18969_vm2, %v22172_v35 }
 0x563   :  { %18481 = vmatprep.subr.mxu1 %v22172_v35 }
 0x564   :  { %v10747_v62 = vpop.f32.mrf.mxu0 }
 0x565   :  { %v21144_v61 = vadd.f32 %v10747_v62, %v9579_v63  ;;  %18474 = vmatmul.mubr.msk.f32.vlgmr.msra.gmra.mxu1 %vm667_vm3, %v22206_v23  ;;  %v22207_v63 = vld [vmem:[#allocation26_spill] sm:$0xff]  ;;  %v9198_v23 = vld [vmem:[%s21998_s6 + $0x34] sm:$0xf] }
 0x566   :  { %v18480_v2 = vpop.f32.mrf.mxu0  ;;  %18482 = vmatpush3.msk.msra.mxu1 %vm671_vm1, %v9190_v29  ;;  %18483 = vmatprep.mubr.msk.f32.mxu1 %vm18969_vm2, %v22172_v35 }
 0x567   :  { %18491 = vmatprep.subr.mxu1 %v22172_v35 }
 0x568   :  { %v10893_v12 = vpop.f32.mrf.mxu0 }
 0x569   :  { %v21155_v26 = vadd.f32 %v10893_v12, %v9725_v19  ;;  %18484 = vmatmul.mubr.msk.f32.vlgmr.msra.gmra.mxu1 %vm667_vm3, %v22207_v63  ;;  %v22208_v19 = vld [vmem:[#allocation28_spill] sm:$0xff]  ;;  %v9200_v63 = vld [vmem:[%s21998_s6 + $0x3c] sm:$0xf] }
 0x56a   :  { %v18490_v33 = vpop.f32.mrf.mxu0  ;;  %18492 = vmatpush3.msk.msra.mxu1 %vm671_vm1, %v9192_v37  ;;  %18493 = vmatprep.mubr.msk.f32.mxu1 %vm18969_vm2, %v22172_v35 }
 0x56b   :  { %18501 = vmatprep.subr.mxu1 %v22172_v35 }
 0x56c   :  { %v11039_v50 = vpop.f32.mrf.mxu0 }
 0x56d   :  { %v21166_v27 = vadd.f32 %v11039_v50, %v9871_v42  ;;  %18494 = vmatmul.mubr.msk.f32.vlgmr.msra.gmra.mxu1 %vm667_vm3, %v22208_v19  ;;  %v22209_v42 = vld [vmem:[#allocation30_spill] sm:$0xff] }
 0x56e   :  { %v18500_v47 = vpop.f32.mrf.mxu0  ;;  %18502 = vmatpush3.msk.msra.mxu1 %vm671_vm1, %v9194_v55  ;;  %18503 = vmatprep.mubr.msk.f32.mxu1 %vm18969_vm2, %v22172_v35  ;;  %v17319_v19 = vld [vmem:[%s21998_s6 + $0x84] sm:$0xf] }
 0x56f   :  { %18511 = vmatprep.subr.mxu1 %v22172_v35 }
 0x570   :  { %v11185_v34 = vpop.f32.mrf.mxu0 }
 0x571   :  { %v21177_v29 = vadd.f32 %v11185_v34, %v10017_v51  ;;  %18504 = vmatmul.mubr.msk.f32.vlgmr.msra.gmra.mxu1 %vm667_vm3, %v22209_v42  ;;  %v22210_v51 = vld [vmem:[#allocation32_spill] sm:$0xff]  ;;  %v17321_v42 = vld [vmem:[%s21998_s6 + $0x8c] sm:$0xf] }
 0x572   :  { %v18510_v62 = vpop.f32.mrf.mxu0  ;;  %18512 = vmatpush3.msk.msra.mxu1 %vm671_vm1, %v9196_v0  ;;  %18513 = vmatprep.mubr.msk.f32.mxu1 %vm18969_vm2, %v22172_v35 }
 0x573   :  { %18521 = vmatprep.subr.mxu1 %v22172_v35 }
 0x574   :  { %v11331_v2 = vpop.f32.mrf.mxu0 }
 0x575   :  { %v21189_v37 = vadd.f32 %v11331_v2, %v21100_v7  ;;  %18514 = vmatmul.mubr.msk.f32.vlgmr.msra.gmra.mxu1 %vm667_vm3, %v22210_v51  ;;  %v22211_v7 = vld [vmem:[#allocation34_spill] sm:$0xff]  ;;  %v17323_v51 = vld [vmem:[%s21998_s6 + $0x94] sm:$0xf] }
 0x576   :  { %v18520_v12 = vpop.f32.mrf.mxu0  ;;  %18522 = vmatpush3.msk.msra.mxu1 %vm671_vm1, %v9198_v23  ;;  %18523 = vmatprep.mubr.msk.f32.mxu1 %vm18969_vm2, %v22172_v35 }
 0x577   :  { %18531 = vmatprep.subr.mxu1 %v22172_v35 }
 0x578   :  { %v11477_v33 = vpop.f32.mrf.mxu0 }
 0x579   :  { %v21201_v55 = vadd.f32 %v11477_v33, %v21111_v20  ;;  %18524 = vmatmul.mubr.msk.f32.vlgmr.msra.gmra.mxu1 %vm667_vm3, %v22211_v7  ;;  %v22212_v20 = vld [vmem:[#allocation35_spill] sm:$0xff]  ;;  %v17325_v7 = vld [vmem:[%s21998_s6 + $0x9c] sm:$0xf] }
 0x57a   :  { %v18530_v50 = vpop.f32.mrf.mxu0  ;;  %18532 = vmatpush3.msk.msra.mxu1 %vm671_vm1, %v9200_v63  ;;  %18533 = vmatprep.mubr.msk.f32.mxu1 %vm18969_vm2, %v22172_v35 }
 0x57b   :  { %18541 = vmatprep.subr.mxu1 %v22172_v35 }
 0x57c   :  { %v11640_v47 = vpop.f32.mrf.mxu0 }
 0x57d   :  { %v21213_v0 = vadd.f32 %v11640_v47, %v21122_v28  ;;  %18534 = vmatmul.mubr.msk.f32.vlgmr.msra.gmra.mxu1 %vm667_vm3, %v22212_v20  ;;  %v22213_v28 = vld [vmem:[#allocation37_spill] sm:$0xff]  ;;  %v17327_v20 = vld [vmem:[%s21998_s6 + $0xa4] sm:$0xf] }
 0x57e   :  { %v18540_v34 = vpop.f32.mrf.mxu0  ;;  %18542 = vmatpush3.msk.msra.mxu1 %vm671_vm1, %v17319_v19  ;;  %18543 = vmatprep.mubr.msk.f32.mxu1 %vm18969_vm2, %v22172_v35 }
 0x57f   :  { %18551 = vmatprep.subr.mxu1 %v22172_v35 }
 0x580   :  { %v11786_v62 = vpop.f32.mrf.mxu0 }
 0x581   :  { %v21225_v23 = vadd.f32 %v11786_v62, %v21133_v38  ;;  %18544 = vmatmul.mubr.msk.f32.vlgmr.msra.gmra.mxu1 %vm667_vm3, %v22213_v28  ;;  %v22214_v38 = vld [vmem:[#allocation39_spill] sm:$0xff] }
 0x582   :  { %v18550_v2 = vpop.f32.mrf.mxu0  ;;  %18552 = vmatpush3.msk.msra.mxu1 %vm671_vm1, %v17321_v42  ;;  %18553 = vmatprep.mubr.msk.f32.mxu1 %vm18969_vm2, %v22172_v35  ;;  %v17329_v28 = vld [vmem:[%s21998_s6 + $0xac] sm:$0xf] }
 0x583   :  { %18561 = vmatprep.subr.mxu1 %v22172_v35 }
 0x584   :  { %v11932_v12 = vpop.f32.mrf.mxu0 }
 0x585   :  { %v21237_v63 = vadd.f32 %v11932_v12, %v21144_v61  ;;  %18554 = vmatmul.mubr.msk.f32.vlgmr.msra.gmra.mxu1 %vm667_vm3, %v22214_v38  ;;  %v22215_v61 = vld [vmem:[#allocation42_spill] sm:$0xff]  ;;  %v17331_v38 = vld [vmem:[%s21998_s6 + $0xb4] sm:$0xf] }
 0x586   :  { %v18560_v33 = vpop.f32.mrf.mxu0  ;;  %18562 = vmatpush3.msk.msra.mxu1 %vm671_vm1, %v17323_v51  ;;  %18563 = vmatprep.mubr.msk.f32.mxu1 %vm18969_vm2, %v22172_v35 }
 0x587   :  { %18571 = vmatprep.subr.mxu1 %v22172_v35 }
 0x588   :  { %v12078_v50 = vpop.f32.mrf.mxu0 }
 0x589   :  { %v21249_v19 = vadd.f32 %v12078_v50, %v21155_v26  ;;  %18564 = vmatmul.mubr.msk.f32.vlgmr.msra.gmra.mxu1 %vm667_vm3, %v22215_v61  ;;  %v22216_v26 = vld [vmem:[#allocation44_spill] sm:$0xff]  ;;  %v17333_v61 = vld [vmem:[%s21998_s6 + $0xbc] sm:$0xf] }
 0x58a   :  { %v18570_v47 = vpop.f32.mrf.mxu0  ;;  %18572 = vmatpush3.msk.msra.mxu1 %vm671_vm1, %v17325_v7  ;;  %18573 = vmatprep.mubr.msk.f32.mxu1 %vm18969_vm2, %v22172_v35 }
 0x58b   :  { %18581 = vmatprep.subr.mxu1 %v22172_v35 }
 0x58c   :  { %v12224_v34 = vpop.f32.mrf.mxu0 }
 0x58d   :  { %v21261_v42 = vadd.f32 %v12224_v34, %v21166_v27  ;;  %18574 = vmatmul.mubr.msk.f32.vlgmr.msra.gmra.mxu1 %vm667_vm3, %v22216_v26  ;;  %v22217_v27 = vld [vmem:[#allocation46_spill] sm:$0xff]  ;;  %v17367_v26 = vld [vmem:[%s21999_s7 + $0x88] sm:$0xff] }
 0x58e   :  { %v18580_v62 = vpop.f32.mrf.mxu0  ;;  %18582 = vmatpush3.msk.msra.mxu1 %vm671_vm1, %v17327_v20  ;;  %18583 = vmatprep.mubr.msk.f32.mxu1 %vm18969_vm2, %v22172_v35 }
 0x58f   :  { %18591 = vmatprep.subr.mxu1 %v22172_v35  ;;  %v22220_v62 = vld [vmem:[#allocation51_spill] sm:$0xff] }
 0x590   :  { %v12370_v2 = vpop.f32.mrf.mxu0 }
 0x591   :  { %v21273_v51 = vadd.f32 %v12370_v2, %v21177_v29  ;;  %18584 = vmatmul.mubr.msk.f32.vlgmr.msra.gmra.mxu1 %vm667_vm3, %v22217_v27  ;;  %v22218_v29 = vld [vmem:[#allocation48_spill] sm:$0xff]  ;;  %v12779_v2 = vcombine.high %v21035_v44, %v22172_v35  ;;  %v12786_v27 = vrot.slane %v21035_v44, %v22170_v14 }
 0x592   :  { %v18590_v12 = vpop.f32.mrf.mxu0  ;;  %18592 = vmatpush3.msk.msra.mxu1 %vm671_vm1, %v17329_v28  ;;  %18593 = vmatprep.mubr.msk.f32.mxu1 %vm18969_vm2, %v22172_v35 }
 0x593   :  { %18601 = vmatprep.subr.mxu1 %v22172_v35 }
 0x594   :  { %v12516_v33 = vpop.f32.mrf.mxu0 }
 0x595   :  { %v21285_v7 = vadd.f32 %v12516_v33, %v21189_v37  ;;  %18594 = vmatmul.mubr.msk.f32.vlgmr.msra.gmra.mxu1 %vm667_vm3, %v22218_v29  ;;  %v22219_v37 = vld [vmem:[#allocation50_spill] sm:$0xff] }
 0x596   :  { %v18600_v50 = vpop.f32.mrf.mxu0  ;;  %18602 = vmatpush3.msk.msra.mxu1 %vm671_vm1, %v17331_v38  ;;  %18603 = vmatprep.mubr.msk.f32.mxu1 %vm18969_vm2, %v22172_v35 }
 0x597   :  { %18611 = vmatprep.subr.mxu1 %v22172_v35  ;;  %v12793_v50 = vrot.slane %v12779_v2, %v22170_v14 }
 0x598   :  { %v12662_v47 = vpop.f32.mrf.mxu0 }
 0x599   :  { %v21297_v20 = vadd.f32 %v12662_v47, %v21201_v55  ;;  %18604 = vmatmul.mubr.msk.f32.vlgmr.msra.gmra.mxu1 %vm667_vm3, %v22219_v37  ;;  %v17368_v47 = vld [vmem:[%s21999_s7 + $0x90] sm:$0xff] }
 0x59a   :  { %v18610_v34 = vpop.f32.mrf.mxu0  ;;  %18612 = vmatpush3.msk.msra.mxu1 %vm671_vm1, %v17333_v61  ;;  %18613 = vmatprep.mubr.msk.f32.mxu1 %vm18969_vm2, %v22172_v35 }
 0x59b   :  { %18621 = vmatprep.subr.mxu1 %v22172_v35 }
 0x59d   :  { %18614 = vmatmul.mubr.msk.f32.vlgmr.msra.gmra.mxu1 %vm667_vm3, %v22220_v62  ;;  %v17369_v62 = vld [vmem:[%s21999_s7 + $0x98] sm:$0xff] }
 0x59e   :  { %18622 = vmatpush3.msra.mxu1 %v17367_v26  ;;  %18623 = vmatprep.mubr.msk.f32.mxu1 %vm18969_vm2, %v22172_v35 }
 0x59f   :  { %18631 = vmatprep.subr.mxu1 %v22172_v35 }
 0x5ab   :  { %v12776_v37 = vpop.permute.xlu1 %12775 }
 0x5ad   :  { %v12774_v55 = vpop.permute.xlu0 %12773 }
 0x5ae   :  { %v12794_v28 = vcombine.high %v12774_v55, %v22172_v35  ;;  %v12801_v12 = vrot.slane %v12774_v55, %v22170_v14  ;;  %v17370_v55 = vld [vmem:[%s21999_s7 + $0xa0] sm:$0xff] }
 0x5b0   :  { %v12808_v38 = vrot.slane %v12794_v28, %v22170_v14  ;;  %v12809_v33 = vcombine.low %v12786_v27, %v12801_v12  ;;  %v12810_v29 = vcombine.high %v12786_v27, %v12801_v12  ;;  %v12867_v28 = vrot.slane %v12776_v37, %v22170_v14 }
 0x5b2   :  { %v12817_v61 = vrot.slane %v12809_v33, %v22171_v40  ;;  %v12824_v34 = vrot.slane %v12810_v29, %v22171_v40  ;;  %v12825_v26 = vcombine.low %v12793_v50, %v12808_v38  ;;  %v12826_v2 = vcombine.high %v12793_v50, %v12808_v38  ;;  %v17371_v33 = vld [vmem:[%s21999_s7 + $0xa8] sm:$0xff]  ;;  %v17372_v38 = vld [vmem:[%s21999_s7 + $0xb0] sm:$0xff] }
 0x5b3   :  { %v12852_v29 = vrot.slane %v21030_v17, %v22170_v14  ;;  %v12860_v50 = vcombine.high %v12776_v37, %v22172_v35  ;;  %v12845_v37 = vcombine.high %v21030_v17, %v22172_v35  ;;  %v17375_v17 = vld [vmem:[%s21999_s7 + $0xc8] sm:$0xff] }
 0x5b4   :  { %v12841_v44 = vcombine.high %v12817_v61, %v22172_v35  ;;  %18619 = vmatmul.mubr.msk.f32.vlgmr.msra.gmra.mxu0 %vm4805_vm4, %v12817_v61  ;;  %v12833_v27 = vrot.slane %v12825_v26, %v22171_v40  ;;  %v12842_v12 = vcombine.high %v12824_v34, %v22172_v35  ;;  %v17373_v26 = vld [vmem:[%s21999_s7 + $0xb8] sm:$0xff] }
 0x5b5   :  { %18627 = vmatpush3.msra.mxu0 %v17368_v47  ;;  %18628 = vmatprep.mubr.msk.f32.mxu0 %vm18969_vm2, %v22172_v35  ;;  %v12875_v61 = vcombine.low %v12852_v29, %v12867_v28  ;;  %v12840_v47 = vrot.slane %v12826_v2, %v22171_v40 }
 0x5b6   :  { %18624 = vmatmul.mubr.msk.f32.vlgmr.msra.gmra.mxu1 %vm4805_vm4, %v12841_v44  ;;  %18636 = vmatprep.subr.mxu0 %v22172_v35  ;;  %v17374_v44 = vld [vmem:[%s21999_s7 + $0xc0] sm:$0xff] }
 0x5b7   :  { %18632 = vmatpush3.msra.mxu1 %v17369_v62  ;;  %18633 = vmatprep.mubr.msk.f32.mxu1 %vm18969_vm2, %v22172_v35  ;;  %v12874_v62 = vrot.slane %v12860_v50, %v22170_v14  ;;  %v12883_v2 = vrot.slane %v12875_v61, %v22171_v40  ;;  %v17377_v50 = vld [vmem:[%s21999_s7 + $0xd8] sm:$0xff]  ;;  %v17378_v61 = vld [vmem:[%s21999_s7 + $0xe0] sm:$0xff] }
 0x5b8   :  { %18629 = vmatmul.mubr.msk.f32.vlgmr.msra.gmra.mxu0 %vm4805_vm4, %v12824_v34  ;;  %18641 = vmatprep.subr.mxu1 %v22172_v35  ;;  %v12843_v34 = vcombine.high %v12833_v27, %v22172_v35 }
 0x5b9   :  { %18637 = vmatpush3.msra.mxu0 %v17370_v55  ;;  %18638 = vmatprep.mubr.msk.f32.mxu0 %vm18969_vm2, %v22172_v35  ;;  %v12876_v55 = vcombine.high %v12852_v29, %v12867_v28  ;;  %v17376_v28 = vld [vmem:[%s21999_s7 + $0xd0] sm:$0xff] }
 0x5ba   :  { %18634 = vmatmul.mubr.msk.f32.vlgmr.msra.gmra.mxu1 %vm4805_vm4, %v12842_v12  ;;  %18646 = vmatprep.subr.mxu0 %v22172_v35  ;;  %v12859_v12 = vrot.slane %v12845_v37, %v22170_v14  ;;  %v17379_v37 = vld [vmem:[%s21999_s7 + $0xe8] sm:$0xff] }
 0x5bb   :  { %18642 = vmatpush3.msra.mxu1 %v17371_v33  ;;  %18643 = vmatprep.mubr.msk.f32.mxu1 %vm18969_vm2, %v22172_v35  ;;  %v12890_v33 = vrot.slane %v12876_v55, %v22171_v40 }
 0x5bc   :  { %18639 = vmatmul.mubr.msk.f32.vlgmr.msra.gmra.mxu0 %vm4805_vm4, %v12833_v27  ;;  %18651 = vmatprep.subr.mxu1 %v22172_v35  ;;  %v12844_v27 = vcombine.high %v12840_v47, %v22172_v35  ;;  %v12891_v29 = vcombine.low %v12859_v12, %v12874_v62 }
 0x5bd   :  { %18647 = vmatpush3.msra.mxu0 %v17372_v38  ;;  %18648 = vmatprep.mubr.msk.f32.mxu0 %vm18969_vm2, %v22172_v35  ;;  %v12907_v38 = vcombine.high %v12883_v2, %v22172_v35 }
 0x5be   :  { %18644 = vmatmul.mubr.msk.f32.vlgmr.msra.gmra.mxu1 %vm4805_vm4, %v12843_v34  ;;  %18656 = vmatprep.subr.mxu0 %v22172_v35  ;;  %v12899_v34 = vrot.slane %v12891_v29, %v22171_v40  ;;  %v12759_v29 = vld [vmem:[%s21999_s7 + $0x20] sm:$0xff] }
 0x5bf   :  { %18652 = vmatpush3.msra.mxu1 %v17373_v26  ;;  %18653 = vmatprep.mubr.msk.f32.mxu1 %vm18969_vm2, %v22172_v35  ;;  %v12908_v26 = vcombine.high %v12890_v33, %v22172_v35 }
 0x5c0   :  { %18649 = vmatmul.mubr.msk.f32.vlgmr.msra.gmra.mxu0 %vm4805_vm4, %v12840_v47  ;;  %18661 = vmatprep.subr.mxu1 %v22172_v35  ;;  %v12892_v47 = vcombine.high %v12859_v12, %v12874_v62  ;;  %v12909_v55 = vcombine.high %v12899_v34, %v22172_v35  ;;  %v12756_v12 = vld [vmem:[%s21999_s7 + $0x8] sm:$0xff] }
 0x5c1   :  { %18657 = vmatpush3.msra.mxu0 %v17374_v44  ;;  %18658 = vmatprep.mubr.msk.f32.mxu0 %vm18969_vm2, %v22172_v35  ;;  %v17380_v44 = vld [vmem:[%s21999_s7 + $0xf0] sm:$0xff] }
 0x5c2   :  { %18654 = vmatmul.mubr.msk.f32.vlgmr.msra.gmra.mxu1 %vm4805_vm4, %v12844_v27  ;;  %18666 = vmatprep.subr.mxu0 %v22172_v35  ;;  %v12906_v62 = vrot.slane %v12892_v47, %v22171_v40  ;;  %v12755_v27 = vld [vmem:[%s21999_s7] sm:$0xff] }
 0x5c3   :  { %18662 = vmatpush3.msra.mxu1 %v17375_v17  ;;  %18663 = vmatprep.mubr.msk.f32.mxu1 %vm18969_vm2, %v22172_v35 }
 0x5c4   :  { %18659 = vmatmul.mubr.msk.f32.vlgmr.msra.gmra.mxu0 %vm4805_vm4, %v12883_v2  ;;  %18671 = vmatprep.subr.mxu1 %v22172_v35  ;;  %v17381_v2 = vld [vmem:[%s21999_s7 + $0xf8] sm:$0xff]  ;;  %v12910_v17 = vcombine.high %v12906_v62, %v22172_v35 }
 0x5c5   :  { %18667 = vmatpush3.msra.mxu0 %v17376_v28  ;;  %18668 = vmatprep.mubr.msk.f32.mxu0 %vm18969_vm2, %v22172_v35  ;;  %v12757_v28 = vld [vmem:[%s21999_s7 + $0x10] sm:$0xff] }
 0x5c6   :  { %18664 = vmatmul.mubr.msk.f32.vlgmr.msra.gmra.mxu1 %vm4805_vm4, %v12907_v38  ;;  %18676 = vmatprep.subr.mxu0 %v22172_v35 }
 0x5c7   :  { %18672 = vmatpush3.msra.mxu1 %v17377_v50  ;;  %18673 = vmatprep.mubr.msk.f32.mxu1 %vm18969_vm2, %v22172_v35 }
 0x5c8   :  { %18669 = vmatmul.mubr.msk.f32.vlgmr.msra.gmra.mxu0 %vm4805_vm4, %v12890_v33  ;;  %18681 = vmatprep.subr.mxu1 %v22172_v35  ;;  %v12758_v33 = vld [vmem:[%s21999_s7 + $0x18] sm:$0xff] }
 0x5c9   :  { %18677 = vmatpush3.msra.mxu0 %v17378_v61  ;;  %18678 = vmatprep.mubr.msk.f32.mxu0 %vm18969_vm2, %v22172_v35  ;;  %v17415_v61 = vld [vmem:[%s21999_s7 + $0x108] sm:$0xff] }
 0x5ca   :  { %18674 = vmatmul.mubr.msk.f32.vlgmr.msra.gmra.mxu1 %vm4805_vm4, %v12908_v26  ;;  %18686 = vmatprep.subr.mxu0 %v22172_v35 }
 0x5cb   :  { %18682 = vmatpush3.msra.mxu1 %v17379_v37  ;;  %18683 = vmatprep.mubr.msk.f32.mxu1 %vm18969_vm2, %v22172_v35 }
 0x5cc   :  { %18679 = vmatmul.mubr.msk.f32.vlgmr.msra.gmra.mxu0 %vm4805_vm4, %v12899_v34  ;;  %18691 = vmatprep.subr.mxu1 %v22172_v35 }
 0x5cd   :  { %18687 = vmatpush3.msra.mxu0 %v17380_v44  ;;  %18688 = vmatprep.mubr.msk.f32.mxu0 %vm18969_vm2, %v22172_v35 }
 0x5ce   :  { %18684 = vmatmul.mubr.msk.f32.vlgmr.msra.gmra.mxu1 %vm4805_vm4, %v12909_v55  ;;  %18696 = vmatprep.subr.mxu0 %v22172_v35 }
 0x5cf   :  { %18692 = vmatpush3.msra.mxu1 %v17381_v2  ;;  %18693 = vmatprep.mubr.msk.f32.mxu1 %vm18969_vm2, %v22172_v35 }
 0x5d0   :  { %18689 = vmatmul.mubr.msk.f32.vlgmr.msra.gmra.mxu0 %vm4805_vm4, %v12906_v62  ;;  %18701 = vmatprep.subr.mxu1 %v22172_v35 }
 0x5d1   :  { %18697 = vmatpush3.msra.mxu0 %v12755_v27  ;;  %18698 = vmatprep.mubr.msk.f32.mxu0 %vm18969_vm2, %v22172_v35 }
 0x5d2   :  { %18694 = vmatmul.mubr.msk.f32.vlgmr.msra.gmra.mxu1 %vm4805_vm4, %v12910_v17  ;;  %18706 = vmatprep.subr.mxu0 %v22172_v35 }
 0x5d3   :  { %18702 = vmatpush3.msra.mxu1 %v12756_v12  ;;  %18703 = vmatprep.mubr.msk.f32.mxu1 %vm18969_vm2, %v22172_v35 }
 0x5d4   :  { %18699 = vmatmul.mubr.msk.f32.vlgmr.msra.gmra.mxu0 %vm4805_vm4, %v20728_v48  ;;  %18711 = vmatprep.subr.mxu1 %v22172_v35  ;;  %v12760_v48 = vld [vmem:[%s21999_s7 + $0x28] sm:$0xff] }
 0x5d5   :  { %18707 = vmatpush3.msra.mxu0 %v12757_v28  ;;  %18708 = vmatprep.mubr.msk.f32.mxu0 %vm18969_vm2, %v22172_v35 }
 0x5d6   :  { %18704 = vmatmul.mubr.msk.f32.vlgmr.msra.gmra.mxu1 %vm4805_vm4, %v20730_v36  ;;  %18716 = vmatprep.subr.mxu0 %v22172_v35  ;;  %v12761_v36 = vld [vmem:[%s21999_s7 + $0x30] sm:$0xff] }
 0x5d7   :  { %18712 = vmatpush3.msra.mxu1 %v12758_v33  ;;  %18713 = vmatprep.mubr.msk.f32.mxu1 %vm18969_vm2, %v22172_v35 }
 0x5d8   :  { %18709 = vmatmul.mubr.msk.f32.vlgmr.msra.gmra.mxu0 %vm4805_vm4, %v20732_v41  ;;  %18721 = vmatprep.subr.mxu1 %v22172_v35  ;;  %v12762_v41 = vld [vmem:[%s21999_s7 + $0x38] sm:$0xff] }
 0x5d9   :  { %18717 = vmatpush3.msra.mxu0 %v12759_v29  ;;  %18718 = vmatprep.mubr.msk.f32.mxu0 %vm18969_vm2, %v22172_v35 }
 0x5da   :  { %18714 = vmatmul.mubr.msk.f32.vlgmr.msra.gmra.mxu1 %vm4805_vm4, %v20734_v24  ;;  %18726 = vmatprep.subr.mxu0 %v22172_v35  ;;  %v12763_v24 = vld [vmem:[%s21999_s7 + $0x40] sm:$0xff] }
 0x5db   :  { %18722 = vmatpush3.msra.mxu1 %v12760_v48  ;;  %18723 = vmatprep.mubr.msk.f32.mxu1 %vm18969_vm2, %v22172_v35 }
 0x5dc   :  { %18719 = vmatmul.mubr.msk.f32.vlgmr.msra.gmra.mxu0 %vm4805_vm4, %v20736_v11  ;;  %18731 = vmatprep.subr.mxu1 %v22172_v35  ;;  %v12764_v11 = vld [vmem:[%s21999_s7 + $0x48] sm:$0xff] }
 0x5dd   :  { %18727 = vmatpush3.msra.mxu0 %v12761_v36  ;;  %18728 = vmatprep.mubr.msk.f32.mxu0 %vm18969_vm2, %v22172_v35 }
 0x5de   :  { %18724 = vmatmul.mubr.msk.f32.vlgmr.msra.gmra.mxu1 %vm4805_vm4, %v20738_v1  ;;  %18736 = vmatprep.subr.mxu0 %v22172_v35  ;;  %v12765_v1 = vld [vmem:[%s21999_s7 + $0x50] sm:$0xff] }
 0x5df   :  { %18732 = vmatpush3.msra.mxu1 %v12762_v41  ;;  %18733 = vmatprep.mubr.msk.f32.mxu1 %vm18969_vm2, %v22172_v35 }
 0x5e0   :  { %18729 = vmatmul.mubr.msk.f32.vlgmr.msra.gmra.mxu0 %vm4805_vm4, %v20773_v22  ;;  %18741 = vmatprep.subr.mxu1 %v22172_v35  ;;  %v12766_v22 = vld [vmem:[%s21999_s7 + $0x58] sm:$0xff] }
 0x5e1   :  { %18737 = vmatpush3.msra.mxu0 %v12763_v24  ;;  %18738 = vmatprep.mubr.msk.f32.mxu0 %vm18969_vm2, %v22172_v35 }
 0x5e2   :  { %18734 = vmatmul.mubr.msk.f32.vlgmr.msra.gmra.mxu1 %vm4805_vm4, %v20778_v58  ;;  %18746 = vmatprep.subr.mxu0 %v22172_v35  ;;  %v12767_v58 = vld [vmem:[%s21999_s7 + $0x60] sm:$0xff] }
 0x5e3   :  { %18742 = vmatpush3.msra.mxu1 %v12764_v11  ;;  %18743 = vmatprep.mubr.msk.f32.mxu1 %vm18969_vm2, %v22172_v35 }
 0x5e4   :  { %18739 = vmatmul.mubr.msk.f32.vlgmr.msra.gmra.mxu0 %vm4805_vm4, %v20740_v59  ;;  %18751 = vmatprep.subr.mxu1 %v22172_v35  ;;  %v12768_v59 = vld [vmem:[%s21999_s7 + $0x68] sm:$0xff] }
 0x5e5   :  { %18747 = vmatpush3.msra.mxu0 %v12765_v1  ;;  %18748 = vmatprep.mubr.msk.f32.mxu0 %vm18969_vm2, %v22172_v35 }
 0x5e6   :  { %18744 = vmatmul.mubr.msk.f32.vlgmr.msra.gmra.mxu1 %vm4805_vm4, %v20742_v10  ;;  %18756 = vmatprep.subr.mxu0 %v22172_v35  ;;  %v12769_v10 = vld [vmem:[%s21999_s7 + $0x70] sm:$0xff] }
 0x5e7   :  { %18752 = vmatpush3.msra.mxu1 %v12766_v22  ;;  %18753 = vmatprep.mubr.msk.f32.mxu1 %vm18969_vm2, %v22172_v35 }
 0x5e8   :  { %18749 = vmatmul.mubr.msk.f32.vlgmr.msra.gmra.mxu0 %vm4805_vm4, %v20744_v21  ;;  %18761 = vmatprep.subr.mxu1 %v22172_v35  ;;  %v12770_v21 = vld [vmem:[%s21999_s7 + $0x78] sm:$0xff] }
 0x5e9   :  { %18757 = vmatpush3.msra.mxu0 %v12767_v58  ;;  %18758 = vmatprep.mubr.msk.f32.mxu0 %vm18969_vm2, %v22172_v35 }
 0x5ea   :  { %18754 = vmatmul.mubr.msk.f32.vlgmr.msra.gmra.mxu1 %vm4805_vm4, %v20746_v43  ;;  %18766 = vmatprep.subr.mxu0 %v22172_v35 }
 0x5eb   :  { %18762 = vmatpush3.msra.mxu1 %v12768_v59  ;;  %18763 = vmatprep.mubr.msk.f32.mxu1 %vm18969_vm2, %v22172_v35 }
 0x5ec   :  { %18759 = vmatmul.mubr.msk.f32.vlgmr.msra.gmra.mxu0 %vm4805_vm4, %v20750_v13  ;;  %18771 = vmatprep.subr.mxu1 %v22172_v35 }
 0x5ed   :  { %18767 = vmatpush3.msra.mxu0 %v12769_v10  ;;  %18768 = vmatprep.mubr.msk.f32.mxu0 %vm18969_vm2, %v22172_v35 }
 0x5ee   :  { %18764 = vmatmul.mubr.msk.f32.vlgmr.msra.gmra.mxu1 %vm4805_vm4, %v20752_v15  ;;  %18776 = vmatprep.subr.mxu0 %v22172_v35  ;;  %v17414_v15 = vld [vmem:[%s21999_s7 + $0x100] sm:$0xff] }
 0x5ef   :  { %18772 = vmatpush3.msra.mxu1 %v12770_v21  ;;  %18773 = vmatprep.mubr.msk.f32.mxu1 %vm18969_vm2, %v22172_v35 }
 0x5f0   :  { %18769 = vmatmul.mubr.msk.f32.vlgmr.msra.gmra.mxu0 %vm4805_vm4, %v20759_v4  ;;  %18781 = vmatprep.subr.mxu1 %v22172_v35 }
 0x5f1   :  { %18778 = vmatprep.mubr.msk.f32.mxu0 %vm18969_vm2, %v22172_v35  ;;  %18777 = vmatpush3.msra.mxu0 %v17414_v15 }
 0x5f2   :  { %18774 = vmatmul.mubr.msk.f32.vlgmr.msra.gmra.mxu1 %vm4805_vm4, %v20765_v18  ;;  %18786 = vmatprep.subr.mxu0 %v22172_v35 }
 0x5f3   :  { %18783 = vmatprep.mubr.msk.f32.mxu1 %vm18969_vm2, %v22172_v35  ;;  %18782 = vmatpush3.msra.mxu1 %v17415_v61 }
 0x5f4   :  { %18791 = vmatprep.subr.mxu1 %v22172_v35 }
 0x5fd   :  { %v18375_v43 = vpop.f32.mrf.mxu1 }
 0x5fe   :  { %v9182_v13 = vmul.f32 2.0, %v18375_v43 }
 0x5ff   :  { %v9172_v38 = vpop.f32.mrf.mxu1 }
 0x600   :  { %v21581_v4 = vsub.f32 %v9182_v13, %v20791_v49  ;;  %v9181_v50 = vmul.f32 2.0, %v9172_v38 }
 0x601   :  { %v9360_v18 = vpop.f32.mrf.mxu1 }
 0x602   :  { %v21588_v47 = vsub.f32 %v9181_v50, %v20796_v9  ;;  %15252 = vrot.lane.b32.xlu1 %v21581_v4, %s18972_s30 }
 0x603   :  { %v18385_v34 = vpop.f32.mrf.mxu1 }
 0x604   :  { %15250 = vrot.lane.b32.xlu0 %v21588_v47, %s18972_s30 }
 0x605   :  { %v9506_v49 = vpop.f32.mrf.mxu1 }
 0x607   :  { %v18395_v26 = vpop.f32.mrf.mxu1 }
 0x609   :  { %v9652_v37 = vpop.f32.mrf.mxu1 }
 0x60b   :  { %v18405_v44 = vpop.f32.mrf.mxu1 }
 0x60d   :  { %v9798_v62 = vpop.f32.mrf.mxu1 }
 0x60f   :  { %v18415_v55 = vpop.f32.mrf.mxu1 }
 0x611   :  { %v9944_v2 = vpop.f32.mrf.mxu1 }
 0x613   :  { %v18425_v27 = vpop.f32.mrf.mxu1 }
 0x615   :  { %v10090_v17 = vpop.f32.mrf.mxu1 }
 0x617   :  { %v18435_v9 = vpop.f32.mrf.mxu1 }
 0x619   :  { %v10236_v12 = vpop.f32.mrf.mxu1 }
 0x61b   :  { %v18445_v28 = vpop.f32.mrf.mxu1 }
 0x61d   :  { %v10382_v33 = vpop.f32.mrf.mxu1 }
 0x61f   :  { %v18455_v29 = vpop.f32.mrf.mxu1 }
 0x621   :  { %v10528_v48 = vpop.f32.mrf.mxu1 }
 0x622   :  { %v10529_v36 = vadd.f32 %v10528_v48, %v9360_v18 }
 0x623   :  { %v18465_v41 = vpop.f32.mrf.mxu1 }
 0x625   :  { %v10674_v24 = vpop.f32.mrf.mxu1 }
 0x626   :  { %v10675_v11 = vadd.f32 %v10674_v24, %v9506_v49 }
 0x627   :  { %v18475_v1 = vpop.f32.mrf.mxu1 }
 0x629   :  { %v10820_v22 = vpop.f32.mrf.mxu1 }
 0x62a   :  { %v10821_v58 = vadd.f32 %v10820_v22, %v9652_v37 }
 0x62b   :  { %v18485_v59 = vpop.f32.mrf.mxu1 }
 0x62d   :  { %v10966_v10 = vpop.f32.mrf.mxu1 }
 0x62e   :  { %v10967_v21 = vadd.f32 %v10966_v10, %v9798_v62 }
 0x62f   :  { %v18495_v43 = vpop.f32.mrf.mxu1 }
 0x631   :  { %v11112_v13 = vpop.f32.mrf.mxu1 }
 0x632   :  { %v11113_v15 = vadd.f32 %v11112_v13, %v9944_v2 }
 0x633   :  { %v18505_v38 = vpop.f32.mrf.mxu1 }
 0x635   :  { %v11258_v50 = vpop.f32.mrf.mxu1 }
 0x636   :  { %v11259_v61 = vadd.f32 %v11258_v50, %v10090_v17 }
 0x637   :  { %v18515_v34 = vpop.f32.mrf.mxu1 }
 0x639   :  { %v11404_v26 = vpop.f32.mrf.mxu1 }
 0x63a   :  { %v11405_v44 = vadd.f32 %v11404_v26, %v10236_v12 }
 0x63b   :  { %v18525_v55 = vpop.f32.mrf.mxu1 }
 0x63d   :  { %v11550_v18 = vpop.f32.mrf.mxu1 }
 0x63e   :  { %v11551_v27 = vadd.f32 %v11550_v18, %v10382_v33 }
 0x63f   :  { %v18535_v9 = vpop.f32.mrf.mxu1 }
 0x641   :  { %v11713_v49 = vpop.f32.mrf.mxu1 }
 0x642   :  { %v21595_v28 = vadd.f32 %v11713_v49, %v10529_v36 }
 0x643   :  { %v18545_v37 = vpop.f32.mrf.mxu1 }
 0x645   :  { %v11859_v29 = vpop.f32.mrf.mxu1 }
 0x646   :  { %v21597_v48 = vadd.f32 %v11859_v29, %v10675_v11 }
 0x647   :  { %v18555_v62 = vpop.f32.mrf.mxu1 }
 0x649   :  { %v12005_v41 = vpop.f32.mrf.mxu1 }
 0x64a   :  { %v21599_v2 = vadd.f32 %v12005_v41, %v10821_v58 }
 0x64b   :  { %v18565_v24 = vpop.f32.mrf.mxu1 }
 0x64d   :  { %v12151_v17 = vpop.f32.mrf.mxu1 }
 0x64e   :  { %v21601_v1 = vadd.f32 %v12151_v17, %v10967_v21 }
 0x64f   :  { %v18575_v12 = vpop.f32.mrf.mxu1 }
 0x651   :  { %v12297_v22 = vpop.f32.mrf.mxu1 }
 0x652   :  { %v21603_v59 = vadd.f32 %v12297_v22, %v11113_v15 }
 0x653   :  { %v18585_v33 = vpop.f32.mrf.mxu1 }
 0x655   :  { %v12443_v10 = vpop.f32.mrf.mxu1 }
 0x656   :  { %v21605_v36 = vadd.f32 %v12443_v10, %v11259_v61  ;;  %v15256_v61 = vcombine.high %v21588_v47, %v22172_v35 }
 0x657   :  { %v18595_v43 = vpop.f32.mrf.mxu1 }
 0x658   :  { %v15270_v17 = vrot.slane %v15256_v61, %v22170_v14 }
 0x659   :  { %v12589_v13 = vpop.f32.mrf.mxu1 }
 0x65a   :  { %v21607_v11 = vadd.f32 %v12589_v13, %v11405_v44  ;;  %v15263_v44 = vrot.slane %v21588_v47, %v22170_v14  ;;  %v17416_v47 = vld [vmem:[%s21999_s7 + $0x110] sm:$0xff] }
 0x65b   :  { %v18605_v38 = vpop.f32.mrf.mxu1 }
 0x65d   :  { %v12735_v50 = vpop.f32.mrf.mxu1 }
 0x65e   :  { %v21609_v58 = vadd.f32 %v12735_v50, %v11551_v27  ;;  %v17417_v50 = vld [vmem:[%s21999_s7 + $0x118] sm:$0xff] }
 0x65f   :  { %v18615_v34 = vpop.f32.mrf.mxu1 }
 0x674   :  { %v21611_v26 = vpop.f32.mrf.mxu0  ;;  %v15253_v10 = vpop.permute.xlu1 %15252 }
 0x676   :  { %v15251_v21 = vpop.permute.xlu0 %15250  ;;  %v18620_v55 = vpop.f32.mrf.mxu0 }
 0x677   :  { %v21613_v18 = vpop.f32.mrf.mxu1  ;;  %v15271_v15 = vcombine.high %v15251_v21, %v22172_v35  ;;  %v15278_v9 = vrot.slane %v15251_v21, %v22170_v14  ;;  %v17418_v55 = vld [vmem:[%s21999_s7 + $0x120] sm:$0xff] }
 0x678   :  { %v21621_v27 = vpop.f32.mrf.mxu0 }
 0x679   :  { %v18625_v49 = vpop.f32.mrf.mxu1  ;;  %v15285_v37 = vrot.slane %v15271_v15, %v22170_v14  ;;  %v15286_v29 = vcombine.low %v15263_v44, %v15278_v9  ;;  %v15287_v62 = vcombine.high %v15263_v44, %v15278_v9  ;;  %v15344_v15 = vrot.slane %v15253_v10, %v22170_v14 }
 0x67a   :  { %v18630_v41 = vpop.f32.mrf.mxu0 }
 0x67b   :  { %v21624_v24 = vpop.f32.mrf.mxu1  ;;  %v15294_v12 = vrot.slane %v15286_v29, %v22171_v40  ;;  %v15301_v43 = vrot.slane %v15287_v62, %v22171_v40  ;;  %v15302_v13 = vcombine.low %v15270_v17, %v15285_v37  ;;  %v15303_v9 = vcombine.high %v15270_v17, %v15285_v37  ;;  %v17419_v62 = vld [vmem:[%s21999_s7 + $0x128] sm:$0xff]  ;;  %v17420_v17 = vld [vmem:[%s21999_s7 + $0x130] sm:$0xff] }
 0x67c   :  { %v21631_v33 = vpop.f32.mrf.mxu0  ;;  %v15329_v37 = vrot.slane %v21581_v4, %v22170_v14 }
 0x67d   :  { %v18635_v22 = vpop.f32.mrf.mxu1  ;;  %v15318_v38 = vcombine.high %v15294_v12, %v22172_v35  ;;  %18779 = vmatmul.mubr.msk.f32.vlgmr.msra.gmra.mxu0 %vm4805_vm4, %v15294_v12  ;;  %v15310_v49 = vrot.slane %v15302_v13, %v22171_v40  ;;  %v15319_v29 = vcombine.high %v15301_v43, %v22172_v35 }
 0x67e   :  { %v18640_v34 = vpop.f32.mrf.mxu0  ;;  %18787 = vmatpush3.msra.mxu0 %v17416_v47  ;;  %18788 = vmatprep.mubr.msk.f32.mxu0 %vm18969_vm2, %v22172_v35  ;;  %v15337_v47 = vcombine.high %v15253_v10, %v22172_v35  ;;  %v15352_v13 = vcombine.low %v15329_v37, %v15344_v15  ;;  %v17421_v10 = vld [vmem:[%s21999_s7 + $0x138] sm:$0xff] }
 0x67f   :  { %v21639_v21 = vpop.f32.mrf.mxu1  ;;  %18784 = vmatmul.mubr.msk.f32.vlgmr.msra.gmra.mxu1 %vm4805_vm4, %v15318_v38  ;;  %18796 = vmatprep.subr.mxu0 %v22172_v35  ;;  %v15317_v38 = vrot.slane %v15303_v9, %v22171_v40  ;;  %v17422_v9 = vld [vmem:[%s21999_s7 + $0x140] sm:$0xff] }
 0x680   :  { %v21649_v44 = vpop.f32.mrf.mxu0  ;;  %18792 = vmatpush3.msra.mxu1 %v17417_v50  ;;  %18793 = vmatprep.mubr.msk.f32.mxu1 %vm18969_vm2, %v22172_v35  ;;  %v15320_v50 = vcombine.high %v15310_v49, %v22172_v35 }
 0x681   :  { %v18645_v61 = vpop.f32.mrf.mxu1  ;;  %18789 = vmatmul.mubr.msk.f32.vlgmr.msra.gmra.mxu0 %vm4805_vm4, %v15301_v43  ;;  %18801 = vmatprep.subr.mxu1 %v22172_v35 }
 0x682   :  { %v18650_v41 = vpop.f32.mrf.mxu0  ;;  %18797 = vmatpush3.msra.mxu0 %v17418_v55  ;;  %18798 = vmatprep.mubr.msk.f32.mxu0 %vm18969_vm2, %v22172_v35  ;;  %v15322_v61 = vcombine.high %v21581_v4, %v22172_v35  ;;  %v15360_v4 = vrot.slane %v15352_v13, %v22171_v40 }
 0x683   :  { %v21660_v12 = vpop.f32.mrf.mxu1  ;;  %18794 = vmatmul.mubr.msk.f32.vlgmr.msra.gmra.mxu1 %vm4805_vm4, %v15319_v29  ;;  %18806 = vmatprep.subr.mxu0 %v22172_v35  ;;  %v15353_v41 = vcombine.high %v15329_v37, %v15344_v15  ;;  %v17424_v37 = vld [vmem:[%s21999_s7 + $0x150] sm:$0xff] }
 0x684   :  { %v21672_v43 = vpop.f32.mrf.mxu0  ;;  %18802 = vmatpush3.msra.mxu1 %v17419_v62  ;;  %18803 = vmatprep.mubr.msk.f32.mxu1 %vm18969_vm2, %v22172_v35  ;;  %v15336_v15 = vrot.slane %v15322_v61, %v22170_v14  ;;  %v15384_v61 = vcombine.high %v15360_v4, %v22172_v35 }
 0x685   :  { %v18655_v22 = vpop.f32.mrf.mxu1  ;;  %18799 = vmatmul.mubr.msk.f32.vlgmr.msra.gmra.mxu0 %vm4805_vm4, %v15310_v49  ;;  %18811 = vmatprep.subr.mxu1 %v22172_v35  ;;  %v15351_v49 = vrot.slane %v15337_v47, %v22170_v14  ;;  %v17423_v47 = vld [vmem:[%s21999_s7 + $0x148] sm:$0xff] }
 0x686   :  { %v18660_v34 = vpop.f32.mrf.mxu0  ;;  %18807 = vmatpush3.msra.mxu0 %v17420_v17  ;;  %18808 = vmatprep.mubr.msk.f32.mxu0 %vm18969_vm2, %v22172_v35  ;;  %v15321_v17 = vcombine.high %v15317_v38, %v22172_v35 }
 0x687   :  { %v21683_v55 = vpop.f32.mrf.mxu1  ;;  %18804 = vmatmul.mubr.msk.f32.vlgmr.msra.gmra.mxu1 %vm4805_vm4, %v15320_v50  ;;  %18816 = vmatprep.subr.mxu0 %v22172_v35  ;;  %v15368_v34 = vcombine.low %v15336_v15, %v15351_v49 }
 0x688   :  { %v21695_v62 = vpop.f32.mrf.mxu0  ;;  %18812 = vmatpush3.msra.mxu1 %v17421_v10  ;;  %18813 = vmatprep.mubr.msk.f32.mxu1 %vm18969_vm2, %v22172_v35  ;;  %v15367_v10 = vrot.slane %v15353_v41, %v22171_v40  ;;  %v17426_v41 = vld [vmem:[%s21999_s7 + $0x160] sm:$0xff] }
 0x689   :  { %v18665_v29 = vpop.f32.mrf.mxu1  ;;  %18809 = vmatmul.mubr.msk.f32.vlgmr.msra.gmra.mxu0 %vm4805_vm4, %v15317_v38  ;;  %18821 = vmatprep.subr.mxu1 %v22172_v35 }
 0x68a   :  { %v18670_v22 = vpop.f32.mrf.mxu0  ;;  %18817 = vmatpush3.msra.mxu0 %v17422_v9  ;;  %18818 = vmatprep.mubr.msk.f32.mxu0 %vm18969_vm2, %v22172_v35  ;;  %v17425_v9 = vld [vmem:[%s21999_s7 + $0x158] sm:$0xff] }
 0x68b   :  { %v21706_v50 = vpop.f32.mrf.mxu1  ;;  %18814 = vmatmul.mubr.msk.f32.vlgmr.msra.gmra.mxu1 %vm4805_vm4, %v15321_v17  ;;  %18826 = vmatprep.subr.mxu0 %v22172_v35  ;;  %v15369_v22 = vcombine.high %v15336_v15, %v15351_v49  ;;  %v17428_v49 = vld [vmem:[%s21999_s7 + $0x170] sm:$0xff] }
 0x68c   :  { %v21716_v38 = vpop.f32.mrf.mxu0  ;;  %18822 = vmatpush3.msra.mxu1 %v17423_v47  ;;  %18823 = vmatprep.mubr.msk.f32.mxu1 %vm18969_vm2, %v22172_v35 }
 0x68d   :  { %v18675_v13 = vpop.f32.mrf.mxu1  ;;  %18819 = vmatmul.mubr.msk.f32.vlgmr.msra.gmra.mxu0 %vm4805_vm4, %v15360_v4  ;;  %18831 = vmatprep.subr.mxu1 %v22172_v35 }
 0x68e   :  { %v18680_v29 = vpop.f32.mrf.mxu0  ;;  %18827 = vmatpush3.msra.mxu0 %v17424_v37  ;;  %18828 = vmatprep.mubr.msk.f32.mxu0 %vm18969_vm2, %v22172_v35  ;;  %v15376_v37 = vrot.slane %v15368_v34, %v22171_v40  ;;  %v15385_v13 = vcombine.high %v15367_v10, %v22172_v35  ;;  %v15383_v34 = vrot.slane %v15369_v22, %v22171_v40 }
 0x68f   :  { %v21727_v17 = vpop.f32.mrf.mxu1  ;;  %18824 = vmatmul.mubr.msk.f32.vlgmr.msra.gmra.mxu1 %vm4805_vm4, %v15384_v61  ;;  %18836 = vmatprep.subr.mxu0 %v22172_v35  ;;  %v17427_v61 = vld [vmem:[%s21999_s7 + $0x168] sm:$0xff] }
 0x690   :  { %v21736_v47 = vpop.f32.mrf.mxu0  ;;  %18832 = vmatpush3.msra.mxu1 %v17425_v9  ;;  %18833 = vmatprep.mubr.msk.f32.mxu1 %vm18969_vm2, %v22172_v35  ;;  %v15386_v9 = vcombine.high %v15376_v37, %v22172_v35 }
 0x691   :  { %v18685_v4 = vpop.f32.mrf.mxu1  ;;  %18829 = vmatmul.mubr.msk.f32.vlgmr.msra.gmra.mxu0 %vm4805_vm4, %v15367_v10  ;;  %18841 = vmatprep.subr.mxu1 %v22172_v35 }
 0x692   :  { %v18690_v29 = vpop.f32.mrf.mxu0  ;;  %18837 = vmatpush3.msra.mxu0 %v17426_v41  ;;  %18838 = vmatprep.mubr.msk.f32.mxu0 %vm18969_vm2, %v22172_v35 }
 0x693   :  { %v21747_v4 = vpop.f32.mrf.mxu1  ;;  %18834 = vmatmul.mubr.msk.f32.vlgmr.msra.gmra.mxu1 %vm4805_vm4, %v15385_v13  ;;  %18846 = vmatprep.subr.mxu0 %v22172_v35  ;;  %v17429_v13 = vld [vmem:[%s21999_s7 + $0x178] sm:$0xff] }
 0x694   :  { %v14164_v10 = vpop.f32.mrf.mxu0  ;;  %18842 = vmatpush3.msra.mxu1 %v17427_v61  ;;  %18843 = vmatprep.mubr.msk.f32.mxu1 %vm18969_vm2, %v22172_v35 }
 0x695   :  { %v18695_v15 = vpop.f32.mrf.mxu1  ;;  %v21761_v41 = vadd.f32 %v14164_v10, %v21611_v26  ;;  %18839 = vmatmul.mubr.msk.f32.vlgmr.msra.gmra.mxu0 %vm4805_vm4, %v15376_v37  ;;  %18851 = vmatprep.subr.mxu1 %v22172_v35  ;;  %v15387_v37 = vcombine.high %v15383_v34, %v22172_v35 }
 0x696   :  { %v18700_v29 = vpop.f32.mrf.mxu0  ;;  %18847 = vmatpush3.msra.mxu0 %v17428_v49  ;;  %18848 = vmatprep.mubr.msk.f32.mxu0 %vm18969_vm2, %v22172_v35 }
 0x697   :  { %v14236_v61 = vpop.f32.mrf.mxu1  ;;  %18844 = vmatmul.mubr.msk.f32.vlgmr.msra.gmra.mxu1 %vm4805_vm4, %v15386_v9 }
 0x698   :  { %v21771_v22 = vadd.f32 %v14236_v61, %v21613_v18  ;;  %v14308_v15 = vpop.f32.mrf.mxu0  ;;  %18852 = vmatpush3.msra.mxu1 %v17429_v13  ;;  %18853 = vmatprep.mubr.msk.f32.mxu1 %vm18969_vm2, %v22172_v35 }
 0x699   :  { %v18705_v26 = vpop.f32.mrf.mxu1  ;;  %v21778_v10 = vadd.f32 %v14308_v15, %v21621_v27  ;;  %18849 = vmatmul.mubr.msk.f32.vlgmr.msra.gmra.mxu0 %vm4805_vm4, %v15383_v34 }
 0x69a   :  { %v18710_v49 = vpop.f32.mrf.mxu0 }
 0x69b   :  { %v14380_v29 = vpop.f32.mrf.mxu1  ;;  %18854 = vmatmul.mubr.msk.f32.vlgmr.msra.gmra.mxu1 %vm4805_vm4, %v15387_v37 }
 0x69c   :  { %v21782_v18 = vadd.f32 %v14380_v29, %v21624_v24  ;;  %v14452_v61 = vpop.f32.mrf.mxu0 }
 0x69d   :  { %v18715_v9 = vpop.f32.mrf.mxu1  ;;  %v21786_v13 = vadd.f32 %v14452_v61, %v21631_v33 }
 0x69e   :  { %v18720_v26 = vpop.f32.mrf.mxu0 }
 0x69f   :  { %v14524_v60 = vpop.f32.mrf.mxu1 }
 0x6a0   :  { %v21789_v35 = vadd.f32 %v14524_v60, %v21639_v21  ;;  %v14596_v15 = vpop.f32.mrf.mxu0 }
 0x6a1   :  { %v18725_v27 = vpop.f32.mrf.mxu1  ;;  %v21792_v34 = vadd.f32 %v14596_v15, %v21649_v44 }
 0x6a2   :  { %v18730_v49 = vpop.f32.mrf.mxu0 }
 0x6a3   :  { %v14668_v24 = vpop.f32.mrf.mxu1 }
 0x6a4   :  { %v21795_v29 = vadd.f32 %v14668_v24, %v21660_v12  ;;  %v14740_v9 = vpop.f32.mrf.mxu0 }
 0x6a5   :  { %v18735_v37 = vpop.f32.mrf.mxu1  ;;  %v21798_v33 = vadd.f32 %v14740_v9, %v21672_v43 }
 0x6a6   :  { %v18740_v61 = vpop.f32.mrf.mxu0 }
 0x6a7   :  { %v14812_v26 = vpop.f32.mrf.mxu1 }
 0x6a8   :  { %v21801_v60 = vadd.f32 %v14812_v26, %v21683_v55  ;;  %v14884_v27 = vpop.f32.mrf.mxu0 }
 0x6a9   :  { %v18745_v21 = vpop.f32.mrf.mxu1  ;;  %v21804_v44 = vadd.f32 %v14884_v27, %v21695_v62 }
 0x6aa   :  { %v18750_v15 = vpop.f32.mrf.mxu0 }
 0x6ab   :  { %v14956_v49 = vpop.f32.mrf.mxu1 }
 0x6ac   :  { %v21807_v12 = vadd.f32 %v14956_v49, %v21706_v50  ;;  %v15028_v37 = vpop.f32.mrf.mxu0 }
 0x6ad   :  { %v18755_v24 = vpop.f32.mrf.mxu1  ;;  %v21810_v43 = vadd.f32 %v15028_v37, %v21716_v38  ;;  %v16605_v38 = vld [vmem:[%s22000_s8] sm:$0xff] }
 0x6ae   :  { %v18760_v9 = vpop.f32.mrf.mxu0  ;;  %v16616_v24 = vrot.slane %v16605_v38, %v20510_v6  ;;  %v16609_v37 = vcombine.high %v16605_v38, %v16605_v38 }
 0x6af   :  { %v15100_v61 = vpop.f32.mrf.mxu1 }
 0x6b0   :  { %v21813_v55 = vadd.f32 %v15100_v61, %v21727_v17  ;;  %v15172_v21 = vpop.f32.mrf.mxu0  ;;  %v16624_v17 = vcombine.high %v16616_v24, %v16616_v24  ;;  %v16632_v9 = vrot.slane %v16616_v24, %v20510_v6  ;;  %v16623_v61 = vrot.slane %v16609_v37, %v20510_v6  ;;  %v16606_v37 = vld [vmem:[%s22000_s8 + $0x8] sm:$0xff] }
 0x6b1   :  { %v18765_v26 = vpop.f32.mrf.mxu1  ;;  %v21816_v62 = vadd.f32 %v15172_v21, %v21736_v47 }
 0x6b2   :  { %v18770_v27 = vpop.f32.mrf.mxu0  ;;  %v16646_v47 = vrot.slane %v16624_v17, %v20510_v6  ;;  %v16625_v39 = vcombine.high %v16623_v61, %v16623_v61 }
 0x6b3   :  { %v15244_v15 = vpop.f32.mrf.mxu1  ;;  %v16654_v27 = vcombine.high %v16632_v9, %v16632_v9 }
 0x6b4   :  { %v21819_v50 = vadd.f32 %v15244_v15, %v21747_v4  ;;  %v16710_v4 = vrot.slane %v16632_v9, %v20531_v53  ;;  %v16656_v3 = vcombine.high %v16646_v47, %v16646_v47  ;;  %v16714_v24 = vrot.slane %v16646_v47, %v20531_v53 }
 0x6b5   :  { %v18775_v49 = vpop.f32.mrf.mxu1  ;;  %v16718_v47 = vrot.slane %v16654_v27, %v20531_v53  ;;  %v16653_v54 = vrot.slane %v16625_v39, %v20510_v6 }
 0x73d   :  { %v15474_v26 = vpop.f32.mrf.mxu0 }
 0x73e   :  { %v16573_v21 = vadd.f32 %v15474_v26, %v21761_v41  ;;  %v16639_v41 = vrot.slane %v16623_v61, %v20510_v6  ;;  %v22221_v26 = vld [vmem:[#allocation60_spill] sm:$0xff]  ;;  %v16665_v61 = vrot.slane %v16606_v37, %v20510_v6 }
 0x73f   :  { %v18780_v15 = vpop.f32.mrf.mxu0  ;;  %v15547_v49 = vpop.f32.mrf.mxu1  ;;  %v21839_v9 = vmul.f32 %v20656_v16, %v22221_v26  ;;  %v21850_v26 = vmul.f32 %v20658_v5, %v22222_v8 }
 0x740   :  { %v16589_v40 = vadd.f32 %v16573_v21, %v21213_v0  ;;  %v16574_v38 = vadd.f32 %v15547_v49, %v21771_v22  ;;  %v16726_v27 = vrot.slane %v16639_v41, %v20531_v53 }
 0x741   :  { %v18785_v17 = vpop.f32.mrf.mxu1  ;;  %v15620_v52 = vpop.f32.mrf.mxu0 }
 0x742   :  { %v16787_v31 = vadd.f32 %v16710_v4, %v16589_v40  ;;  %v16590_v0 = vadd.f32 %v16574_v38, %v21595_v28  ;;  %v16575_v22 = vadd.f32 %v15620_v52, %v21778_v10  ;;  %v16722_v17 = vrot.slane %v16656_v3, %v20531_v53  ;;  %v22223_v3 = vld [vmem:[#allocation62_spill] sm:$0xff] }
 0x743   :  { %v18790_v21 = vpop.f32.mrf.mxu0  ;;  %v15693_v49 = vpop.f32.mrf.mxu1  ;;  %v16655_v38 = vcombine.high %v16639_v41, %v16639_v41  ;;  %v21857_v39 = vmul.f32 %v20663_v45, %v22223_v3 }
 0x744   :  { %18932 = vtanh.f32 %v16787_v31  ;;  %v16788_v40 = vadd.f32 %v16714_v24, %v16590_v0  ;;  %v16591_v28 = vadd.f32 %v16575_v22, %v21225_v23  ;;  %v16576_v52 = vadd.f32 %v15693_v49, %v21782_v18 }
 0x745   :  { %v18795_v10 = vpop.f32.mrf.mxu1  ;;  %v15766_v4 = vpop.f32.mrf.mxu0  ;;  %v16730_v18 = vrot.slane %v16653_v54, %v20531_v53  ;;  %v16657_v22 = vcombine.high %v16653_v54, %v16653_v54  ;;  %v16673_v49 = vcombine.high %v16665_v61, %v16665_v61  ;;  %v16837_v54 = vsub.f32 1.0, %v20663_v45 }
 0x746   :  { %18934 = vtanh.f32 %v16788_v40  ;;  %v16789_v8 = vadd.f32 %v16718_v47, %v16591_v28  ;;  %v16592_v31 = vadd.f32 %v16576_v52, %v21597_v48  ;;  %v16577_v24 = vadd.f32 %v15766_v4, %v21786_v13  ;;  %v22224_v13 = vld [vmem:[#allocation63_spill] sm:$0xff] }
 0x747   :  { %v18800_v23 = vpop.f32.mrf.mxu0  ;;  %v15839_v0 = vpop.f32.mrf.mxu1  ;;  %v16658_v10 = vcombine.high %v16606_v37, %v16606_v37  ;;  %v16734_v47 = vrot.slane %v16655_v38, %v20531_v53  ;;  %v16681_v48 = vrot.slane %v16665_v61, %v20510_v6  ;;  %v21869_v28 = vmul.f32 %v20666_v30, %v22224_v13  ;;  %v22226_v13 = vld [vmem:[#allocation65_spill] sm:$0xff] }
 0x748   :  { %18936 = vtanh.f32 %v16789_v8  ;;  %v16790_v41 = vadd.f32 %v16722_v17, %v16592_v31  ;;  %v16593_v3 = vadd.f32 %v16577_v24, %v21237_v63  ;;  %v16578_v15 = vadd.f32 %v15839_v0, %v21789_v35  ;;  %v22225_v23 = vld [vmem:[#allocation64_spill] sm:$0xff] }
 0x749   :  { %v18805_v21 = vpop.f32.mrf.mxu1  ;;  %v15912_v40 = vpop.f32.mrf.mxu0  ;;  %v16738_v4 = vrot.slane %v16657_v22, %v20531_v53  ;;  %v16695_v38 = vrot.slane %v16673_v49, %v20510_v6  ;;  %v16672_v61 = vrot.slane %v16658_v10, %v20510_v6  ;;  %v21883_v0 = vmul.f32 %v20671_v46, %v22225_v23 }
 0x74a   :  { %18938 = vtanh.f32 %v16790_v41  ;;  %v16791_v37 = vadd.f32 %v16726_v27, %v16593_v3  ;;  %v16594_v17 = vadd.f32 %v16578_v15, %v21599_v2  ;;  %v16579_v63 = vadd.f32 %v15912_v40, %v21792_v34 }
 0x74b   :  { %v18810_v52 = vpop.f32.mrf.mxu0  ;;  %v15985_v35 = vpop.f32.mrf.mxu1  ;;  %v16838_v21 = vsub.f32 1.0, %v20666_v30  ;;  %v16742_v34 = vrot.slane %v16681_v48, %v20531_v53  ;;  %v16703_v15 = vcombine.high %v16681_v48, %v16681_v48  ;;  %v16839_v22 = vsub.f32 1.0, %v20671_v46 }
 0x74c   :  { %18940 = vtanh.f32 %v16791_v37  ;;  %v16792_v8 = vadd.f32 %v16730_v18, %v16594_v17  ;;  %v16595_v31 = vadd.f32 %v16579_v63, %v21249_v19  ;;  %v16580_v27 = vadd.f32 %v15985_v35, %v21795_v29 }
 0x74d   :  { %v18815_v24 = vpop.f32.mrf.mxu1  ;;  %v16058_v2 = vpop.f32.mrf.mxu0  ;;  %v16746_v29 = vrot.slane %v16695_v38, %v20531_v53  ;;  %v16705_v3 = vcombine.high %v16695_v38, %v16695_v38  ;;  %v16674_v40 = vcombine.high %v16672_v61, %v16672_v61  ;;  %v21891_v48 = vmul.f32 %v20674_v57, %v22226_v13 }
 0x74e   :  { %18942 = vtanh.f32 %v16792_v8  ;;  %v16793_v49 = vadd.f32 %v16734_v47, %v16595_v31  ;;  %v16596_v10 = vadd.f32 %v16580_v27, %v21601_v1  ;;  %v16581_v18 = vadd.f32 %v16058_v2, %v21798_v33  ;;  %v22227_v8 = vld [vmem:[#allocation66_spill] sm:$0xff] }
 0x74f   :  { %v18820_v19 = vpop.f32.mrf.mxu0  ;;  %v16131_v41 = vpop.f32.mrf.mxu1  ;;  %v16750_v33 = vrot.slane %v16703_v15, %v20531_v53  ;;  %v16688_v35 = vrot.slane %v16672_v61, %v20510_v6  ;;  %v21899_v38 = vmul.f32 %v20716_v56, %v22227_v8  ;;  %v16840_v31 = vsub.f32 1.0, %v20674_v57 }
 0x750   :  { %18944 = vtanh.f32 %v16793_v49  ;;  %v16794_v37 = vadd.f32 %v16738_v4, %v16596_v10  ;;  %v16597_v17 = vadd.f32 %v16581_v18, %v21261_v42  ;;  %v16582_v47 = vadd.f32 %v16131_v41, %v21801_v60 }
 0x751   :  { %v18933_v63 = vpop.eup %18932  ;;  %v18825_v1 = vpop.f32.mrf.mxu1  ;;  %v16754_v23 = vrot.slane %v16705_v3, %v20531_v53  ;;  %v16702_v15 = vrot.slane %v16674_v40, %v20510_v6  ;;  %v16841_v61 = vsub.f32 1.0, %v20716_v56  ;;  %v22228_v49 = vsub.f32 1.0, %v20656_v16 }
 0x752   :  { %v16204_v52 = vpop.f32.mrf.mxu0  ;;  %18946 = vtanh.f32 %v16794_v37  ;;  %v16795_v27 = vadd.f32 %v16742_v34, %v16597_v17  ;;  %v16598_v4 = vadd.f32 %v16582_v47, %v21603_v59  ;;  %v16758_v13 = vrot.slane %v16688_v35, %v20531_v53 }
 0x753   :  { %v16583_v42 = vadd.f32 %v16204_v52, %v21804_v44  ;;  %v18935_v60 = vpop.eup %18934  ;;  %v16277_v2 = vpop.f32.mrf.mxu1  ;;  %v16851_v10 = vmul.f32 %v18933_v63, %v22228_v49  ;;  %v16704_v37 = vcombine.high %v16688_v35, %v16688_v35  ;;  %v22229_v3 = vsub.f32 1.0, %v20658_v5 }
 0x754   :  { %v18830_v24 = vpop.f32.mrf.mxu0  ;;  %18948 = vtanh.f32 %v16795_v27  ;;  %v16796_v18 = vadd.f32 %v16746_v29, %v16598_v4  ;;  %v16584_v59 = vadd.f32 %v16277_v2, %v21807_v12  ;;  %v16762_v47 = vrot.slane %v16702_v15, %v20531_v53  ;;  %v22230_v27 = vld [vmem:[#allocation67_spill] sm:$0xff] }
 0x755   :  { %v16599_v34 = vadd.f32 %v16583_v42, %v21273_v51  ;;  %v18937_v19 = vpop.eup %18936  ;;  %v18835_v44 = vpop.f32.mrf.mxu1  ;;  %v16852_v6 = vmul.f32 %v18935_v60, %v22229_v3  ;;  %v16867_v56 = vadd.f32 %v16851_v10, %v21839_v9  ;;  %v16706_v63 = vcombine.high %v16702_v15, %v16702_v15 }
 0x756   :  { %v16350_v41 = vpop.f32.mrf.mxu0  ;;  %18950 = vtanh.f32 %v16796_v18  ;;  %v16600_v40 = vadd.f32 %v16584_v59, %v21605_v36  ;;  %v16853_v1 = vmul.f32 %v18937_v19, %v16837_v54  ;;  %v16766_v8 = vrot.slane %v16704_v37, %v20531_v53 }
 0x757   :  { %v16797_v16 = vadd.f32 %v16750_v33, %v16599_v34  ;;  %v16585_v29 = vadd.f32 %v16350_v41, %v21810_v43  ;;  %v18939_v51 = vpop.eup %18938  ;;  %v16423_v12 = vpop.f32.mrf.mxu1  ;;  %v16868_v5 = vadd.f32 %v16852_v6, %v21850_v26  ;;  %v16826_v4 = vmul.f32 %v20720_v32, %v22230_v27 }
 0x758   :  { %v18840_v17 = vpop.f32.mrf.mxu0  ;;  %v16798_v52 = vadd.f32 %v16754_v23, %v16600_v40  ;;  %v16586_v33 = vadd.f32 %v16423_v12, %v21813_v55  ;;  %v16854_v45 = vmul.f32 %v18939_v51, %v16838_v21  ;;  %v16869_v54 = vadd.f32 %v16853_v1, %v21857_v39  ;;  %v22234_v51 = vld [vmem:[#allocation69_spill] sm:$0xff] }
 0x759   :  { %18952 = vtanh.f32 %v16797_v16  ;;  %v16601_v9 = vadd.f32 %v16585_v29, %v21285_v7  ;;  %v18941_v36 = vpop.eup %18940  ;;  %v18845_v35 = vpop.f32.mrf.mxu1  ;;  %v16770_v2 = vrot.slane %v16706_v63, %v20531_v53  ;;  %v22233_v16 = vld [vmem:[#allocation53_spill] sm:$0xff]  ;;  %v16845_v17 = vsub.f32 1.0, %v22234_v51  ;;  %v22235_v63 = vld [vmem:[#allocation54_spill] sm:$0xff] }
 0x75a   :  { %v16496_v43 = vpop.f32.mrf.mxu0  ;;  %18954 = vtanh.f32 %v16798_v52  ;;  %v16602_v42 = vadd.f32 %v16586_v33, %v21607_v11  ;;  %v16855_v23 = vmul.f32 %v18941_v36, %v16839_v22  ;;  %v16870_v15 = vadd.f32 %v16854_v45, %v21869_v28 }
 0x75b   :  { %v16799_v26 = vadd.f32 %v16758_v13, %v16601_v9  ;;  %v16587_v7 = vadd.f32 %v16496_v43, %v21816_v62  ;;  %v18943_v55 = vpop.eup %18942  ;;  %v16569_v24 = vpop.f32.mrf.mxu1  ;;  %v16883_v30 = vcombine.low %v16867_v56, %v16869_v54  ;;  %v16842_v62 = vsub.f32 1.0, %v20720_v32  ;;  %v22231_v13 = vld [vmem:[#allocation52_spill] sm:$0xff]  ;;  %v22237_v43 = vld [vmem:[#allocation55_spill] sm:$0xff] }
 0x75c   :  { %v18850_v60 = vpop.f32.mrf.mxu0  ;;  %v16800_v21 = vadd.f32 %v16762_v47, %v16602_v42  ;;  %v16588_v49 = vadd.f32 %v16569_v24, %v21819_v50  ;;  %v16856_v18 = vmul.f32 %v18943_v55, %v16840_v31  ;;  %v16871_v53 = vadd.f32 %v16855_v23, %v21883_v0 }
 0x75d   :  { %18956 = vtanh.f32 %v16799_v26  ;;  %v16603_v39 = vadd.f32 %v16587_v7, %v21297_v20  ;;  %v18945_v11 = vpop.eup %18944  ;;  %v18855_v10 = vpop.f32.mrf.mxu1  ;;  %v16891_v46 = vcombine.low %v16868_v5, %v16870_v15  ;;  %v16890_v50 = vrot.slane %v16883_v30, %v22170_v14  ;;  %v22239_v7 = vld [vmem:[#allocation3_spill] sm:$0xff]  ;;  %v22240_v60 = vld [vmem:[#allocation56_spill] sm:$0xff] }
 0x75e   :  { %18958 = vtanh.f32 %v16800_v21  ;;  %v16604_v28 = vadd.f32 %v16588_v49, %v21609_v58  ;;  %v16857_v34 = vmul.f32 %v18945_v11, %v16841_v61  ;;  %v16872_v20 = vadd.f32 %v16856_v18, %v21891_v48  ;;  %v22232_v61 = vld [vmem:[#allocation68_spill] sm:$0xff]  ;;  %v22242_v11 = vld [vmem:[#allocation57_spill] sm:$0xff] }
 0x75f   :  { %v16801_v22 = vadd.f32 %v16766_v8, %v16603_v39  ;;  %v18947_v59 = vpop.eup %18946  ;;  %v16898_v19 = vrot.slane %v16891_v46, %v22170_v14  ;;  %v16843_v32 = vsub.f32 1.0, %v20680_v25  ;;  %v16827_v58 = vmul.f32 %v20680_v25, %v22231_v13  ;;  %v22236_v25 = vld [vmem:[#allocation70_spill] sm:$0xff]  ;;  %v22243_v18 = vld [vmem:[#allocation73_spill] sm:$0xff]  ;;  %v22246_v13 = vld [vmem:[#allocation59_spill] sm:$0xff] }
 0x760   :  { %v16802_v57 = vadd.f32 %v16770_v2, %v16604_v28  ;;  %v16858_v31 = vmul.f32 %v18947_v59, %v16842_v62  ;;  %v16873_v0 = vadd.f32 %v16857_v34, %v21899_v38  ;;  %v16844_v37 = vsub.f32 1.0, %v22232_v61  ;;  %v22241_v2 = vld [vmem:[#allocation72_spill] sm:$0xff] }
 0x761   :  { %18960 = vtanh.f32 %v16801_v22  ;;  %v18949_v44 = vpop.eup %18948  ;;  %v16915_v41 = vcombine.low %v16890_v50, %v16898_v19  ;;  %v16828_v40 = vmul.f32 %v22232_v61, %v22233_v16  ;;  %v16829_v1 = vmul.f32 %v22234_v51, %v22235_v63  ;;  %v22245_v19 = vld [vmem:[#allocation74_spill] sm:$0xff] }
 0x762   :  { %18962 = vtanh.f32 %v16802_v57  ;;  %v16874_v48 = vadd.f32 %v16858_v31, %v16826_v4  ;;  %v16899_v3 = vcombine.low %v16871_v53, %v16873_v0  ;;  %v16859_v6 = vmul.f32 %v18949_v44, %v16843_v32  ;;  %v22238_v4 = vld [vmem:[#allocation71_spill] sm:$0xff] }
 0x763   :  { %v18951_v56 = vpop.eup %18950  ;;  %v16846_v5 = vsub.f32 1.0, %v22236_v25  ;;  %v16830_v8 = vmul.f32 %v22236_v25, %v22237_v43  ;;  %v16847_v45 = vsub.f32 1.0, %v22238_v4  ;;  %v16922_v55 = vrot.slane %v16915_v41, %v22239_v7 }
 0x764   :  { %v16907_v29 = vcombine.low %v16872_v20, %v16874_v48  ;;  %v16860_v12 = vmul.f32 %v18951_v56, %v16844_v37  ;;  %v16875_v38 = vadd.f32 %v16859_v6, %v16827_v58  ;;  %v16906_v52 = vrot.slane %v16899_v3, %v22170_v14  ;;  %v22244_v20 = vld [vmem:[#allocation58_spill] sm:$0xff] }
 0x765   :  { %v16831_v24 = vmul.f32 %v22238_v4, %v22240_v60  ;;  %v16848_v23 = vsub.f32 1.0, %v22241_v2  ;;  %v16832_v10 = vmul.f32 %v22241_v2, %v22242_v11  ;;  %v16849_v53 = vsub.f32 1.0, %v22243_v18 }
 0x766   :  { %v18953_v47 = vpop.eup %18952  ;;  %v16914_v9 = vrot.slane %v16907_v29, %v22170_v14  ;;  %v16876_v36 = vadd.f32 %v16860_v12, %v16828_v40  ;;  %v16833_v50 = vmul.f32 %v22243_v18, %v22244_v20  ;;  %v16850_v32 = vsub.f32 1.0, %v22245_v19 }
 0x767   :  { %v16861_v33 = vmul.f32 %v18953_v47, %v16845_v17  ;;  %v18955_v35 = vpop.eup %18954  ;;  %v16834_v58 = vmul.f32 %v22245_v19, %v22246_v13 }
 0x768   :  { %v16923_v27 = vcombine.low %v16906_v52, %v16914_v9  ;;  %v16862_v54 = vmul.f32 %v18955_v35, %v16846_v5 }
 0x769   :  { %v16877_v26 = vadd.f32 %v16861_v33, %v16829_v1 }
 0x76a   :  { %v18957_v42 = vpop.eup %18956  ;;  %v16930_v15 = vrot.slane %v16923_v27, %v22239_v7  ;;  %v16878_v21 = vadd.f32 %v16862_v54, %v16830_v8 }
 0x76b   :  { %v16863_v30 = vmul.f32 %v18957_v42, %v16847_v45  ;;  %v16933_v39 = vcombine.low %v16875_v38, %v16877_v26  ;;  %v18959_v49 = vpop.eup %18958 }
 0x76c   :  { %v16932_v62 = vcombine.high %v16922_v55, %v16930_v15  ;;  %v16864_v46 = vmul.f32 %v18959_v49, %v16848_v23  ;;  %v16941_v34 = vcombine.low %v16876_v36, %v16878_v21  ;;  %v16931_v59 = vcombine.low %v16922_v55, %v16930_v15 }
 0x76d   :  { %v16879_v22 = vadd.f32 %v16863_v30, %v16831_v24  ;;  %v16940_v44 = vrot.slane %v16933_v39, %v22170_v14 }
 0x76e   :  { %v18961_v28 = vpop.eup %18960  ;;  %16985 = vrot.lane.b32.xlu0 %v16932_v62, %s18973_s1  ;;  %v16880_v31 = vadd.f32 %v16864_v46, %v16832_v10  ;;  %v16948_v41 = vrot.slane %v16941_v34, %v22170_v14 }
 0x76f   :  { %v16865_v57 = vmul.f32 %v18961_v28, %v16849_v53  ;;  %v18963_v0 = vpop.eup %18962 }
 0x770   :  { %v16866_v61 = vmul.f32 %v18963_v0, %v16850_v32  ;;  %v16965_v48 = vcombine.low %v16940_v44, %v16948_v41 }
 0x771   :  { %v16881_v37 = vadd.f32 %v16865_v57, %v16833_v50 }
 0x772   :  { %v16882_v3 = vadd.f32 %v16866_v61, %v16834_v58  ;;  %v16972_v51 = vrot.slane %v16965_v48, %v22239_v7 }
 0x773   :  { %v16949_v6 = vcombine.low %v16879_v22, %v16881_v37 }
 0x774   :  { %v16957_v56 = vcombine.low %v16880_v31, %v16882_v3 }
 0x775   :  { %v16956_v16 = vrot.slane %v16949_v6, %v22170_v14 }
 0x776   :  { %v16964_v40 = vrot.slane %v16957_v56, %v22170_v14 }
 0x778   :  { %v16973_v29 = vcombine.low %v16956_v16, %v16964_v40 }
 0x77a   :  { %v16980_v17 = vrot.slane %v16973_v29, %v22239_v7 }
 0x77c   :  { %v16982_v12 = vcombine.high %v16972_v51, %v16980_v17  ;;  %v16981_v38 = vcombine.low %v16972_v51, %v16980_v17 }
 0x77e   :  { %16987 = vrot.lane.b32.xlu1 %v16982_v12, %s18973_s1 }
 0x7e0   :  { %v16986_v47 = vpop.permute.xlu0 %16985 }
 0x7e1   :  { %v16991_v63 = vsel %vm4805_vm4, %v16931_v59, %v16986_v47 }
 0x7e2   :  { %16993 = vst.msk [vmem:[%s22001_s9] sm:$0xff] %vm38_vm0, %v16991_v63 }
 0x7f0   :  { %v16988_v1 = vpop.permute.xlu1 %16987 }
 0x7f1   :  { %v16992_v14 = vsel %vm4805_vm4, %v16981_v38, %v16988_v1 }
 0x7f2   :  { %16994 = vst.msk [vmem:[%s22001_s9 + $0x8] sm:$0xff] %vm38_vm0, %v16992_v14 }

</bundles_post_ra>
